<compile_context>
chip_gen: v6e
topology: v6e:2x2x1
jax: 0.10.0
libtpu: 0.0.40
codegen_flags: <defaults>
</compile_context>

<pallas_src>
import numpy as np
import jax
import jax.numpy as jnp
from jax.experimental import pallas as pl
from jax.experimental.pallas import tpu as pltpu

# ----------------------------- model config ---------------------------------
VOCAB = 16
DIM_MODEL = 32          # = DIM_KEY * NB_HEADS
NB_HEADS = 4
DIM_KEY = 8
DIM_VALUE = 8
DIM_FF = 64
ENC_LAYERS = 2
DEC_LAYERS = 2
SEQ = 8
LN_EPS = 1e-5
NEG_BIG = -1e30         # finite "minus infinity" for the causal mask


# ------------------------- in-kernel helper functions ------------------------
def _linear(x, w, b):
    return jnp.dot(x, w, preferred_element_type=jnp.float32) + b


def _add_layernorm(a, b, gamma, beta):
    # addAndNorm(a, b, norm) assumed to be norm(a + b)   # TODO(synk): confirm.
    x = a + b
    mu = jnp.mean(x, axis=-1, keepdims=True)
    var = jnp.mean((x - mu) ** 2, axis=-1, keepdims=True)
    return (x - mu) * jax.lax.rsqrt(var + LN_EPS) * gamma + beta


def _softmax_last(x):
    m = jnp.max(x, axis=-1, keepdims=True)
    e = jnp.exp(x - m)
    # exact reciprocal for the final output distribution
    return e * pl.reciprocal(jnp.sum(e, axis=-1, keepdims=True), approx=False)


def _mha(Q, K, V, wq, bq, wk, bk, wv, bv, masked):
    """Multi-head attention with head-stacked weights.

    wq/wk: (dim_model, H*dim_key), wv: (dim_model, H*dim_value).
    Output is lane-dense (seq_q, H*dim_value) == torch.cat(heads, dim=1).
    """
    qp = _linear(Q, wq, bq)          # (sq, H*dk) — all heads in one MXU dot
    kp = _linear(K, wk, bk)          # (sk, H*dk)
    vp = _linear(V, wv, bv)          # (sk, H*dv)
    sq, sk = Q.shape[0], K.shape[0]

    if masked:
        row = jax.lax.broadcasted_iota(jnp.int32, (sq, sk), 0)
        col = jax.lax.broadcasted_iota(jnp.int32, (sq, sk), 1)
        mask_add = jnp.where(col > row, jnp.float32(NEG_BIG), jnp.float32(0.0))

    inv_scale = jnp.float32(1.0 / DIM_MODEL)   # reference divides by dim_model, NOT sqrt
    heads = []
    for h in range(NB_HEADS):                  # statically unrolled — tiny (8x8) matmuls
        qh = qp[:, h * DIM_KEY:(h + 1) * DIM_KEY]
        kh = kp[:, h * DIM_KEY:(h + 1) * DIM_KEY]
        vh = vp[:, h * DIM_VALUE:(h + 1) * DIM_VALUE]
        s = jax.lax.dot_general(qh, kh, (((1,), (1,)), ((), ())),
                                preferred_element_type=jnp.float32) * inv_scale
        if masked:
            s = s + mask_add
        m = jnp.max(s, axis=-1, keepdims=True)
        p = jnp.exp(s - m)
        p = p * pl.reciprocal(jnp.sum(p, axis=-1, keepdims=True), approx=True)
        heads.append(jnp.dot(p, vh, preferred_element_type=jnp.float32))
    return jnp.concatenate(heads, axis=1)      # (sq, H*dv), lane-dense


# ------------------------------ fused kernel ---------------------------------
def transformer_kernel(
    x_ref, last_ref, pe_ref,
    emb_w_ref, emb_b_ref, out_w_ref, out_b_ref,
    enc_gamma_ref, enc_beta_ref, dec_gamma_ref, dec_beta_ref,
    e_wq_ref, e_bq_ref, e_wk_ref, e_bk_ref, e_wv_ref, e_bv_ref,
    e_w1_ref, e_b1_ref, e_w2_ref, e_b2_ref,
    d_wq1_ref, d_bq1_ref, d_wk1_ref, d_bk1_ref, d_wv1_ref, d_bv1_ref,
    d_wq2_ref, d_bq2_ref, d_wk2_ref, d_bk2_ref, d_wv2_ref, d_bv2_ref,
    d_w1_ref, d_b1_ref, d_w2_ref, d_b2_ref,
    o_ref,
):
    # ----- embedding + positional encoding (weights loaded once, reused twice)
    pe = pe_ref[...]
    emb_w = emb_w_ref[...]
    emb_b = emb_b_ref[...]
    enc_in = _linear(x_ref[...], emb_w, emb_b) + pe
    dec_in = _linear(last_ref[...], emb_w, emb_b) + pe
    # dropout(p=0.1) -> identity (eval / deterministic)

    # ----- encoder -----------------------------------------------------------
    enc_gamma = enc_gamma_ref[...]
    enc_beta = enc_beta_ref[...]
    x = enc_in
    for l in range(ENC_LAYERS):
        attn = _mha(x, x, x,
                    e_wq_ref[l], e_bq_ref[l], e_wk_ref[l], e_bk_ref[l],
                    e_wv_ref[l], e_bv_ref[l], masked=False)
        h1 = _add_layernorm(x, attn, enc_gamma, enc_beta)
        hff = jnp.maximum(_linear(h1, e_w1_ref[l], e_b1_ref[l]), 0.0)
        ff = _linear(hff, e_w2_ref[l], e_b2_ref[l])
        x = _add_layernorm(h1, ff, enc_gamma, enc_beta)
    enc_out = x

    # ----- decoder -----------------------------------------------------------
    dec_gamma = dec_gamma_ref[...]
    dec_beta = dec_beta_ref[...]
    last = None
    for l in range(DEC_LAYERS):
        # NOTE: reference never updates decoderInput across layers — reproduced.
        a1 = _mha(dec_in, dec_in, dec_in,
                  d_wq1_ref[l], d_bq1_ref[l], d_wk1_ref[l], d_bk1_ref[l],
                  d_wv1_ref[l], d_bv1_ref[l], masked=True)
        h1 = _add_layernorm(dec_in, a1, dec_gamma, dec_beta)
        a2 = _mha(h1, enc_out, enc_out,
                  d_wq2_ref[l], d_bq2_ref[l], d_wk2_ref[l], d_bk2_ref[l],
                  d_wv2_ref[l], d_bv2_ref[l], masked=False)
        h2 = _add_layernorm(h1, a2, dec_gamma, dec_beta)
        hff = jnp.maximum(_linear(h2, d_w1_ref[l], d_b1_ref[l]), 0.0)
        ff = _linear(hff, d_w2_ref[l], d_b2_ref[l])
        last = _add_layernorm(h2, ff, dec_gamma, dec_beta)

    # ----- toProba: Linear + Softmax (only HBM write of the whole forward) ---
    logits = _linear(last, out_w_ref[...], out_b_ref[...])
    o_ref[...] = _softmax_last(logits)


# --------------------------- pallas_call wrapper ------------------------------
def positional_encoding(seq_len, dim_model):
    # Standard sinusoidal PE (reference's positionalEncoding is not defined).
    pos = np.arange(seq_len)[:, None].astype(np.float32)
    i = np.arange(dim_model)[None, :]
    angle = pos / np.power(10000.0, (2 * (i // 2)).astype(np.float32) / dim_model)
    pe = np.where(i % 2 == 0, np.sin(angle), np.cos(angle)).astype(np.float32)
    return jnp.asarray(pe)


def transformer_forward(params, x, last_output):
    pe = positional_encoding(x.shape[0], DIM_MODEL)
    enc = params["enc"]
    dec = params["dec"]
    operands = [
        x, last_output, pe,
        params["emb_w"], params["emb_b"], params["out_w"], params["out_b"],
        params["enc_gamma"], params["enc_beta"], params["dec_gamma"], params["dec_beta"],
        enc["wq"], enc["bq"], enc["wk"], enc["bk"], enc["wv"], enc["bv"],
        enc["w1"], enc["b1"], enc["w2"], enc["b2"],
        dec["wq1"], dec["bq1"], dec["wk1"], dec["bk1"], dec["wv1"], dec["bv1"],
        dec["wq2"], dec["bq2"], dec["wk2"], dec["bk2"], dec["wv2"], dec["bv2"],
        dec["w1"], dec["b1"], dec["w2"], dec["b2"],
    ]
    # Single invocation (no grid): every operand is a full-array VMEM block.
    in_specs = [pl.BlockSpec(a.shape, lambda *_, n=a.ndim: (0,) * n) for a in operands]
    out_shape = jax.ShapeDtypeStruct((x.shape[0], VOCAB), jnp.float32)
    return pl.pallas_call(
        transformer_kernel,
        out_shape=out_shape,
        in_specs=in_specs,
        out_specs=pl.BlockSpec(out_shape.shape, lambda *_: (0, 0)),
    )(*operands)


# ----------------------------- parameter init --------------------------------
def init_linear_params(key, fan_in, fan_out):
    # PyTorch nn.Linear default init: U(-1/sqrt(fan_in), 1/sqrt(fan_in)) for W and b.
    kw, kb = jax.random.split(key)
    bound = 1.0 / np.sqrt(fan_in)
    w = jax.random.uniform(kw, (fan_in, fan_out), jnp.float32, -bound, bound)
    b = jax.random.uniform(kb, (1, fan_out), jnp.float32, -bound, bound)
    return w, b


def init_mha_params(key):
    """Per-head Linear(dm, dk) weights concatenated along the output (lane) axis."""
    keys = jax.random.split(key, 3 * NB_HEADS)
    wq, bq, wk, bk, wv, bv = [], [], [], [], [], []
    for h in range(NB_HEADS):
        w, b = init_linear_params(keys[3 * h + 0], DIM_MODEL, DIM_KEY)
        wq.append(w); bq.append(b)
        w, b = init_linear_params(keys[3 * h + 1], DIM_MODEL, DIM_KEY)
        wk.append(w); bk.append(b)
        w, b = init_linear_params(keys[3 * h + 2], DIM_MODEL, DIM_VALUE)
        wv.append(w); bv.append(b)
    return (jnp.concatenate(wq, axis=1), jnp.concatenate(bq, axis=1),
            jnp.concatenate(wk, axis=1), jnp.concatenate(bk, axis=1),
            jnp.concatenate(wv, axis=1), jnp.concatenate(bv, axis=1))


def init_transformer_params(key):
    ks = iter(jax.random.split(key, 2 + 2 * ENC_LAYERS + 3 * DEC_LAYERS))
    emb_w, emb_b = init_linear_params(next(ks), VOCAB, DIM_MODEL)
    out_w, out_b = init_linear_params(next(ks), DIM_MODEL, VOCAB)

    enc_names = ("wq", "bq", "wk", "bk", "wv", "bv", "w1", "b1", "w2", "b2")
    enc = {n: [] for n in enc_names}
    for _ in range(ENC_LAYERS):
        wq, bq, wk, bk, wv, bv = init_mha_params(next(ks))
        k1, k2 = jax.random.split(next(ks))
        w1, b1 = init_linear_params(k1, DIM_MODEL, DIM_FF)
        w2, b2 = init_linear_params(k2, DIM_FF, DIM_MODEL)
        for n, v in zip(enc_names, (wq, bq, wk, bk, wv, bv, w1, b1, w2, b2)):
            enc[n].append(v)
    enc = {n: jnp.stack(v) for n, v in enc.items()}     # leading layer axis

    dec_names = ("wq1", "bq1", "wk1", "bk1", "wv1", "bv1",
                 "wq2", "bq2", "wk2", "bk2", "wv2", "bv2",
                 "w1", "b1", "w2", "b2")
    dec = {n: [] for n in dec_names}
    for _ in range(DEC_LAYERS):
        m1 = init_mha_params(next(ks))
        m2 = init_mha_params(next(ks))
        k1, k2 = jax.random.split(next(ks))
        w1, b1 = init_linear_params(k1, DIM_MODEL, DIM_FF)
        w2, b2 = init_linear_params(k2, DIM_FF, DIM_MODEL)
        for n, v in zip(dec_names, (*m1, *m2, w1, b1, w2, b2)):
            dec[n].append(v)
    dec = {n: jnp.stack(v) for n, v in dec.items()}

    # nn.LayerNorm default init; encoder and decoder have distinct norm modules.
    ones = jnp.ones((1, DIM_MODEL), jnp.float32)
    zeros = jnp.zeros((1, DIM_MODEL), jnp.float32)
    return dict(
        emb_w=emb_w, emb_b=emb_b, out_w=out_w, out_b=out_b,
        enc_gamma=ones, enc_beta=zeros, dec_gamma=ones, dec_beta=zeros,
        enc=enc, dec=dec,
    )


# ---------------------------------- main --------------------------------------
if __name__ == "__main__":
    root = jax.random.PRNGKey(0)
    kp, kx, kl = jax.random.split(root, 3)
    params = init_transformer_params(kp)

    x = jax.random.normal(kx, (SEQ, VOCAB), jnp.float32)          # source tokens (dense)
    last_out = jax.random.normal(kl, (SEQ, VOCAB), jnp.float32)   # previous decoder output

    out = transformer_forward(params, x, last_out)
    out = jax.block_until_ready(out)

    assert out.shape == (SEQ, VOCAB)
    assert bool(jnp.all(jnp.isfinite(out)))
    # rows of toProba output are softmax distributions
    assert bool(jnp.allclose(jnp.sum(out, axis=-1), 1.0, atol=1e-4))
    print("KERNEL_OK")
</pallas_src>

<mosaic_0001>
module attributes {stable_mosaic.version = 11 : i64} {
  func.func @transformer_kernel(%arg0: memref<8x16xf32, #tpu.memory_space<vmem>>, %arg1: memref<8x16xf32, #tpu.memory_space<vmem>>, %arg2: memref<8x32xf32, #tpu.memory_space<vmem>>, %arg3: memref<16x32xf32, #tpu.memory_space<vmem>>, %arg4: memref<1x32xf32, #tpu.memory_space<vmem>>, %arg5: memref<32x16xf32, #tpu.memory_space<vmem>>, %arg6: memref<1x16xf32, #tpu.memory_space<vmem>>, %arg7: memref<1x32xf32, #tpu.memory_space<vmem>>, %arg8: memref<1x32xf32, #tpu.memory_space<vmem>>, %arg9: memref<1x32xf32, #tpu.memory_space<vmem>>, %arg10: memref<1x32xf32, #tpu.memory_space<vmem>>, %arg11: memref<2x32x32xf32, #tpu.memory_space<vmem>>, %arg12: memref<2x1x32xf32, #tpu.memory_space<vmem>>, %arg13: memref<2x32x32xf32, #tpu.memory_space<vmem>>, %arg14: memref<2x1x32xf32, #tpu.memory_space<vmem>>, %arg15: memref<2x32x32xf32, #tpu.memory_space<vmem>>, %arg16: memref<2x1x32xf32, #tpu.memory_space<vmem>>, %arg17: memref<2x32x64xf32, #tpu.memory_space<vmem>>, %arg18: memref<2x1x64xf32, #tpu.memory_space<vmem>>, %arg19: memref<2x64x32xf32, #tpu.memory_space<vmem>>, %arg20: memref<2x1x32xf32, #tpu.memory_space<vmem>>, %arg21: memref<2x32x32xf32, #tpu.memory_space<vmem>>, %arg22: memref<2x1x32xf32, #tpu.memory_space<vmem>>, %arg23: memref<2x32x32xf32, #tpu.memory_space<vmem>>, %arg24: memref<2x1x32xf32, #tpu.memory_space<vmem>>, %arg25: memref<2x32x32xf32, #tpu.memory_space<vmem>>, %arg26: memref<2x1x32xf32, #tpu.memory_space<vmem>>, %arg27: memref<2x32x32xf32, #tpu.memory_space<vmem>>, %arg28: memref<2x1x32xf32, #tpu.memory_space<vmem>>, %arg29: memref<2x32x32xf32, #tpu.memory_space<vmem>>, %arg30: memref<2x1x32xf32, #tpu.memory_space<vmem>>, %arg31: memref<2x32x32xf32, #tpu.memory_space<vmem>>, %arg32: memref<2x1x32xf32, #tpu.memory_space<vmem>>, %arg33: memref<2x32x64xf32, #tpu.memory_space<vmem>>, %arg34: memref<2x1x64xf32, #tpu.memory_space<vmem>>, %arg35: memref<2x64x32xf32, #tpu.memory_space<vmem>>, %arg36: memref<2x1x32xf32, #tpu.memory_space<vmem>>, %arg37: memref<8x16xf32, #tpu.memory_space<vmem>>) attributes {dimension_semantics = [], scalar_prefetch = 0 : i64, scratch_operands = 0 : i64, tpu.core_type = #tpu.core_type<tc>} {
    %c0 = arith.constant 0 : index
    %c0_0 = arith.constant 0 : index
    %0 = vector.load %arg2[%c0, %c0_0] : memref<8x32xf32, #tpu.memory_space<vmem>>, vector<8x32xf32>
    %c0_1 = arith.constant 0 : index
    %c0_2 = arith.constant 0 : index
    %1 = vector.load %arg3[%c0_1, %c0_2] : memref<16x32xf32, #tpu.memory_space<vmem>>, vector<16x32xf32>
    %c0_3 = arith.constant 0 : index
    %c0_4 = arith.constant 0 : index
    %2 = vector.load %arg4[%c0_3, %c0_4] : memref<1x32xf32, #tpu.memory_space<vmem>>, vector<1x32xf32>
    %c0_5 = arith.constant 0 : index
    %c0_6 = arith.constant 0 : index
    %3 = vector.load %arg0[%c0_5, %c0_6] : memref<8x16xf32, #tpu.memory_space<vmem>>, vector<8x16xf32>
    %cst = arith.constant dense<0.000000e+00> : vector<8x32xf32>
    %4 = tpu.matmul %3, %1, %cst {dimension_numbers = #tpu.dot_dimension_numbers<[1], [0], [0], [1], [0, 0, 1, 1], [], []>} : vector<8x16xf32>, vector<16x32xf32>, vector<8x32xf32> -> vector<8x32xf32>
    %5 = vector.broadcast %2 : vector<1x32xf32> to vector<8x32xf32>
    %6 = arith.addf %4, %5 : vector<8x32xf32>
    %7 = arith.addf %6, %0 : vector<8x32xf32>
    %c0_7 = arith.constant 0 : index
    %c0_8 = arith.constant 0 : index
    %8 = vector.load %arg1[%c0_7, %c0_8] : memref<8x16xf32, #tpu.memory_space<vmem>>, vector<8x16xf32>
    %cst_9 = arith.constant dense<0.000000e+00> : vector<8x32xf32>
    %9 = tpu.matmul %8, %1, %cst_9 {dimension_numbers = #tpu.dot_dimension_numbers<[1], [0], [0], [1], [0, 0, 1, 1], [], []>} : vector<8x16xf32>, vector<16x32xf32>, vector<8x32xf32> -> vector<8x32xf32>
    %10 = vector.broadcast %2 : vector<1x32xf32> to vector<8x32xf32>
    %11 = arith.addf %9, %10 : vector<8x32xf32>
    %12 = arith.addf %11, %0 : vector<8x32xf32>
    %c0_10 = arith.constant 0 : index
    %c0_11 = arith.constant 0 : index
    %13 = vector.load %arg7[%c0_10, %c0_11] : memref<1x32xf32, #tpu.memory_space<vmem>>, vector<1x32xf32>
    %c0_12 = arith.constant 0 : index
    %c0_13 = arith.constant 0 : index
    %14 = vector.load %arg8[%c0_12, %c0_13] : memref<1x32xf32, #tpu.memory_space<vmem>>, vector<1x32xf32>
    %c0_14 = arith.constant 0 : index
    %c0_15 = arith.constant 0 : index
    %c0_16 = arith.constant 0 : index
    %15 = vector.load %arg11[%c0_14, %c0_15, %c0_16] : memref<2x32x32xf32, #tpu.memory_space<vmem>>, vector<1x32x32xf32>
    %16 = vector.shape_cast %15 : vector<1x32x32xf32> to vector<32x32xf32>
    %c0_17 = arith.constant 0 : index
    %c0_18 = arith.constant 0 : index
    %c0_19 = arith.constant 0 : index
    %17 = vector.load %arg12[%c0_17, %c0_18, %c0_19] : memref<2x1x32xf32, #tpu.memory_space<vmem>>, vector<1x1x32xf32>
    %18 = vector.shape_cast %17 : vector<1x1x32xf32> to vector<1x32xf32>
    %c0_20 = arith.constant 0 : index
    %c0_21 = arith.constant 0 : index
    %c0_22 = arith.constant 0 : index
    %19 = vector.load %arg13[%c0_20, %c0_21, %c0_22] : memref<2x32x32xf32, #tpu.memory_space<vmem>>, vector<1x32x32xf32>
    %20 = vector.shape_cast %19 : vector<1x32x32xf32> to vector<32x32xf32>
    %c0_23 = arith.constant 0 : index
    %c0_24 = arith.constant 0 : index
    %c0_25 = arith.constant 0 : index
    %21 = vector.load %arg14[%c0_23, %c0_24, %c0_25] : memref<2x1x32xf32, #tpu.memory_space<vmem>>, vector<1x1x32xf32>
    %22 = vector.shape_cast %21 : vector<1x1x32xf32> to vector<1x32xf32>
    %c0_26 = arith.constant 0 : index
    %c0_27 = arith.constant 0 : index
    %c0_28 = arith.constant 0 : index
    %23 = vector.load %arg15[%c0_26, %c0_27, %c0_28] : memref<2x32x32xf32, #tpu.memory_space<vmem>>, vector<1x32x32xf32>
    %24 = vector.shape_cast %23 : vector<1x32x32xf32> to vector<32x32xf32>
    %c0_29 = arith.constant 0 : index
    %c0_30 = arith.constant 0 : index
    %c0_31 = arith.constant 0 : index
    %25 = vector.load %arg16[%c0_29, %c0_30, %c0_31] : memref<2x1x32xf32, #tpu.memory_space<vmem>>, vector<1x1x32xf32>
    %26 = vector.shape_cast %25 : vector<1x1x32xf32> to vector<1x32xf32>
    %cst_32 = arith.constant dense<0.000000e+00> : vector<8x32xf32>
    %27 = tpu.matmul %7, %16, %cst_32 {dimension_numbers = #tpu.dot_dimension_numbers<[1], [0], [0], [1], [0, 0, 1, 1], [], []>} : vector<8x32xf32>, vector<32x32xf32>, vector<8x32xf32> -> vector<8x32xf32>
    %28 = vector.broadcast %18 : vector<1x32xf32> to vector<8x32xf32>
    %29 = arith.addf %27, %28 : vector<8x32xf32>
    %cst_33 = arith.constant dense<0.000000e+00> : vector<8x32xf32>
    %30 = tpu.matmul %7, %20, %cst_33 {dimension_numbers = #tpu.dot_dimension_numbers<[1], [0], [0], [1], [0, 0, 1, 1], [], []>} : vector<8x32xf32>, vector<32x32xf32>, vector<8x32xf32> -> vector<8x32xf32>
    %31 = vector.broadcast %22 : vector<1x32xf32> to vector<8x32xf32>
    %32 = arith.addf %30, %31 : vector<8x32xf32>
    %cst_34 = arith.constant dense<0.000000e+00> : vector<8x32xf32>
    %33 = tpu.matmul %7, %24, %cst_34 {dimension_numbers = #tpu.dot_dimension_numbers<[1], [0], [0], [1], [0, 0, 1, 1], [], []>} : vector<8x32xf32>, vector<32x32xf32>, vector<8x32xf32> -> vector<8x32xf32>
    %34 = vector.broadcast %26 : vector<1x32xf32> to vector<8x32xf32>
    %35 = arith.addf %33, %34 : vector<8x32xf32>
    %36 = vector.extract_strided_slice %29 {offsets = [0, 0], sizes = [8, 8], strides = [1, 1]} : vector<8x32xf32> to vector<8x8xf32>
    %37 = vector.extract_strided_slice %32 {offsets = [0, 0], sizes = [8, 8], strides = [1, 1]} : vector<8x32xf32> to vector<8x8xf32>
    %38 = vector.extract_strided_slice %35 {offsets = [0, 0], sizes = [8, 8], strides = [1, 1]} : vector<8x32xf32> to vector<8x8xf32>
    %cst_35 = arith.constant dense<0.000000e+00> : vector<8x8xf32>
    %39 = tpu.matmul %36, %37, %cst_35 {dimension_numbers = #tpu.dot_dimension_numbers<[1], [1], [0], [0], [0, 0, 1, 0], [], []>} : vector<8x8xf32>, vector<8x8xf32>, vector<8x8xf32> -> vector<8x8xf32>
    %cst_36 = arith.constant 3.125000e-02 : f32
    %40 = vector.broadcast %cst_36 : f32 to vector<8x8xf32>
    %41 = arith.mulf %39, %40 : vector<8x8xf32>
    %cst_37 = arith.constant dense<0xFF800000> : vector<8xf32>
    %42 = vector.multi_reduction <maximumf>, %41, %cst_37 [1] : vector<8x8xf32> to vector<8xf32>
    %43 = vector.shape_cast %42 : vector<8xf32> to vector<8x1xf32>
    %44 = vector.broadcast %43 : vector<8x1xf32> to vector<8x8xf32>
    %45 = arith.subf %41, %44 : vector<8x8xf32>
    %46 = math.exp %45 : vector<8x8xf32>
    %cst_38 = arith.constant dense<0.000000e+00> : vector<8xf32>
    %47 = vector.multi_reduction <add>, %46, %cst_38 [1] : vector<8x8xf32> to vector<8xf32>
    %48 = vector.shape_cast %47 : vector<8xf32> to vector<8x1xf32>
    %49 = tpu.reciprocal %48 {approx = true} : vector<8x1xf32> -> vector<8x1xf32>
    %50 = vector.broadcast %49 : vector<8x1xf32> to vector<8x8xf32>
    %51 = arith.mulf %46, %50 : vector<8x8xf32>
    %cst_39 = arith.constant dense<0.000000e+00> : vector<8x8xf32>
    %52 = tpu.matmul %51, %38, %cst_39 {dimension_numbers = #tpu.dot_dimension_numbers<[1], [0], [0], [1], [0, 0, 1, 1], [], []>} : vector<8x8xf32>, vector<8x8xf32>, vector<8x8xf32> -> vector<8x8xf32>
    %53 = vector.extract_strided_slice %29 {offsets = [0, 8], sizes = [8, 8], strides = [1, 1]} : vector<8x32xf32> to vector<8x8xf32>
    %54 = vector.extract_strided_slice %32 {offsets = [0, 8], sizes = [8, 8], strides = [1, 1]} : vector<8x32xf32> to vector<8x8xf32>
    %55 = vector.extract_strided_slice %35 {offsets = [0, 8], sizes = [8, 8], strides = [1, 1]} : vector<8x32xf32> to vector<8x8xf32>
    %cst_40 = arith.constant dense<0.000000e+00> : vector<8x8xf32>
    %56 = tpu.matmul %53, %54, %cst_40 {dimension_numbers = #tpu.dot_dimension_numbers<[1], [1], [0], [0], [0, 0, 1, 0], [], []>} : vector<8x8xf32>, vector<8x8xf32>, vector<8x8xf32> -> vector<8x8xf32>
    %cst_41 = arith.constant 3.125000e-02 : f32
    %57 = vector.broadcast %cst_41 : f32 to vector<8x8xf32>
    %58 = arith.mulf %56, %57 : vector<8x8xf32>
    %cst_42 = arith.constant dense<0xFF800000> : vector<8xf32>
    %59 = vector.multi_reduction <maximumf>, %58, %cst_42 [1] : vector<8x8xf32> to vector<8xf32>
    %60 = vector.shape_cast %59 : vector<8xf32> to vector<8x1xf32>
    %61 = vector.broadcast %60 : vector<8x1xf32> to vector<8x8xf32>
    %62 = arith.subf %58, %61 : vector<8x8xf32>
    %63 = math.exp %62 : vector<8x8xf32>
    %cst_43 = arith.constant dense<0.000000e+00> : vector<8xf32>
    %64 = vector.multi_reduction <add>, %63, %cst_43 [1] : vector<8x8xf32> to vector<8xf32>
    %65 = vector.shape_cast %64 : vector<8xf32> to vector<8x1xf32>
    %66 = tpu.reciprocal %65 {approx = true} : vector<8x1xf32> -> vector<8x1xf32>
    %67 = vector.broadcast %66 : vector<8x1xf32> to vector<8x8xf32>
    %68 = arith.mulf %63, %67 : vector<8x8xf32>
    %cst_44 = arith.constant dense<0.000000e+00> : vector<8x8xf32>
    %69 = tpu.matmul %68, %55, %cst_44 {dimension_numbers = #tpu.dot_dimension_numbers<[1], [0], [0], [1], [0, 0, 1, 1], [], []>} : vector<8x8xf32>, vector<8x8xf32>, vector<8x8xf32> -> vector<8x8xf32>
    %70 = vector.extract_strided_slice %29 {offsets = [0, 16], sizes = [8, 8], strides = [1, 1]} : vector<8x32xf32> to vector<8x8xf32>
    %71 = vector.extract_strided_slice %32 {offsets = [0, 16], sizes = [8, 8], strides = [1, 1]} : vector<8x32xf32> to vector<8x8xf32>
    %72 = vector.extract_strided_slice %35 {offsets = [0, 16], sizes = [8, 8], strides = [1, 1]} : vector<8x32xf32> to vector<8x8xf32>
    %cst_45 = arith.constant dense<0.000000e+00> : vector<8x8xf32>
    %73 = tpu.matmul %70, %71, %cst_45 {dimension_numbers = #tpu.dot_dimension_numbers<[1], [1], [0], [0], [0, 0, 1, 0], [], []>} : vector<8x8xf32>, vector<8x8xf32>, vector<8x8xf32> -> vector<8x8xf32>
    %cst_46 = arith.constant 3.125000e-02 : f32
    %74 = vector.broadcast %cst_46 : f32 to vector<8x8xf32>
    %75 = arith.mulf %73, %74 : vector<8x8xf32>
    %cst_47 = arith.constant dense<0xFF800000> : vector<8xf32>
    %76 = vector.multi_reduction <maximumf>, %75, %cst_47 [1] : vector<8x8xf32> to vector<8xf32>
    %77 = vector.shape_cast %76 : vector<8xf32> to vector<8x1xf32>
    %78 = vector.broadcast %77 : vector<8x1xf32> to vector<8x8xf32>
    %79 = arith.subf %75, %78 : vector<8x8xf32>
    %80 = math.exp %79 : vector<8x8xf32>
    %cst_48 = arith.constant dense<0.000000e+00> : vector<8xf32>
    %81 = vector.multi_reduction <add>, %80, %cst_48 [1] : vector<8x8xf32> to vector<8xf32>
    %82 = vector.shape_cast %81 : vector<8xf32> to vector<8x1xf32>
    %83 = tpu.reciprocal %82 {approx = true} : vector<8x1xf32> -> vector<8x1xf32>
    %84 = vector.broadcast %83 : vector<8x1xf32> to vector<8x8xf32>
    %85 = arith.mulf %80, %84 : vector<8x8xf32>
    %cst_49 = arith.constant dense<0.000000e+00> : vector<8x8xf32>
    %86 = tpu.matmul %85, %72, %cst_49 {dimension_numbers = #tpu.dot_dimension_numbers<[1], [0], [0], [1], [0, 0, 1, 1], [], []>} : vector<8x8xf32>, vector<8x8xf32>, vector<8x8xf32> -> vector<8x8xf32>
    %87 = vector.extract_strided_slice %29 {offsets = [0, 24], sizes = [8, 8], strides = [1, 1]} : vector<8x32xf32> to vector<8x8xf32>
    %88 = vector.extract_strided_slice %32 {offsets = [0, 24], sizes = [8, 8], strides = [1, 1]} : vector<8x32xf32> to vector<8x8xf32>
    %89 = vector.extract_strided_slice %35 {offsets = [0, 24], sizes = [8, 8], strides = [1, 1]} : vector<8x32xf32> to vector<8x8xf32>
    %cst_50 = arith.constant dense<0.000000e+00> : vector<8x8xf32>
    %90 = tpu.matmul %87, %88, %cst_50 {dimension_numbers = #tpu.dot_dimension_numbers<[1], [1], [0], [0], [0, 0, 1, 0], [], []>} : vector<8x8xf32>, vector<8x8xf32>, vector<8x8xf32> -> vector<8x8xf32>
    %cst_51 = arith.constant 3.125000e-02 : f32
    %91 = vector.broadcast %cst_51 : f32 to vector<8x8xf32>
    %92 = arith.mulf %90, %91 : vector<8x8xf32>
    %cst_52 = arith.constant dense<0xFF800000> : vector<8xf32>
    %93 = vector.multi_reduction <maximumf>, %92, %cst_52 [1] : vector<8x8xf32> to vector<8xf32>
    %94 = vector.shape_cast %93 : vector<8xf32> to vector<8x1xf32>
    %95 = vector.broadcast %94 : vector<8x1xf32> to vector<8x8xf32>
    %96 = arith.subf %92, %95 : vector<8x8xf32>
    %97 = math.exp %96 : vector<8x8xf32>
    %cst_53 = arith.constant dense<0.000000e+00> : vector<8xf32>
    %98 = vector.multi_reduction <add>, %97, %cst_53 [1] : vector<8x8xf32> to vector<8xf32>
    %99 = vector.shape_cast %98 : vector<8xf32> to vector<8x1xf32>
    %100 = tpu.reciprocal %99 {approx = true} : vector<8x1xf32> -> vector<8x1xf32>
    %101 = vector.broadcast %100 : vector<8x1xf32> to vector<8x8xf32>
    %102 = arith.mulf %97, %101 : vector<8x8xf32>
    %cst_54 = arith.constant dense<0.000000e+00> : vector<8x8xf32>
    %103 = tpu.matmul %102, %89, %cst_54 {dimension_numbers = #tpu.dot_dimension_numbers<[1], [0], [0], [1], [0, 0, 1, 1], [], []>} : vector<8x8xf32>, vector<8x8xf32>, vector<8x8xf32> -> vector<8x8xf32>
    %104 = tpu.concatenate %52, %69, %86, %103 in 1 : vector<8x8xf32>, vector<8x8xf32>, vector<8x8xf32>, vector<8x8xf32> -> vector<8x32xf32>
    %105 = arith.addf %7, %104 : vector<8x32xf32>
    %cst_55 = arith.constant dense<0.000000e+00> : vector<8xf32>
    %106 = vector.multi_reduction <add>, %105, %cst_55 [1] : vector<8x32xf32> to vector<8xf32>
    %107 = vector.shape_cast %106 : vector<8xf32> to vector<8x1xf32>
    %cst_56 = arith.constant 3.200000e+01 : f32
    %108 = vector.broadcast %cst_56 : f32 to vector<8x1xf32>
    %109 = arith.divf %107, %108 : vector<8x1xf32>
    %110 = vector.broadcast %109 : vector<8x1xf32> to vector<8x32xf32>
    %111 = arith.subf %105, %110 : vector<8x32xf32>
    %112 = arith.mulf %111, %111 : vector<8x32xf32>
    %cst_57 = arith.constant dense<0.000000e+00> : vector<8xf32>
    %113 = vector.multi_reduction <add>, %112, %cst_57 [1] : vector<8x32xf32> to vector<8xf32>
    %114 = vector.shape_cast %113 : vector<8xf32> to vector<8x1xf32>
    %cst_58 = arith.constant 3.200000e+01 : f32
    %115 = vector.broadcast %cst_58 : f32 to vector<8x1xf32>
    %116 = arith.divf %114, %115 : vector<8x1xf32>
    %117 = vector.broadcast %109 : vector<8x1xf32> to vector<8x32xf32>
    %118 = arith.subf %105, %117 : vector<8x32xf32>
    %cst_59 = arith.constant 9.99999974E-6 : f32
    %119 = vector.broadcast %cst_59 : f32 to vector<8x1xf32>
    %120 = arith.addf %116, %119 : vector<8x1xf32>
    %121 = math.rsqrt %120 : vector<8x1xf32>
    %122 = vector.broadcast %121 : vector<8x1xf32> to vector<8x32xf32>
    %123 = arith.mulf %118, %122 : vector<8x32xf32>
    %124 = vector.broadcast %13 : vector<1x32xf32> to vector<8x32xf32>
    %125 = arith.mulf %123, %124 : vector<8x32xf32>
    %126 = vector.broadcast %14 : vector<1x32xf32> to vector<8x32xf32>
    %127 = arith.addf %125, %126 : vector<8x32xf32>
    %c0_60 = arith.constant 0 : index
    %c0_61 = arith.constant 0 : index
    %c0_62 = arith.constant 0 : index
    %128 = vector.load %arg17[%c0_60, %c0_61, %c0_62] : memref<2x32x64xf32, #tpu.memory_space<vmem>>, vector<1x32x64xf32>
    %129 = vector.shape_cast %128 : vector<1x32x64xf32> to vector<32x64xf32>
    %c0_63 = arith.constant 0 : index
    %c0_64 = arith.constant 0 : index
    %c0_65 = arith.constant 0 : index
    %130 = vector.load %arg18[%c0_63, %c0_64, %c0_65] : memref<2x1x64xf32, #tpu.memory_space<vmem>>, vector<1x1x64xf32>
    %131 = vector.shape_cast %130 : vector<1x1x64xf32> to vector<1x64xf32>
    %cst_66 = arith.constant dense<0.000000e+00> : vector<8x64xf32>
    %132 = tpu.matmul %127, %129, %cst_66 {dimension_numbers = #tpu.dot_dimension_numbers<[1], [0], [0], [1], [0, 0, 1, 1], [], []>} : vector<8x32xf32>, vector<32x64xf32>, vector<8x64xf32> -> vector<8x64xf32>
    %133 = vector.broadcast %131 : vector<1x64xf32> to vector<8x64xf32>
    %134 = arith.addf %132, %133 : vector<8x64xf32>
    %cst_67 = arith.constant 0.000000e+00 : f32
    %135 = vector.broadcast %cst_67 : f32 to vector<8x64xf32>
    %136 = arith.maximumf %134, %135 : vector<8x64xf32>
    %c0_68 = arith.constant 0 : index
    %c0_69 = arith.constant 0 : index
    %c0_70 = arith.constant 0 : index
    %137 = vector.load %arg19[%c0_68, %c0_69, %c0_70] : memref<2x64x32xf32, #tpu.memory_space<vmem>>, vector<1x64x32xf32>
    %138 = vector.shape_cast %137 : vector<1x64x32xf32> to vector<64x32xf32>
    %c0_71 = arith.constant 0 : index
    %c0_72 = arith.constant 0 : index
    %c0_73 = arith.constant 0 : index
    %139 = vector.load %arg20[%c0_71, %c0_72, %c0_73] : memref<2x1x32xf32, #tpu.memory_space<vmem>>, vector<1x1x32xf32>
    %140 = vector.shape_cast %139 : vector<1x1x32xf32> to vector<1x32xf32>
    %cst_74 = arith.constant dense<0.000000e+00> : vector<8x32xf32>
    %141 = tpu.matmul %136, %138, %cst_74 {dimension_numbers = #tpu.dot_dimension_numbers<[1], [0], [0], [1], [0, 0, 1, 1], [], []>} : vector<8x64xf32>, vector<64x32xf32>, vector<8x32xf32> -> vector<8x32xf32>
    %142 = vector.broadcast %140 : vector<1x32xf32> to vector<8x32xf32>
    %143 = arith.addf %141, %142 : vector<8x32xf32>
    %144 = arith.addf %127, %143 : vector<8x32xf32>
    %cst_75 = arith.constant dense<0.000000e+00> : vector<8xf32>
    %145 = vector.multi_reduction <add>, %144, %cst_75 [1] : vector<8x32xf32> to vector<8xf32>
    %146 = vector.shape_cast %145 : vector<8xf32> to vector<8x1xf32>
    %cst_76 = arith.constant 3.200000e+01 : f32
    %147 = vector.broadcast %cst_76 : f32 to vector<8x1xf32>
    %148 = arith.divf %146, %147 : vector<8x1xf32>
    %149 = vector.broadcast %148 : vector<8x1xf32> to vector<8x32xf32>
    %150 = arith.subf %144, %149 : vector<8x32xf32>
    %151 = arith.mulf %150, %150 : vector<8x32xf32>
    %cst_77 = arith.constant dense<0.000000e+00> : vector<8xf32>
    %152 = vector.multi_reduction <add>, %151, %cst_77 [1] : vector<8x32xf32> to vector<8xf32>
    %153 = vector.shape_cast %152 : vector<8xf32> to vector<8x1xf32>
    %cst_78 = arith.constant 3.200000e+01 : f32
    %154 = vector.broadcast %cst_78 : f32 to vector<8x1xf32>
    %155 = arith.divf %153, %154 : vector<8x1xf32>
    %156 = vector.broadcast %148 : vector<8x1xf32> to vector<8x32xf32>
    %157 = arith.subf %144, %156 : vector<8x32xf32>
    %cst_79 = arith.constant 9.99999974E-6 : f32
    %158 = vector.broadcast %cst_79 : f32 to vector<8x1xf32>
    %159 = arith.addf %155, %158 : vector<8x1xf32>
    %160 = math.rsqrt %159 : vector<8x1xf32>
    %161 = vector.broadcast %160 : vector<8x1xf32> to vector<8x32xf32>
    %162 = arith.mulf %157, %161 : vector<8x32xf32>
    %163 = vector.broadcast %13 : vector<1x32xf32> to vector<8x32xf32>
    %164 = arith.mulf %162, %163 : vector<8x32xf32>
    %165 = vector.broadcast %14 : vector<1x32xf32> to vector<8x32xf32>
    %166 = arith.addf %164, %165 : vector<8x32xf32>
    %c1 = arith.constant 1 : index
    %c0_80 = arith.constant 0 : index
    %c0_81 = arith.constant 0 : index
    %167 = vector.load %arg11[%c1, %c0_80, %c0_81] : memref<2x32x32xf32, #tpu.memory_space<vmem>>, vector<1x32x32xf32>
    %168 = vector.shape_cast %167 : vector<1x32x32xf32> to vector<32x32xf32>
    %c1_82 = arith.constant 1 : index
    %c0_83 = arith.constant 0 : index
    %c0_84 = arith.constant 0 : index
    %169 = vector.load %arg12[%c1_82, %c0_83, %c0_84] : memref<2x1x32xf32, #tpu.memory_space<vmem>>, vector<1x1x32xf32>
    %170 = vector.shape_cast %169 : vector<1x1x32xf32> to vector<1x32xf32>
    %c1_85 = arith.constant 1 : index
    %c0_86 = arith.constant 0 : index
    %c0_87 = arith.constant 0 : index
    %171 = vector.load %arg13[%c1_85, %c0_86, %c0_87] : memref<2x32x32xf32, #tpu.memory_space<vmem>>, vector<1x32x32xf32>
    %172 = vector.shape_cast %171 : vector<1x32x32xf32> to vector<32x32xf32>
    %c1_88 = arith.constant 1 : index
    %c0_89 = arith.constant 0 : index
    %c0_90 = arith.constant 0 : index
    %173 = vector.load %arg14[%c1_88, %c0_89, %c0_90] : memref<2x1x32xf32, #tpu.memory_space<vmem>>, vector<1x1x32xf32>
    %174 = vector.shape_cast %173 : vector<1x1x32xf32> to vector<1x32xf32>
    %c1_91 = arith.constant 1 : index
    %c0_92 = arith.constant 0 : index
    %c0_93 = arith.constant 0 : index
    %175 = vector.load %arg15[%c1_91, %c0_92, %c0_93] : memref<2x32x32xf32, #tpu.memory_space<vmem>>, vector<1x32x32xf32>
    %176 = vector.shape_cast %175 : vector<1x32x32xf32> to vector<32x32xf32>
    %c1_94 = arith.constant 1 : index
    %c0_95 = arith.constant 0 : index
    %c0_96 = arith.constant 0 : index
    %177 = vector.load %arg16[%c1_94, %c0_95, %c0_96] : memref<2x1x32xf32, #tpu.memory_space<vmem>>, vector<1x1x32xf32>
    %178 = vector.shape_cast %177 : vector<1x1x32xf32> to vector<1x32xf32>
    %cst_97 = arith.constant dense<0.000000e+00> : vector<8x32xf32>
    %179 = tpu.matmul %166, %168, %cst_97 {dimension_numbers = #tpu.dot_dimension_numbers<[1], [0], [0], [1], [0, 0, 1, 1], [], []>} : vector<8x32xf32>, vector<32x32xf32>, vector<8x32xf32> -> vector<8x32xf32>
    %180 = vector.broadcast %170 : vector<1x32xf32> to vector<8x32xf32>
    %181 = arith.addf %179, %180 : vector<8x32xf32>
    %cst_98 = arith.constant dense<0.000000e+00> : vector<8x32xf32>
    %182 = tpu.matmul %166, %172, %cst_98 {dimension_numbers = #tpu.dot_dimension_numbers<[1], [0], [0], [1], [0, 0, 1, 1], [], []>} : vector<8x32xf32>, vector<32x32xf32>, vector<8x32xf32> -> vector<8x32xf32>
    %183 = vector.broadcast %174 : vector<1x32xf32> to vector<8x32xf32>
    %184 = arith.addf %182, %183 : vector<8x32xf32>
    %cst_99 = arith.constant dense<0.000000e+00> : vector<8x32xf32>
    %185 = tpu.matmul %166, %176, %cst_99 {dimension_numbers = #tpu.dot_dimension_numbers<[1], [0], [0], [1], [0, 0, 1, 1], [], []>} : vector<8x32xf32>, vector<32x32xf32>, vector<8x32xf32> -> vector<8x32xf32>
    %186 = vector.broadcast %178 : vector<1x32xf32> to vector<8x32xf32>
    %187 = arith.addf %185, %186 : vector<8x32xf32>
    %188 = vector.extract_strided_slice %181 {offsets = [0, 0], sizes = [8, 8], strides = [1, 1]} : vector<8x32xf32> to vector<8x8xf32>
    %189 = vector.extract_strided_slice %184 {offsets = [0, 0], sizes = [8, 8], strides = [1, 1]} : vector<8x32xf32> to vector<8x8xf32>
    %190 = vector.extract_strided_slice %187 {offsets = [0, 0], sizes = [8, 8], strides = [1, 1]} : vector<8x32xf32> to vector<8x8xf32>
    %cst_100 = arith.constant dense<0.000000e+00> : vector<8x8xf32>
    %191 = tpu.matmul %188, %189, %cst_100 {dimension_numbers = #tpu.dot_dimension_numbers<[1], [1], [0], [0], [0, 0, 1, 0], [], []>} : vector<8x8xf32>, vector<8x8xf32>, vector<8x8xf32> -> vector<8x8xf32>
    %cst_101 = arith.constant 3.125000e-02 : f32
    %192 = vector.broadcast %cst_101 : f32 to vector<8x8xf32>
    %193 = arith.mulf %191, %192 : vector<8x8xf32>
    %cst_102 = arith.constant dense<0xFF800000> : vector<8xf32>
    %194 = vector.multi_reduction <maximumf>, %193, %cst_102 [1] : vector<8x8xf32> to vector<8xf32>
    %195 = vector.shape_cast %194 : vector<8xf32> to vector<8x1xf32>
    %196 = vector.broadcast %195 : vector<8x1xf32> to vector<8x8xf32>
    %197 = arith.subf %193, %196 : vector<8x8xf32>
    %198 = math.exp %197 : vector<8x8xf32>
    %cst_103 = arith.constant dense<0.000000e+00> : vector<8xf32>
    %199 = vector.multi_reduction <add>, %198, %cst_103 [1] : vector<8x8xf32> to vector<8xf32>
    %200 = vector.shape_cast %199 : vector<8xf32> to vector<8x1xf32>
    %201 = tpu.reciprocal %200 {approx = true} : vector<8x1xf32> -> vector<8x1xf32>
    %202 = vector.broadcast %201 : vector<8x1xf32> to vector<8x8xf32>
    %203 = arith.mulf %198, %202 : vector<8x8xf32>
    %cst_104 = arith.constant dense<0.000000e+00> : vector<8x8xf32>
    %204 = tpu.matmul %203, %190, %cst_104 {dimension_numbers = #tpu.dot_dimension_numbers<[1], [0], [0], [1], [0, 0, 1, 1], [], []>} : vector<8x8xf32>, vector<8x8xf32>, vector<8x8xf32> -> vector<8x8xf32>
    %205 = vector.extract_strided_slice %181 {offsets = [0, 8], sizes = [8, 8], strides = [1, 1]} : vector<8x32xf32> to vector<8x8xf32>
    %206 = vector.extract_strided_slice %184 {offsets = [0, 8], sizes = [8, 8], strides = [1, 1]} : vector<8x32xf32> to vector<8x8xf32>
    %207 = vector.extract_strided_slice %187 {offsets = [0, 8], sizes = [8, 8], strides = [1, 1]} : vector<8x32xf32> to vector<8x8xf32>
    %cst_105 = arith.constant dense<0.000000e+00> : vector<8x8xf32>
    %208 = tpu.matmul %205, %206, %cst_105 {dimension_numbers = #tpu.dot_dimension_numbers<[1], [1], [0], [0], [0, 0, 1, 0], [], []>} : vector<8x8xf32>, vector<8x8xf32>, vector<8x8xf32> -> vector<8x8xf32>
    %cst_106 = arith.constant 3.125000e-02 : f32
    %209 = vector.broadcast %cst_106 : f32 to vector<8x8xf32>
    %210 = arith.mulf %208, %209 : vector<8x8xf32>
    %cst_107 = arith.constant dense<0xFF800000> : vector<8xf32>
    %211 = vector.multi_reduction <maximumf>, %210, %cst_107 [1] : vector<8x8xf32> to vector<8xf32>
    %212 = vector.shape_cast %211 : vector<8xf32> to vector<8x1xf32>
    %213 = vector.broadcast %212 : vector<8x1xf32> to vector<8x8xf32>
    %214 = arith.subf %210, %213 : vector<8x8xf32>
    %215 = math.exp %214 : vector<8x8xf32>
    %cst_108 = arith.constant dense<0.000000e+00> : vector<8xf32>
    %216 = vector.multi_reduction <add>, %215, %cst_108 [1] : vector<8x8xf32> to vector<8xf32>
    %217 = vector.shape_cast %216 : vector<8xf32> to vector<8x1xf32>
    %218 = tpu.reciprocal %217 {approx = true} : vector<8x1xf32> -> vector<8x1xf32>
    %219 = vector.broadcast %218 : vector<8x1xf32> to vector<8x8xf32>
    %220 = arith.mulf %215, %219 : vector<8x8xf32>
    %cst_109 = arith.constant dense<0.000000e+00> : vector<8x8xf32>
    %221 = tpu.matmul %220, %207, %cst_109 {dimension_numbers = #tpu.dot_dimension_numbers<[1], [0], [0], [1], [0, 0, 1, 1], [], []>} : vector<8x8xf32>, vector<8x8xf32>, vector<8x8xf32> -> vector<8x8xf32>
    %222 = vector.extract_strided_slice %181 {offsets = [0, 16], sizes = [8, 8], strides = [1, 1]} : vector<8x32xf32> to vector<8x8xf32>
    %223 = vector.extract_strided_slice %184 {offsets = [0, 16], sizes = [8, 8], strides = [1, 1]} : vector<8x32xf32> to vector<8x8xf32>
    %224 = vector.extract_strided_slice %187 {offsets = [0, 16], sizes = [8, 8], strides = [1, 1]} : vector<8x32xf32> to vector<8x8xf32>
    %cst_110 = arith.constant dense<0.000000e+00> : vector<8x8xf32>
    %225 = tpu.matmul %222, %223, %cst_110 {dimension_numbers = #tpu.dot_dimension_numbers<[1], [1], [0], [0], [0, 0, 1, 0], [], []>} : vector<8x8xf32>, vector<8x8xf32>, vector<8x8xf32> -> vector<8x8xf32>
    %cst_111 = arith.constant 3.125000e-02 : f32
    %226 = vector.broadcast %cst_111 : f32 to vector<8x8xf32>
    %227 = arith.mulf %225, %226 : vector<8x8xf32>
    %cst_112 = arith.constant dense<0xFF800000> : vector<8xf32>
    %228 = vector.multi_reduction <maximumf>, %227, %cst_112 [1] : vector<8x8xf32> to vector<8xf32>
    %229 = vector.shape_cast %228 : vector<8xf32> to vector<8x1xf32>
    %230 = vector.broadcast %229 : vector<8x1xf32> to vector<8x8xf32>
    %231 = arith.subf %227, %230 : vector<8x8xf32>
    %232 = math.exp %231 : vector<8x8xf32>
    %cst_113 = arith.constant dense<0.000000e+00> : vector<8xf32>
    %233 = vector.multi_reduction <add>, %232, %cst_113 [1] : vector<8x8xf32> to vector<8xf32>
    %234 = vector.shape_cast %233 : vector<8xf32> to vector<8x1xf32>
    %235 = tpu.reciprocal %234 {approx = true} : vector<8x1xf32> -> vector<8x1xf32>
    %236 = vector.broadcast %235 : vector<8x1xf32> to vector<8x8xf32>
    %237 = arith.mulf %232, %236 : vector<8x8xf32>
    %cst_114 = arith.constant dense<0.000000e+00> : vector<8x8xf32>
    %238 = tpu.matmul %237, %224, %cst_114 {dimension_numbers = #tpu.dot_dimension_numbers<[1], [0], [0], [1], [0, 0, 1, 1], [], []>} : vector<8x8xf32>, vector<8x8xf32>, vector<8x8xf32> -> vector<8x8xf32>
    %239 = vector.extract_strided_slice %181 {offsets = [0, 24], sizes = [8, 8], strides = [1, 1]} : vector<8x32xf32> to vector<8x8xf32>
    %240 = vector.extract_strided_slice %184 {offsets = [0, 24], sizes = [8, 8], strides = [1, 1]} : vector<8x32xf32> to vector<8x8xf32>
    %241 = vector.extract_strided_slice %187 {offsets = [0, 24], sizes = [8, 8], strides = [1, 1]} : vector<8x32xf32> to vector<8x8xf32>
    %cst_115 = arith.constant dense<0.000000e+00> : vector<8x8xf32>
    %242 = tpu.matmul %239, %240, %cst_115 {dimension_numbers = #tpu.dot_dimension_numbers<[1], [1], [0], [0], [0, 0, 1, 0], [], []>} : vector<8x8xf32>, vector<8x8xf32>, vector<8x8xf32> -> vector<8x8xf32>
    %cst_116 = arith.constant 3.125000e-02 : f32
    %243 = vector.broadcast %cst_116 : f32 to vector<8x8xf32>
    %244 = arith.mulf %242, %243 : vector<8x8xf32>
    %cst_117 = arith.constant dense<0xFF800000> : vector<8xf32>
    %245 = vector.multi_reduction <maximumf>, %244, %cst_117 [1] : vector<8x8xf32> to vector<8xf32>
    %246 = vector.shape_cast %245 : vector<8xf32> to vector<8x1xf32>
    %247 = vector.broadcast %246 : vector<8x1xf32> to vector<8x8xf32>
    %248 = arith.subf %244, %247 : vector<8x8xf32>
    %249 = math.exp %248 : vector<8x8xf32>
    %cst_118 = arith.constant dense<0.000000e+00> : vector<8xf32>
    %250 = vector.multi_reduction <add>, %249, %cst_118 [1] : vector<8x8xf32> to vector<8xf32>
    %251 = vector.shape_cast %250 : vector<8xf32> to vector<8x1xf32>
    %252 = tpu.reciprocal %251 {approx = true} : vector<8x1xf32> -> vector<8x1xf32>
    %253 = vector.broadcast %252 : vector<8x1xf32> to vector<8x8xf32>
    %254 = arith.mulf %249, %253 : vector<8x8xf32>
    %cst_119 = arith.constant dense<0.000000e+00> : vector<8x8xf32>
    %255 = tpu.matmul %254, %241, %cst_119 {dimension_numbers = #tpu.dot_dimension_numbers<[1], [0], [0], [1], [0, 0, 1, 1], [], []>} : vector<8x8xf32>, vector<8x8xf32>, vector<8x8xf32> -> vector<8x8xf32>
    %256 = tpu.concatenate %204, %221, %238, %255 in 1 : vector<8x8xf32>, vector<8x8xf32>, vector<8x8xf32>, vector<8x8xf32> -> vector<8x32xf32>
    %257 = arith.addf %166, %256 : vector<8x32xf32>
    %cst_120 = arith.constant dense<0.000000e+00> : vector<8xf32>
    %258 = vector.multi_reduction <add>, %257, %cst_120 [1] : vector<8x32xf32> to vector<8xf32>
    %259 = vector.shape_cast %258 : vector<8xf32> to vector<8x1xf32>
    %cst_121 = arith.constant 3.200000e+01 : f32
    %260 = vector.broadcast %cst_121 : f32 to vector<8x1xf32>
    %261 = arith.divf %259, %260 : vector<8x1xf32>
    %262 = vector.broadcast %261 : vector<8x1xf32> to vector<8x32xf32>
    %263 = arith.subf %257, %262 : vector<8x32xf32>
    %264 = arith.mulf %263, %263 : vector<8x32xf32>
    %cst_122 = arith.constant dense<0.000000e+00> : vector<8xf32>
    %265 = vector.multi_reduction <add>, %264, %cst_122 [1] : vector<8x32xf32> to vector<8xf32>
    %266 = vector.shape_cast %265 : vector<8xf32> to vector<8x1xf32>
    %cst_123 = arith.constant 3.200000e+01 : f32
    %267 = vector.broadcast %cst_123 : f32 to vector<8x1xf32>
    %268 = arith.divf %266, %267 : vector<8x1xf32>
    %269 = vector.broadcast %261 : vector<8x1xf32> to vector<8x32xf32>
    %270 = arith.subf %257, %269 : vector<8x32xf32>
    %cst_124 = arith.constant 9.99999974E-6 : f32
    %271 = vector.broadcast %cst_124 : f32 to vector<8x1xf32>
    %272 = arith.addf %268, %271 : vector<8x1xf32>
    %273 = math.rsqrt %272 : vector<8x1xf32>
    %274 = vector.broadcast %273 : vector<8x1xf32> to vector<8x32xf32>
    %275 = arith.mulf %270, %274 : vector<8x32xf32>
    %276 = vector.broadcast %13 : vector<1x32xf32> to vector<8x32xf32>
    %277 = arith.mulf %275, %276 : vector<8x32xf32>
    %278 = vector.broadcast %14 : vector<1x32xf32> to vector<8x32xf32>
    %279 = arith.addf %277, %278 : vector<8x32xf32>
    %c1_125 = arith.constant 1 : index
    %c0_126 = arith.constant 0 : index
    %c0_127 = arith.constant 0 : index
    %280 = vector.load %arg17[%c1_125, %c0_126, %c0_127] : memref<2x32x64xf32, #tpu.memory_space<vmem>>, vector<1x32x64xf32>
    %281 = vector.shape_cast %280 : vector<1x32x64xf32> to vector<32x64xf32>
    %c1_128 = arith.constant 1 : index
    %c0_129 = arith.constant 0 : index
    %c0_130 = arith.constant 0 : index
    %282 = vector.load %arg18[%c1_128, %c0_129, %c0_130] : memref<2x1x64xf32, #tpu.memory_space<vmem>>, vector<1x1x64xf32>
    %283 = vector.shape_cast %282 : vector<1x1x64xf32> to vector<1x64xf32>
    %cst_131 = arith.constant dense<0.000000e+00> : vector<8x64xf32>
    %284 = tpu.matmul %279, %281, %cst_131 {dimension_numbers = #tpu.dot_dimension_numbers<[1], [0], [0], [1], [0, 0, 1, 1], [], []>} : vector<8x32xf32>, vector<32x64xf32>, vector<8x64xf32> -> vector<8x64xf32>
    %285 = vector.broadcast %283 : vector<1x64xf32> to vector<8x64xf32>
    %286 = arith.addf %284, %285 : vector<8x64xf32>
    %cst_132 = arith.constant 0.000000e+00 : f32
    %287 = vector.broadcast %cst_132 : f32 to vector<8x64xf32>
    %288 = arith.maximumf %286, %287 : vector<8x64xf32>
    %c1_133 = arith.constant 1 : index
    %c0_134 = arith.constant 0 : index
    %c0_135 = arith.constant 0 : index
    %289 = vector.load %arg19[%c1_133, %c0_134, %c0_135] : memref<2x64x32xf32, #tpu.memory_space<vmem>>, vector<1x64x32xf32>
    %290 = vector.shape_cast %289 : vector<1x64x32xf32> to vector<64x32xf32>
    %c1_136 = arith.constant 1 : index
    %c0_137 = arith.constant 0 : index
    %c0_138 = arith.constant 0 : index
    %291 = vector.load %arg20[%c1_136, %c0_137, %c0_138] : memref<2x1x32xf32, #tpu.memory_space<vmem>>, vector<1x1x32xf32>
    %292 = vector.shape_cast %291 : vector<1x1x32xf32> to vector<1x32xf32>
    %cst_139 = arith.constant dense<0.000000e+00> : vector<8x32xf32>
    %293 = tpu.matmul %288, %290, %cst_139 {dimension_numbers = #tpu.dot_dimension_numbers<[1], [0], [0], [1], [0, 0, 1, 1], [], []>} : vector<8x64xf32>, vector<64x32xf32>, vector<8x32xf32> -> vector<8x32xf32>
    %294 = vector.broadcast %292 : vector<1x32xf32> to vector<8x32xf32>
    %295 = arith.addf %293, %294 : vector<8x32xf32>
    %296 = arith.addf %279, %295 : vector<8x32xf32>
    %cst_140 = arith.constant dense<0.000000e+00> : vector<8xf32>
    %297 = vector.multi_reduction <add>, %296, %cst_140 [1] : vector<8x32xf32> to vector<8xf32>
    %298 = vector.shape_cast %297 : vector<8xf32> to vector<8x1xf32>
    %cst_141 = arith.constant 3.200000e+01 : f32
    %299 = vector.broadcast %cst_141 : f32 to vector<8x1xf32>
    %300 = arith.divf %298, %299 : vector<8x1xf32>
    %301 = vector.broadcast %300 : vector<8x1xf32> to vector<8x32xf32>
    %302 = arith.subf %296, %301 : vector<8x32xf32>
    %303 = arith.mulf %302, %302 : vector<8x32xf32>
    %cst_142 = arith.constant dense<0.000000e+00> : vector<8xf32>
    %304 = vector.multi_reduction <add>, %303, %cst_142 [1] : vector<8x32xf32> to vector<8xf32>
    %305 = vector.shape_cast %304 : vector<8xf32> to vector<8x1xf32>
    %cst_143 = arith.constant 3.200000e+01 : f32
    %306 = vector.broadcast %cst_143 : f32 to vector<8x1xf32>
    %307 = arith.divf %305, %306 : vector<8x1xf32>
    %308 = vector.broadcast %300 : vector<8x1xf32> to vector<8x32xf32>
    %309 = arith.subf %296, %308 : vector<8x32xf32>
    %cst_144 = arith.constant 9.99999974E-6 : f32
    %310 = vector.broadcast %cst_144 : f32 to vector<8x1xf32>
    %311 = arith.addf %307, %310 : vector<8x1xf32>
    %312 = math.rsqrt %311 : vector<8x1xf32>
    %313 = vector.broadcast %312 : vector<8x1xf32> to vector<8x32xf32>
    %314 = arith.mulf %309, %313 : vector<8x32xf32>
    %315 = vector.broadcast %13 : vector<1x32xf32> to vector<8x32xf32>
    %316 = arith.mulf %314, %315 : vector<8x32xf32>
    %317 = vector.broadcast %14 : vector<1x32xf32> to vector<8x32xf32>
    %318 = arith.addf %316, %317 : vector<8x32xf32>
    %c0_145 = arith.constant 0 : index
    %c0_146 = arith.constant 0 : index
    %319 = vector.load %arg9[%c0_145, %c0_146] : memref<1x32xf32, #tpu.memory_space<vmem>>, vector<1x32xf32>
    %c0_147 = arith.constant 0 : index
    %c0_148 = arith.constant 0 : index
    %320 = vector.load %arg10[%c0_147, %c0_148] : memref<1x32xf32, #tpu.memory_space<vmem>>, vector<1x32xf32>
    %c1_149 = arith.constant 1 : index
    %c0_150 = arith.constant 0 : index
    %c0_151 = arith.constant 0 : index
    %321 = vector.load %arg21[%c1_149, %c0_150, %c0_151] : memref<2x32x32xf32, #tpu.memory_space<vmem>>, vector<1x32x32xf32>
    %322 = vector.shape_cast %321 : vector<1x32x32xf32> to vector<32x32xf32>
    %c1_152 = arith.constant 1 : index
    %c0_153 = arith.constant 0 : index
    %c0_154 = arith.constant 0 : index
    %323 = vector.load %arg22[%c1_152, %c0_153, %c0_154] : memref<2x1x32xf32, #tpu.memory_space<vmem>>, vector<1x1x32xf32>
    %324 = vector.shape_cast %323 : vector<1x1x32xf32> to vector<1x32xf32>
    %c1_155 = arith.constant 1 : index
    %c0_156 = arith.constant 0 : index
    %c0_157 = arith.constant 0 : index
    %325 = vector.load %arg23[%c1_155, %c0_156, %c0_157] : memref<2x32x32xf32, #tpu.memory_space<vmem>>, vector<1x32x32xf32>
    %326 = vector.shape_cast %325 : vector<1x32x32xf32> to vector<32x32xf32>
    %c1_158 = arith.constant 1 : index
    %c0_159 = arith.constant 0 : index
    %c0_160 = arith.constant 0 : index
    %327 = vector.load %arg24[%c1_158, %c0_159, %c0_160] : memref<2x1x32xf32, #tpu.memory_space<vmem>>, vector<1x1x32xf32>
    %328 = vector.shape_cast %327 : vector<1x1x32xf32> to vector<1x32xf32>
    %c1_161 = arith.constant 1 : index
    %c0_162 = arith.constant 0 : index
    %c0_163 = arith.constant 0 : index
    %329 = vector.load %arg25[%c1_161, %c0_162, %c0_163] : memref<2x32x32xf32, #tpu.memory_space<vmem>>, vector<1x32x32xf32>
    %330 = vector.shape_cast %329 : vector<1x32x32xf32> to vector<32x32xf32>
    %c1_164 = arith.constant 1 : index
    %c0_165 = arith.constant 0 : index
    %c0_166 = arith.constant 0 : index
    %331 = vector.load %arg26[%c1_164, %c0_165, %c0_166] : memref<2x1x32xf32, #tpu.memory_space<vmem>>, vector<1x1x32xf32>
    %332 = vector.shape_cast %331 : vector<1x1x32xf32> to vector<1x32xf32>
    %cst_167 = arith.constant dense<0.000000e+00> : vector<8x32xf32>
    %333 = tpu.matmul %12, %322, %cst_167 {dimension_numbers = #tpu.dot_dimension_numbers<[1], [0], [0], [1], [0, 0, 1, 1], [], []>} : vector<8x32xf32>, vector<32x32xf32>, vector<8x32xf32> -> vector<8x32xf32>
    %334 = vector.broadcast %324 : vector<1x32xf32> to vector<8x32xf32>
    %335 = arith.addf %333, %334 : vector<8x32xf32>
    %cst_168 = arith.constant dense<0.000000e+00> : vector<8x32xf32>
    %336 = tpu.matmul %12, %326, %cst_168 {dimension_numbers = #tpu.dot_dimension_numbers<[1], [0], [0], [1], [0, 0, 1, 1], [], []>} : vector<8x32xf32>, vector<32x32xf32>, vector<8x32xf32> -> vector<8x32xf32>
    %337 = vector.broadcast %328 : vector<1x32xf32> to vector<8x32xf32>
    %338 = arith.addf %336, %337 : vector<8x32xf32>
    %cst_169 = arith.constant dense<0.000000e+00> : vector<8x32xf32>
    %339 = tpu.matmul %12, %330, %cst_169 {dimension_numbers = #tpu.dot_dimension_numbers<[1], [0], [0], [1], [0, 0, 1, 1], [], []>} : vector<8x32xf32>, vector<32x32xf32>, vector<8x32xf32> -> vector<8x32xf32>
    %340 = vector.broadcast %332 : vector<1x32xf32> to vector<8x32xf32>
    %341 = arith.addf %339, %340 : vector<8x32xf32>
    %342 = tpu.iota {dimensions = array<i32: 0>} : vector<8x8xi32>
    %343 = tpu.iota {dimensions = array<i32: 1>} : vector<8x8xi32>
    %344 = arith.cmpi sgt, %343, %342 : vector<8x8xi32>
    %cst_170 = arith.constant -1.000000e+30 : f32
    %cst_171 = arith.constant 0.000000e+00 : f32
    %345 = vector.broadcast %cst_170 : f32 to vector<8x8xf32>
    %346 = vector.broadcast %cst_171 : f32 to vector<8x8xf32>
    %347 = arith.select %344, %345, %346 : vector<8x8xi1>, vector<8x8xf32>
    %348 = vector.extract_strided_slice %335 {offsets = [0, 0], sizes = [8, 8], strides = [1, 1]} : vector<8x32xf32> to vector<8x8xf32>
    %349 = vector.extract_strided_slice %338 {offsets = [0, 0], sizes = [8, 8], strides = [1, 1]} : vector<8x32xf32> to vector<8x8xf32>
    %350 = vector.extract_strided_slice %341 {offsets = [0, 0], sizes = [8, 8], strides = [1, 1]} : vector<8x32xf32> to vector<8x8xf32>
    %cst_172 = arith.constant dense<0.000000e+00> : vector<8x8xf32>
    %351 = tpu.matmul %348, %349, %cst_172 {dimension_numbers = #tpu.dot_dimension_numbers<[1], [1], [0], [0], [0, 0, 1, 0], [], []>} : vector<8x8xf32>, vector<8x8xf32>, vector<8x8xf32> -> vector<8x8xf32>
    %cst_173 = arith.constant 3.125000e-02 : f32
    %352 = vector.broadcast %cst_173 : f32 to vector<8x8xf32>
    %353 = arith.mulf %351, %352 : vector<8x8xf32>
    %354 = arith.addf %353, %347 : vector<8x8xf32>
    %cst_174 = arith.constant dense<0xFF800000> : vector<8xf32>
    %355 = vector.multi_reduction <maximumf>, %354, %cst_174 [1] : vector<8x8xf32> to vector<8xf32>
    %356 = vector.shape_cast %355 : vector<8xf32> to vector<8x1xf32>
    %357 = vector.broadcast %356 : vector<8x1xf32> to vector<8x8xf32>
    %358 = arith.subf %354, %357 : vector<8x8xf32>
    %359 = math.exp %358 : vector<8x8xf32>
    %cst_175 = arith.constant dense<0.000000e+00> : vector<8xf32>
    %360 = vector.multi_reduction <add>, %359, %cst_175 [1] : vector<8x8xf32> to vector<8xf32>
    %361 = vector.shape_cast %360 : vector<8xf32> to vector<8x1xf32>
    %362 = tpu.reciprocal %361 {approx = true} : vector<8x1xf32> -> vector<8x1xf32>
    %363 = vector.broadcast %362 : vector<8x1xf32> to vector<8x8xf32>
    %364 = arith.mulf %359, %363 : vector<8x8xf32>
    %cst_176 = arith.constant dense<0.000000e+00> : vector<8x8xf32>
    %365 = tpu.matmul %364, %350, %cst_176 {dimension_numbers = #tpu.dot_dimension_numbers<[1], [0], [0], [1], [0, 0, 1, 1], [], []>} : vector<8x8xf32>, vector<8x8xf32>, vector<8x8xf32> -> vector<8x8xf32>
    %366 = vector.extract_strided_slice %335 {offsets = [0, 8], sizes = [8, 8], strides = [1, 1]} : vector<8x32xf32> to vector<8x8xf32>
    %367 = vector.extract_strided_slice %338 {offsets = [0, 8], sizes = [8, 8], strides = [1, 1]} : vector<8x32xf32> to vector<8x8xf32>
    %368 = vector.extract_strided_slice %341 {offsets = [0, 8], sizes = [8, 8], strides = [1, 1]} : vector<8x32xf32> to vector<8x8xf32>
    %cst_177 = arith.constant dense<0.000000e+00> : vector<8x8xf32>
    %369 = tpu.matmul %366, %367, %cst_177 {dimension_numbers = #tpu.dot_dimension_numbers<[1], [1], [0], [0], [0, 0, 1, 0], [], []>} : vector<8x8xf32>, vector<8x8xf32>, vector<8x8xf32> -> vector<8x8xf32>
    %cst_178 = arith.constant 3.125000e-02 : f32
    %370 = vector.broadcast %cst_178 : f32 to vector<8x8xf32>
    %371 = arith.mulf %369, %370 : vector<8x8xf32>
    %372 = arith.addf %371, %347 : vector<8x8xf32>
    %cst_179 = arith.constant dense<0xFF800000> : vector<8xf32>
    %373 = vector.multi_reduction <maximumf>, %372, %cst_179 [1] : vector<8x8xf32> to vector<8xf32>
    %374 = vector.shape_cast %373 : vector<8xf32> to vector<8x1xf32>
    %375 = vector.broadcast %374 : vector<8x1xf32> to vector<8x8xf32>
    %376 = arith.subf %372, %375 : vector<8x8xf32>
    %377 = math.exp %376 : vector<8x8xf32>
    %cst_180 = arith.constant dense<0.000000e+00> : vector<8xf32>
    %378 = vector.multi_reduction <add>, %377, %cst_180 [1] : vector<8x8xf32> to vector<8xf32>
    %379 = vector.shape_cast %378 : vector<8xf32> to vector<8x1xf32>
    %380 = tpu.reciprocal %379 {approx = true} : vector<8x1xf32> -> vector<8x1xf32>
    %381 = vector.broadcast %380 : vector<8x1xf32> to vector<8x8xf32>
    %382 = arith.mulf %377, %381 : vector<8x8xf32>
    %cst_181 = arith.constant dense<0.000000e+00> : vector<8x8xf32>
    %383 = tpu.matmul %382, %368, %cst_181 {dimension_numbers = #tpu.dot_dimension_numbers<[1], [0], [0], [1], [0, 0, 1, 1], [], []>} : vector<8x8xf32>, vector<8x8xf32>, vector<8x8xf32> -> vector<8x8xf32>
    %384 = vector.extract_strided_slice %335 {offsets = [0, 16], sizes = [8, 8], strides = [1, 1]} : vector<8x32xf32> to vector<8x8xf32>
    %385 = vector.extract_strided_slice %338 {offsets = [0, 16], sizes = [8, 8], strides = [1, 1]} : vector<8x32xf32> to vector<8x8xf32>
    %386 = vector.extract_strided_slice %341 {offsets = [0, 16], sizes = [8, 8], strides = [1, 1]} : vector<8x32xf32> to vector<8x8xf32>
    %cst_182 = arith.constant dense<0.000000e+00> : vector<8x8xf32>
    %387 = tpu.matmul %384, %385, %cst_182 {dimension_numbers = #tpu.dot_dimension_numbers<[1], [1], [0], [0], [0, 0, 1, 0], [], []>} : vector<8x8xf32>, vector<8x8xf32>, vector<8x8xf32> -> vector<8x8xf32>
    %cst_183 = arith.constant 3.125000e-02 : f32
    %388 = vector.broadcast %cst_183 : f32 to vector<8x8xf32>
    %389 = arith.mulf %387, %388 : vector<8x8xf32>
    %390 = arith.addf %389, %347 : vector<8x8xf32>
    %cst_184 = arith.constant dense<0xFF800000> : vector<8xf32>
    %391 = vector.multi_reduction <maximumf>, %390, %cst_184 [1] : vector<8x8xf32> to vector<8xf32>
    %392 = vector.shape_cast %391 : vector<8xf32> to vector<8x1xf32>
    %393 = vector.broadcast %392 : vector<8x1xf32> to vector<8x8xf32>
    %394 = arith.subf %390, %393 : vector<8x8xf32>
    %395 = math.exp %394 : vector<8x8xf32>
    %cst_185 = arith.constant dense<0.000000e+00> : vector<8xf32>
    %396 = vector.multi_reduction <add>, %395, %cst_185 [1] : vector<8x8xf32> to vector<8xf32>
    %397 = vector.shape_cast %396 : vector<8xf32> to vector<8x1xf32>
    %398 = tpu.reciprocal %397 {approx = true} : vector<8x1xf32> -> vector<8x1xf32>
    %399 = vector.broadcast %398 : vector<8x1xf32> to vector<8x8xf32>
    %400 = arith.mulf %395, %399 : vector<8x8xf32>
    %cst_186 = arith.constant dense<0.000000e+00> : vector<8x8xf32>
    %401 = tpu.matmul %400, %386, %cst_186 {dimension_numbers = #tpu.dot_dimension_numbers<[1], [0], [0], [1], [0, 0, 1, 1], [], []>} : vector<8x8xf32>, vector<8x8xf32>, vector<8x8xf32> -> vector<8x8xf32>
    %402 = vector.extract_strided_slice %335 {offsets = [0, 24], sizes = [8, 8], strides = [1, 1]} : vector<8x32xf32> to vector<8x8xf32>
    %403 = vector.extract_strided_slice %338 {offsets = [0, 24], sizes = [8, 8], strides = [1, 1]} : vector<8x32xf32> to vector<8x8xf32>
    %404 = vector.extract_strided_slice %341 {offsets = [0, 24], sizes = [8, 8], strides = [1, 1]} : vector<8x32xf32> to vector<8x8xf32>
    %cst_187 = arith.constant dense<0.000000e+00> : vector<8x8xf32>
    %405 = tpu.matmul %402, %403, %cst_187 {dimension_numbers = #tpu.dot_dimension_numbers<[1], [1], [0], [0], [0, 0, 1, 0], [], []>} : vector<8x8xf32>, vector<8x8xf32>, vector<8x8xf32> -> vector<8x8xf32>
    %cst_188 = arith.constant 3.125000e-02 : f32
    %406 = vector.broadcast %cst_188 : f32 to vector<8x8xf32>
    %407 = arith.mulf %405, %406 : vector<8x8xf32>
    %408 = arith.addf %407, %347 : vector<8x8xf32>
    %cst_189 = arith.constant dense<0xFF800000> : vector<8xf32>
    %409 = vector.multi_reduction <maximumf>, %408, %cst_189 [1] : vector<8x8xf32> to vector<8xf32>
    %410 = vector.shape_cast %409 : vector<8xf32> to vector<8x1xf32>
    %411 = vector.broadcast %410 : vector<8x1xf32> to vector<8x8xf32>
    %412 = arith.subf %408, %411 : vector<8x8xf32>
    %413 = math.exp %412 : vector<8x8xf32>
    %cst_190 = arith.constant dense<0.000000e+00> : vector<8xf32>
    %414 = vector.multi_reduction <add>, %413, %cst_190 [1] : vector<8x8xf32> to vector<8xf32>
    %415 = vector.shape_cast %414 : vector<8xf32> to vector<8x1xf32>
    %416 = tpu.reciprocal %415 {approx = true} : vector<8x1xf32> -> vector<8x1xf32>
    %417 = vector.broadcast %416 : vector<8x1xf32> to vector<8x8xf32>
    %418 = arith.mulf %413, %417 : vector<8x8xf32>
    %cst_191 = arith.constant dense<0.000000e+00> : vector<8x8xf32>
    %419 = tpu.matmul %418, %404, %cst_191 {dimension_numbers = #tpu.dot_dimension_numbers<[1], [0], [0], [1], [0, 0, 1, 1], [], []>} : vector<8x8xf32>, vector<8x8xf32>, vector<8x8xf32> -> vector<8x8xf32>
    %420 = tpu.concatenate %365, %383, %401, %419 in 1 : vector<8x8xf32>, vector<8x8xf32>, vector<8x8xf32>, vector<8x8xf32> -> vector<8x32xf32>
    %421 = arith.addf %12, %420 : vector<8x32xf32>
    %cst_192 = arith.constant dense<0.000000e+00> : vector<8xf32>
    %422 = vector.multi_reduction <add>, %421, %cst_192 [1] : vector<8x32xf32> to vector<8xf32>
    %423 = vector.shape_cast %422 : vector<8xf32> to vector<8x1xf32>
    %cst_193 = arith.constant 3.200000e+01 : f32
    %424 = vector.broadcast %cst_193 : f32 to vector<8x1xf32>
    %425 = arith.divf %423, %424 : vector<8x1xf32>
    %426 = vector.broadcast %425 : vector<8x1xf32> to vector<8x32xf32>
    %427 = arith.subf %421, %426 : vector<8x32xf32>
    %428 = arith.mulf %427, %427 : vector<8x32xf32>
    %cst_194 = arith.constant dense<0.000000e+00> : vector<8xf32>
    %429 = vector.multi_reduction <add>, %428, %cst_194 [1] : vector<8x32xf32> to vector<8xf32>
    %430 = vector.shape_cast %429 : vector<8xf32> to vector<8x1xf32>
    %cst_195 = arith.constant 3.200000e+01 : f32
    %431 = vector.broadcast %cst_195 : f32 to vector<8x1xf32>
    %432 = arith.divf %430, %431 : vector<8x1xf32>
    %433 = vector.broadcast %425 : vector<8x1xf32> to vector<8x32xf32>
    %434 = arith.subf %421, %433 : vector<8x32xf32>
    %cst_196 = arith.constant 9.99999974E-6 : f32
    %435 = vector.broadcast %cst_196 : f32 to vector<8x1xf32>
    %436 = arith.addf %432, %435 : vector<8x1xf32>
    %437 = math.rsqrt %436 : vector<8x1xf32>
    %438 = vector.broadcast %437 : vector<8x1xf32> to vector<8x32xf32>
    %439 = arith.mulf %434, %438 : vector<8x32xf32>
    %440 = vector.broadcast %319 : vector<1x32xf32> to vector<8x32xf32>
    %441 = arith.mulf %439, %440 : vector<8x32xf32>
    %442 = vector.broadcast %320 : vector<1x32xf32> to vector<8x32xf32>
    %443 = arith.addf %441, %442 : vector<8x32xf32>
    %c1_197 = arith.constant 1 : index
    %c0_198 = arith.constant 0 : index
    %c0_199 = arith.constant 0 : index
    %444 = vector.load %arg27[%c1_197, %c0_198, %c0_199] : memref<2x32x32xf32, #tpu.memory_space<vmem>>, vector<1x32x32xf32>
    %445 = vector.shape_cast %444 : vector<1x32x32xf32> to vector<32x32xf32>
    %c1_200 = arith.constant 1 : index
    %c0_201 = arith.constant 0 : index
    %c0_202 = arith.constant 0 : index
    %446 = vector.load %arg28[%c1_200, %c0_201, %c0_202] : memref<2x1x32xf32, #tpu.memory_space<vmem>>, vector<1x1x32xf32>
    %447 = vector.shape_cast %446 : vector<1x1x32xf32> to vector<1x32xf32>
    %c1_203 = arith.constant 1 : index
    %c0_204 = arith.constant 0 : index
    %c0_205 = arith.constant 0 : index
    %448 = vector.load %arg29[%c1_203, %c0_204, %c0_205] : memref<2x32x32xf32, #tpu.memory_space<vmem>>, vector<1x32x32xf32>
    %449 = vector.shape_cast %448 : vector<1x32x32xf32> to vector<32x32xf32>
    %c1_206 = arith.constant 1 : index
    %c0_207 = arith.constant 0 : index
    %c0_208 = arith.constant 0 : index
    %450 = vector.load %arg30[%c1_206, %c0_207, %c0_208] : memref<2x1x32xf32, #tpu.memory_space<vmem>>, vector<1x1x32xf32>
    %451 = vector.shape_cast %450 : vector<1x1x32xf32> to vector<1x32xf32>
    %c1_209 = arith.constant 1 : index
    %c0_210 = arith.constant 0 : index
    %c0_211 = arith.constant 0 : index
    %452 = vector.load %arg31[%c1_209, %c0_210, %c0_211] : memref<2x32x32xf32, #tpu.memory_space<vmem>>, vector<1x32x32xf32>
    %453 = vector.shape_cast %452 : vector<1x32x32xf32> to vector<32x32xf32>
    %c1_212 = arith.constant 1 : index
    %c0_213 = arith.constant 0 : index
    %c0_214 = arith.constant 0 : index
    %454 = vector.load %arg32[%c1_212, %c0_213, %c0_214] : memref<2x1x32xf32, #tpu.memory_space<vmem>>, vector<1x1x32xf32>
    %455 = vector.shape_cast %454 : vector<1x1x32xf32> to vector<1x32xf32>
    %cst_215 = arith.constant dense<0.000000e+00> : vector<8x32xf32>
    %456 = tpu.matmul %443, %445, %cst_215 {dimension_numbers = #tpu.dot_dimension_numbers<[1], [0], [0], [1], [0, 0, 1, 1], [], []>} : vector<8x32xf32>, vector<32x32xf32>, vector<8x32xf32> -> vector<8x32xf32>
    %457 = vector.broadcast %447 : vector<1x32xf32> to vector<8x32xf32>
    %458 = arith.addf %456, %457 : vector<8x32xf32>
    %cst_216 = arith.constant dense<0.000000e+00> : vector<8x32xf32>
    %459 = tpu.matmul %318, %449, %cst_216 {dimension_numbers = #tpu.dot_dimension_numbers<[1], [0], [0], [1], [0, 0, 1, 1], [], []>} : vector<8x32xf32>, vector<32x32xf32>, vector<8x32xf32> -> vector<8x32xf32>
    %460 = vector.broadcast %451 : vector<1x32xf32> to vector<8x32xf32>
    %461 = arith.addf %459, %460 : vector<8x32xf32>
    %cst_217 = arith.constant dense<0.000000e+00> : vector<8x32xf32>
    %462 = tpu.matmul %318, %453, %cst_217 {dimension_numbers = #tpu.dot_dimension_numbers<[1], [0], [0], [1], [0, 0, 1, 1], [], []>} : vector<8x32xf32>, vector<32x32xf32>, vector<8x32xf32> -> vector<8x32xf32>
    %463 = vector.broadcast %455 : vector<1x32xf32> to vector<8x32xf32>
    %464 = arith.addf %462, %463 : vector<8x32xf32>
    %465 = vector.extract_strided_slice %458 {offsets = [0, 0], sizes = [8, 8], strides = [1, 1]} : vector<8x32xf32> to vector<8x8xf32>
    %466 = vector.extract_strided_slice %461 {offsets = [0, 0], sizes = [8, 8], strides = [1, 1]} : vector<8x32xf32> to vector<8x8xf32>
    %467 = vector.extract_strided_slice %464 {offsets = [0, 0], sizes = [8, 8], strides = [1, 1]} : vector<8x32xf32> to vector<8x8xf32>
    %cst_218 = arith.constant dense<0.000000e+00> : vector<8x8xf32>
    %468 = tpu.matmul %465, %466, %cst_218 {dimension_numbers = #tpu.dot_dimension_numbers<[1], [1], [0], [0], [0, 0, 1, 0], [], []>} : vector<8x8xf32>, vector<8x8xf32>, vector<8x8xf32> -> vector<8x8xf32>
    %cst_219 = arith.constant 3.125000e-02 : f32
    %469 = vector.broadcast %cst_219 : f32 to vector<8x8xf32>
    %470 = arith.mulf %468, %469 : vector<8x8xf32>
    %cst_220 = arith.constant dense<0xFF800000> : vector<8xf32>
    %471 = vector.multi_reduction <maximumf>, %470, %cst_220 [1] : vector<8x8xf32> to vector<8xf32>
    %472 = vector.shape_cast %471 : vector<8xf32> to vector<8x1xf32>
    %473 = vector.broadcast %472 : vector<8x1xf32> to vector<8x8xf32>
    %474 = arith.subf %470, %473 : vector<8x8xf32>
    %475 = math.exp %474 : vector<8x8xf32>
    %cst_221 = arith.constant dense<0.000000e+00> : vector<8xf32>
    %476 = vector.multi_reduction <add>, %475, %cst_221 [1] : vector<8x8xf32> to vector<8xf32>
    %477 = vector.shape_cast %476 : vector<8xf32> to vector<8x1xf32>
    %478 = tpu.reciprocal %477 {approx = true} : vector<8x1xf32> -> vector<8x1xf32>
    %479 = vector.broadcast %478 : vector<8x1xf32> to vector<8x8xf32>
    %480 = arith.mulf %475, %479 : vector<8x8xf32>
    %cst_222 = arith.constant dense<0.000000e+00> : vector<8x8xf32>
    %481 = tpu.matmul %480, %467, %cst_222 {dimension_numbers = #tpu.dot_dimension_numbers<[1], [0], [0], [1], [0, 0, 1, 1], [], []>} : vector<8x8xf32>, vector<8x8xf32>, vector<8x8xf32> -> vector<8x8xf32>
    %482 = vector.extract_strided_slice %458 {offsets = [0, 8], sizes = [8, 8], strides = [1, 1]} : vector<8x32xf32> to vector<8x8xf32>
    %483 = vector.extract_strided_slice %461 {offsets = [0, 8], sizes = [8, 8], strides = [1, 1]} : vector<8x32xf32> to vector<8x8xf32>
    %484 = vector.extract_strided_slice %464 {offsets = [0, 8], sizes = [8, 8], strides = [1, 1]} : vector<8x32xf32> to vector<8x8xf32>
    %cst_223 = arith.constant dense<0.000000e+00> : vector<8x8xf32>
    %485 = tpu.matmul %482, %483, %cst_223 {dimension_numbers = #tpu.dot_dimension_numbers<[1], [1], [0], [0], [0, 0, 1, 0], [], []>} : vector<8x8xf32>, vector<8x8xf32>, vector<8x8xf32> -> vector<8x8xf32>
    %cst_224 = arith.constant 3.125000e-02 : f32
    %486 = vector.broadcast %cst_224 : f32 to vector<8x8xf32>
    %487 = arith.mulf %485, %486 : vector<8x8xf32>
    %cst_225 = arith.constant dense<0xFF800000> : vector<8xf32>
    %488 = vector.multi_reduction <maximumf>, %487, %cst_225 [1] : vector<8x8xf32> to vector<8xf32>
    %489 = vector.shape_cast %488 : vector<8xf32> to vector<8x1xf32>
    %490 = vector.broadcast %489 : vector<8x1xf32> to vector<8x8xf32>
    %491 = arith.subf %487, %490 : vector<8x8xf32>
    %492 = math.exp %491 : vector<8x8xf32>
    %cst_226 = arith.constant dense<0.000000e+00> : vector<8xf32>
    %493 = vector.multi_reduction <add>, %492, %cst_226 [1] : vector<8x8xf32> to vector<8xf32>
    %494 = vector.shape_cast %493 : vector<8xf32> to vector<8x1xf32>
    %495 = tpu.reciprocal %494 {approx = true} : vector<8x1xf32> -> vector<8x1xf32>
    %496 = vector.broadcast %495 : vector<8x1xf32> to vector<8x8xf32>
    %497 = arith.mulf %492, %496 : vector<8x8xf32>
    %cst_227 = arith.constant dense<0.000000e+00> : vector<8x8xf32>
    %498 = tpu.matmul %497, %484, %cst_227 {dimension_numbers = #tpu.dot_dimension_numbers<[1], [0], [0], [1], [0, 0, 1, 1], [], []>} : vector<8x8xf32>, vector<8x8xf32>, vector<8x8xf32> -> vector<8x8xf32>
    %499 = vector.extract_strided_slice %458 {offsets = [0, 16], sizes = [8, 8], strides = [1, 1]} : vector<8x32xf32> to vector<8x8xf32>
    %500 = vector.extract_strided_slice %461 {offsets = [0, 16], sizes = [8, 8], strides = [1, 1]} : vector<8x32xf32> to vector<8x8xf32>
    %501 = vector.extract_strided_slice %464 {offsets = [0, 16], sizes = [8, 8], strides = [1, 1]} : vector<8x32xf32> to vector<8x8xf32>
    %cst_228 = arith.constant dense<0.000000e+00> : vector<8x8xf32>
    %502 = tpu.matmul %499, %500, %cst_228 {dimension_numbers = #tpu.dot_dimension_numbers<[1], [1], [0], [0], [0, 0, 1, 0], [], []>} : vector<8x8xf32>, vector<8x8xf32>, vector<8x8xf32> -> vector<8x8xf32>
    %cst_229 = arith.constant 3.125000e-02 : f32
    %503 = vector.broadcast %cst_229 : f32 to vector<8x8xf32>
    %504 = arith.mulf %502, %503 : vector<8x8xf32>
    %cst_230 = arith.constant dense<0xFF800000> : vector<8xf32>
    %505 = vector.multi_reduction <maximumf>, %504, %cst_230 [1] : vector<8x8xf32> to vector<8xf32>
    %506 = vector.shape_cast %505 : vector<8xf32> to vector<8x1xf32>
    %507 = vector.broadcast %506 : vector<8x1xf32> to vector<8x8xf32>
    %508 = arith.subf %504, %507 : vector<8x8xf32>
    %509 = math.exp %508 : vector<8x8xf32>
    %cst_231 = arith.constant dense<0.000000e+00> : vector<8xf32>
    %510 = vector.multi_reduction <add>, %509, %cst_231 [1] : vector<8x8xf32> to vector<8xf32>
    %511 = vector.shape_cast %510 : vector<8xf32> to vector<8x1xf32>
    %512 = tpu.reciprocal %511 {approx = true} : vector<8x1xf32> -> vector<8x1xf32>
    %513 = vector.broadcast %512 : vector<8x1xf32> to vector<8x8xf32>
    %514 = arith.mulf %509, %513 : vector<8x8xf32>
    %cst_232 = arith.constant dense<0.000000e+00> : vector<8x8xf32>
    %515 = tpu.matmul %514, %501, %cst_232 {dimension_numbers = #tpu.dot_dimension_numbers<[1], [0], [0], [1], [0, 0, 1, 1], [], []>} : vector<8x8xf32>, vector<8x8xf32>, vector<8x8xf32> -> vector<8x8xf32>
    %516 = vector.extract_strided_slice %458 {offsets = [0, 24], sizes = [8, 8], strides = [1, 1]} : vector<8x32xf32> to vector<8x8xf32>
    %517 = vector.extract_strided_slice %461 {offsets = [0, 24], sizes = [8, 8], strides = [1, 1]} : vector<8x32xf32> to vector<8x8xf32>
    %518 = vector.extract_strided_slice %464 {offsets = [0, 24], sizes = [8, 8], strides = [1, 1]} : vector<8x32xf32> to vector<8x8xf32>
    %cst_233 = arith.constant dense<0.000000e+00> : vector<8x8xf32>
    %519 = tpu.matmul %516, %517, %cst_233 {dimension_numbers = #tpu.dot_dimension_numbers<[1], [1], [0], [0], [0, 0, 1, 0], [], []>} : vector<8x8xf32>, vector<8x8xf32>, vector<8x8xf32> -> vector<8x8xf32>
    %cst_234 = arith.constant 3.125000e-02 : f32
    %520 = vector.broadcast %cst_234 : f32 to vector<8x8xf32>
    %521 = arith.mulf %519, %520 : vector<8x8xf32>
    %cst_235 = arith.constant dense<0xFF800000> : vector<8xf32>
    %522 = vector.multi_reduction <maximumf>, %521, %cst_235 [1] : vector<8x8xf32> to vector<8xf32>
    %523 = vector.shape_cast %522 : vector<8xf32> to vector<8x1xf32>
    %524 = vector.broadcast %523 : vector<8x1xf32> to vector<8x8xf32>
    %525 = arith.subf %521, %524 : vector<8x8xf32>
    %526 = math.exp %525 : vector<8x8xf32>
    %cst_236 = arith.constant dense<0.000000e+00> : vector<8xf32>
    %527 = vector.multi_reduction <add>, %526, %cst_236 [1] : vector<8x8xf32> to vector<8xf32>
    %528 = vector.shape_cast %527 : vector<8xf32> to vector<8x1xf32>
    %529 = tpu.reciprocal %528 {approx = true} : vector<8x1xf32> -> vector<8x1xf32>
    %530 = vector.broadcast %529 : vector<8x1xf32> to vector<8x8xf32>
    %531 = arith.mulf %526, %530 : vector<8x8xf32>
    %cst_237 = arith.constant dense<0.000000e+00> : vector<8x8xf32>
    %532 = tpu.matmul %531, %518, %cst_237 {dimension_numbers = #tpu.dot_dimension_numbers<[1], [0], [0], [1], [0, 0, 1, 1], [], []>} : vector<8x8xf32>, vector<8x8xf32>, vector<8x8xf32> -> vector<8x8xf32>
    %533 = tpu.concatenate %481, %498, %515, %532 in 1 : vector<8x8xf32>, vector<8x8xf32>, vector<8x8xf32>, vector<8x8xf32> -> vector<8x32xf32>
    %534 = arith.addf %443, %533 : vector<8x32xf32>
    %cst_238 = arith.constant dense<0.000000e+00> : vector<8xf32>
    %535 = vector.multi_reduction <add>, %534, %cst_238 [1] : vector<8x32xf32> to vector<8xf32>
    %536 = vector.shape_cast %535 : vector<8xf32> to vector<8x1xf32>
    %cst_239 = arith.constant 3.200000e+01 : f32
    %537 = vector.broadcast %cst_239 : f32 to vector<8x1xf32>
    %538 = arith.divf %536, %537 : vector<8x1xf32>
    %539 = vector.broadcast %538 : vector<8x1xf32> to vector<8x32xf32>
    %540 = arith.subf %534, %539 : vector<8x32xf32>
    %541 = arith.mulf %540, %540 : vector<8x32xf32>
    %cst_240 = arith.constant dense<0.000000e+00> : vector<8xf32>
    %542 = vector.multi_reduction <add>, %541, %cst_240 [1] : vector<8x32xf32> to vector<8xf32>
    %543 = vector.shape_cast %542 : vector<8xf32> to vector<8x1xf32>
    %cst_241 = arith.constant 3.200000e+01 : f32
    %544 = vector.broadcast %cst_241 : f32 to vector<8x1xf32>
    %545 = arith.divf %543, %544 : vector<8x1xf32>
    %546 = vector.broadcast %538 : vector<8x1xf32> to vector<8x32xf32>
    %547 = arith.subf %534, %546 : vector<8x32xf32>
    %cst_242 = arith.constant 9.99999974E-6 : f32
    %548 = vector.broadcast %cst_242 : f32 to vector<8x1xf32>
    %549 = arith.addf %545, %548 : vector<8x1xf32>
    %550 = math.rsqrt %549 : vector<8x1xf32>
    %551 = vector.broadcast %550 : vector<8x1xf32> to vector<8x32xf32>
    %552 = arith.mulf %547, %551 : vector<8x32xf32>
    %553 = vector.broadcast %319 : vector<1x32xf32> to vector<8x32xf32>
    %554 = arith.mulf %552, %553 : vector<8x32xf32>
    %555 = vector.broadcast %320 : vector<1x32xf32> to vector<8x32xf32>
    %556 = arith.addf %554, %555 : vector<8x32xf32>
    %c1_243 = arith.constant 1 : index
    %c0_244 = arith.constant 0 : index
    %c0_245 = arith.constant 0 : index
    %557 = vector.load %arg33[%c1_243, %c0_244, %c0_245] : memref<2x32x64xf32, #tpu.memory_space<vmem>>, vector<1x32x64xf32>
    %558 = vector.shape_cast %557 : vector<1x32x64xf32> to vector<32x64xf32>
    %c1_246 = arith.constant 1 : index
    %c0_247 = arith.constant 0 : index
    %c0_248 = arith.constant 0 : index
    %559 = vector.load %arg34[%c1_246, %c0_247, %c0_248] : memref<2x1x64xf32, #tpu.memory_space<vmem>>, vector<1x1x64xf32>
    %560 = vector.shape_cast %559 : vector<1x1x64xf32> to vector<1x64xf32>
    %cst_249 = arith.constant dense<0.000000e+00> : vector<8x64xf32>
    %561 = tpu.matmul %556, %558, %cst_249 {dimension_numbers = #tpu.dot_dimension_numbers<[1], [0], [0], [1], [0, 0, 1, 1], [], []>} : vector<8x32xf32>, vector<32x64xf32>, vector<8x64xf32> -> vector<8x64xf32>
    %562 = vector.broadcast %560 : vector<1x64xf32> to vector<8x64xf32>
    %563 = arith.addf %561, %562 : vector<8x64xf32>
    %cst_250 = arith.constant 0.000000e+00 : f32
    %564 = vector.broadcast %cst_250 : f32 to vector<8x64xf32>
    %565 = arith.maximumf %563, %564 : vector<8x64xf32>
    %c1_251 = arith.constant 1 : index
    %c0_252 = arith.constant 0 : index
    %c0_253 = arith.constant 0 : index
    %566 = vector.load %arg35[%c1_251, %c0_252, %c0_253] : memref<2x64x32xf32, #tpu.memory_space<vmem>>, vector<1x64x32xf32>
    %567 = vector.shape_cast %566 : vector<1x64x32xf32> to vector<64x32xf32>
    %c1_254 = arith.constant 1 : index
    %c0_255 = arith.constant 0 : index
    %c0_256 = arith.constant 0 : index
    %568 = vector.load %arg36[%c1_254, %c0_255, %c0_256] : memref<2x1x32xf32, #tpu.memory_space<vmem>>, vector<1x1x32xf32>
    %569 = vector.shape_cast %568 : vector<1x1x32xf32> to vector<1x32xf32>
    %cst_257 = arith.constant dense<0.000000e+00> : vector<8x32xf32>
    %570 = tpu.matmul %565, %567, %cst_257 {dimension_numbers = #tpu.dot_dimension_numbers<[1], [0], [0], [1], [0, 0, 1, 1], [], []>} : vector<8x64xf32>, vector<64x32xf32>, vector<8x32xf32> -> vector<8x32xf32>
    %571 = vector.broadcast %569 : vector<1x32xf32> to vector<8x32xf32>
    %572 = arith.addf %570, %571 : vector<8x32xf32>
    %573 = arith.addf %556, %572 : vector<8x32xf32>
    %cst_258 = arith.constant dense<0.000000e+00> : vector<8xf32>
    %574 = vector.multi_reduction <add>, %573, %cst_258 [1] : vector<8x32xf32> to vector<8xf32>
    %575 = vector.shape_cast %574 : vector<8xf32> to vector<8x1xf32>
    %cst_259 = arith.constant 3.200000e+01 : f32
    %576 = vector.broadcast %cst_259 : f32 to vector<8x1xf32>
    %577 = arith.divf %575, %576 : vector<8x1xf32>
    %578 = vector.broadcast %577 : vector<8x1xf32> to vector<8x32xf32>
    %579 = arith.subf %573, %578 : vector<8x32xf32>
    %580 = arith.mulf %579, %579 : vector<8x32xf32>
    %cst_260 = arith.constant dense<0.000000e+00> : vector<8xf32>
    %581 = vector.multi_reduction <add>, %580, %cst_260 [1] : vector<8x32xf32> to vector<8xf32>
    %582 = vector.shape_cast %581 : vector<8xf32> to vector<8x1xf32>
    %cst_261 = arith.constant 3.200000e+01 : f32
    %583 = vector.broadcast %cst_261 : f32 to vector<8x1xf32>
    %584 = arith.divf %582, %583 : vector<8x1xf32>
    %585 = vector.broadcast %577 : vector<8x1xf32> to vector<8x32xf32>
    %586 = arith.subf %573, %585 : vector<8x32xf32>
    %cst_262 = arith.constant 9.99999974E-6 : f32
    %587 = vector.broadcast %cst_262 : f32 to vector<8x1xf32>
    %588 = arith.addf %584, %587 : vector<8x1xf32>
    %589 = math.rsqrt %588 : vector<8x1xf32>
    %590 = vector.broadcast %589 : vector<8x1xf32> to vector<8x32xf32>
    %591 = arith.mulf %586, %590 : vector<8x32xf32>
    %592 = vector.broadcast %319 : vector<1x32xf32> to vector<8x32xf32>
    %593 = arith.mulf %591, %592 : vector<8x32xf32>
    %594 = vector.broadcast %320 : vector<1x32xf32> to vector<8x32xf32>
    %595 = arith.addf %593, %594 : vector<8x32xf32>
    %c0_263 = arith.constant 0 : index
    %c0_264 = arith.constant 0 : index
    %596 = vector.load %arg5[%c0_263, %c0_264] : memref<32x16xf32, #tpu.memory_space<vmem>>, vector<32x16xf32>
    %c0_265 = arith.constant 0 : index
    %c0_266 = arith.constant 0 : index
    %597 = vector.load %arg6[%c0_265, %c0_266] : memref<1x16xf32, #tpu.memory_space<vmem>>, vector<1x16xf32>
    %cst_267 = arith.constant dense<0.000000e+00> : vector<8x16xf32>
    %598 = tpu.matmul %595, %596, %cst_267 {dimension_numbers = #tpu.dot_dimension_numbers<[1], [0], [0], [1], [0, 0, 1, 1], [], []>} : vector<8x32xf32>, vector<32x16xf32>, vector<8x16xf32> -> vector<8x16xf32>
    %599 = vector.broadcast %597 : vector<1x16xf32> to vector<8x16xf32>
    %600 = arith.addf %598, %599 : vector<8x16xf32>
    %cst_268 = arith.constant dense<0xFF800000> : vector<8xf32>
    %601 = vector.multi_reduction <maximumf>, %600, %cst_268 [1] : vector<8x16xf32> to vector<8xf32>
    %602 = vector.shape_cast %601 : vector<8xf32> to vector<8x1xf32>
    %603 = vector.broadcast %602 : vector<8x1xf32> to vector<8x16xf32>
    %604 = arith.subf %600, %603 : vector<8x16xf32>
    %605 = math.exp %604 : vector<8x16xf32>
    %cst_269 = arith.constant dense<0.000000e+00> : vector<8xf32>
    %606 = vector.multi_reduction <add>, %605, %cst_269 [1] : vector<8x16xf32> to vector<8xf32>
    %607 = vector.shape_cast %606 : vector<8xf32> to vector<8x1xf32>
    %608 = tpu.reciprocal %607 : vector<8x1xf32> -> vector<8x1xf32>
    %609 = vector.broadcast %608 : vector<8x1xf32> to vector<8x16xf32>
    %610 = arith.mulf %605, %609 : vector<8x16xf32>
    %c0_270 = arith.constant 0 : index
    %c0_271 = arith.constant 0 : index
    %611 = vector.load %arg37[%c0_270, %c0_271] : memref<8x16xf32, #tpu.memory_space<vmem>>, vector<8x16xf32>
    tpu.vector_store %arg37[%c0_270, %c0_271], %610 {strides = array<i32>} : memref<8x16xf32, #tpu.memory_space<vmem>>, vector<8x16xf32>,
    return
  }
}

</mosaic_0001>

<bundles_post_ra>
// kernel: tpu_custom_call.1
= control target key start
LH: loop header
LB: loop body
LE: loop exit
PB: predicated region body
PF: predicated region fallthrough
CT: control target
= control target key end

     0   :  { %s6394_s6 = smov 1   ;;  %s6395_s10 = smov 2   ;;  %s7258_s0 = inlined_call_operand.smem [shape: u32[38], index: -1, kind: input, shape index: {}] }
   0x1   :  { %s6469_s5 = sld [smem:[%s7258_s0]]   ;;  %s6396_s14 = smov 3  }
   0x2   :  { %s6474_s9 = sld [smem:[%s7258_s0 + %s6394_s6]]   ;;  %s6397_s18 = smov 4  }
   0x3   :  { %s6479_s13 = sld [smem:[%s7258_s0 + %s6395_s10]]   ;;  %s6398_s22 = smov 5  }
   0x4   :  { %s6484_s17 = sld [smem:[%s7258_s0 + %s6396_s14]]   ;;  %s6399_s26 = smov 6  }
   0x5   :  { %s6489_s21 = sld [smem:[%s7258_s0 + %s6397_s18]]   ;;  %s6400_s30 = smov 7  }
   0x6   :  { %s6494_s25 = sld [smem:[%s7258_s0 + %s6398_s22]]   ;;  %s6401_s4 = smov 8  }
   0x7   :  { %s6499_s29 = sld [smem:[%s7258_s0 + %s6399_s26]]   ;;  %s6402_s10 = smov 9  }
   0x8   :  { %s6504_s3 = sld [smem:[%s7258_s0 + %s6400_s30]]   ;;  %s6403_s15 = smov 10  }
   0x9   :  { %s6509_s8 = sld [smem:[%s7258_s0 + %s6401_s4]]   ;;  %s6404_s20 = smov 11  }
   0xa   :  { %7268 = sst [smem:[#allocation44_spill]] %s6484_s17  ;;  %s6405_s26 = smov 12  }
   0xb   :  { %s6514_s14 = sld [smem:[%s7258_s0 + %s6402_s10]]   ;;  %s6406_s1 = smov 13  }
   0xc   :  { %7269 = sst [smem:[#allocation45_spill]] %s6494_s25  ;;  %s6407_s7 = smov 14  }
   0xd   :  { %s6519_s19 = sld [smem:[%s7258_s0 + %s6403_s15]]   ;;  %s6408_s15 = smov 15  }
   0xe   :  { %s6524_s24 = sld [smem:[%s7258_s0 + %s6404_s20]]   ;;  %s6409_s22 = smov 16  }
   0xf   :  { %s6529_s30 = sld [smem:[%s7258_s0 + %s6405_s26]]   ;;  %s6410_s28 = smov 17  }
  0x10   :  { %s6534_s6 = sld [smem:[%s7258_s0 + %s6406_s1]]  }
  0x11   :  { %s6539_s12 = sld [smem:[%s7258_s0 + %s6407_s7]]   ;;  %s6411_s7 = smov 18  }
  0x12   :  { %s6544_s20 = sld [smem:[%s7258_s0 + %s6408_s15]]   ;;  %s6412_s15 = smov 19  }
  0x13   :  { %s6549_s27 = sld [smem:[%s7258_s0 + %s6409_s22]]   ;;  %s6413_s22 = smov 20  }
  0x14   :  { %7270 = sst [smem:[#allocation46_spill]] %s6524_s24 }
  0x15   :  { %7271 = sst [smem:[#allocation47_spill]] %s6529_s30 }
  0x16   :  { %7272 = sst [smem:[#allocation48_spill]] %s6534_s6 }
  0x17   :  { %s6554_s4 = sld [smem:[%s7258_s0 + %s6410_s28]]   ;;  %s6414_s28 = smov 21  }
  0x18   :  { %7273 = sst [smem:[#allocation49_spill]] %s6544_s20 }
  0x19   :  { %7274 = sst [smem:[#allocation50_spill]] %s6549_s27 }
  0x1a   :  { %s6559_s25 = sld [smem:[%s7258_s0 + %s6411_s7]]   ;;  %s6415_s7 = smov 22  }
  0x1b   :  { %s6564_s30 = sld [smem:[%s7258_s0 + %s6412_s15]]   ;;  %s6416_s15 = smov 23  }
  0x1c   :  { %s6569_s20 = sld [smem:[%s7258_s0 + %s6413_s22]]   ;;  %s6417_s22 = smov 24  }
  0x1d   :  { %7275 = sst [smem:[#allocation51_spill]] %s6554_s4 }
  0x1e   :  { %s6574_s4 = sld [smem:[%s7258_s0 + %s6414_s28]]   ;;  %s6418_s28 = smov 25  }
  0x1f   :  { %s6579_s6 = sld [smem:[%s7258_s0 + %s6415_s7]]   ;;  %s6419_s7 = smov 26  }
  0x20   :  { %s6589_s24 = sld [smem:[%s7258_s0 + %s6417_s22]]   ;;  %s6421_s22 = smov 28  }
  0x21   :  { %7276 = sst [smem:[#allocation52_spill]] %s6564_s30 }
  0x22   :  { %7277 = sst [smem:[#allocation53_spill]] %s6569_s20 }
  0x23   :  { %s6584_s30 = sld [smem:[%s7258_s0 + %s6416_s15]]   ;;  %s6420_s15 = smov 27  }
  0x24   :  { %7278 = sst [smem:[#allocation54_spill]] %s6574_s4 }
  0x25   :  { %7279 = sst [smem:[#allocation55_spill]] %s6579_s6 }
  0x26   :  { %7280 = sst [smem:[#allocation56_spill]] %s6589_s24 }
  0x27   :  { %s6594_s4 = sld [smem:[%s7258_s0 + %s6418_s28]]   ;;  %s6422_s28 = smov 29  }
  0x28   :  { %s6599_s6 = sld [smem:[%s7258_s0 + %s6419_s7]]   ;;  %s6423_s7 = smov 30  }
  0x29   :  { %s6604_s17 = sld [smem:[%s7258_s0 + %s6420_s15]]   ;;  %s6424_s15 = smov 31  }
  0x2a   :  { %s6609_s24 = sld [smem:[%s7258_s0 + %s6421_s22]]   ;;  %s6425_s22 = smov 32  }
  0x2b   :  { %s6624_s20 = sld [smem:[%s7258_s0 + %s6424_s15]]   ;;  %s6428_s15 = smov 35  }
  0x2c   :  { %s6644_s27 = sld [smem:[%s7258_s0 + %s6428_s15]]  }
  0x2d   :  { %7281 = sst [smem:[#allocation57_spill]] %s6594_s4 }
  0x2e   :  { %7282 = sst [smem:[#allocation58_spill]] %s6599_s6 }
  0x2f   :  { %s6614_s4 = sld [smem:[%s7258_s0 + %s6422_s28]]   ;;  %s6426_s28 = smov 33  }
  0x30   :  { %7283 = sst [smem:[#allocation59_spill]] %s6609_s24 }
  0x31   :  { %s6619_s6 = sld [smem:[%s7258_s0 + %s6423_s7]]   ;;  %s6427_s7 = smov 34  }
  0x32   :  { %s6629_s24 = sld [smem:[%s7258_s0 + %s6425_s22]]   ;;  %s6429_s22 = smov 36  }
  0x35   :  { %7284 = sst [smem:[#allocation60_spill]] %s6614_s4 }
  0x36   :  { %s6634_s4 = sld [smem:[%s7258_s0 + %s6426_s28]]   ;;  %s6430_s28 = smov 37  }
  0x37   :  { %7285 = sst [smem:[#allocation61_spill]] %s6619_s6 }
  0x38   :  { %7286 = sst [smem:[#allocation62_spill]] %s6629_s24 }
  0x39   :  { %s6639_s6 = sld [smem:[%s7258_s0 + %s6427_s7]]  }
  0x3a   :  { %s6649_s24 = sld [smem:[%s7258_s0 + %s6429_s22]]  }
  0x3c   :  { %7287 = sst [smem:[#allocation63_spill]] %s6634_s4 }
  0x3d   :  { %s6654_s4 = sld [smem:[%s7258_s0 + %s6430_s28]]  }
  0x3e   :  { %80 = vsyncpa [#allocation3], 0 }
  0x3f   :  { %81 = vsyncpa [#allocation6], 0 }
  0x40   :  { %82 = vsyncpa [#allocation9], 0 }
  0x41   :  { %83 = vsyncpa [#allocation12], 0 }
  0x42   :  { %84 = vsyncpa [#allocation15], 0 }
  0x43   :  { %85 = vsyncpa [#allocation18], 0 }
  0x44   :  { %86 = vsyncpa [#allocation21], 0 }
  0x45   :  { %87 = vsyncpa [#allocation24], 0 }
  0x46   :  { %88 = vsyncpa [#allocation27], 0 }
  0x47   :  { %89 = vsyncpa [#allocation30], 0 }
  0x48   :  { %90 = vsyncpa [#allocation4], 0  ;;  %s6431_s7 = smov [#allocation5]   ;;  %s6432_s11 = smov [#allocation8]  }
  0x49   :  { %s107_s10 = sshll.u32 %s6431_s7, 4  ;;  %s129_s15 = sshll.u32 %s6432_s11, 4  ;;  %s108_s10 = int_to_ptr.vmem [resolvable:$true] %s107_s10  ;;  %s130_s15 = int_to_ptr.vmem [resolvable:$true] %s129_s15 }
  0x4a   :  { %s5980_s16 = scalar_lea.vmem %s108_s10, 128  ;;  %p5985_p1 = scmp.lt.s32.totalorder %s108_s10, %s108_s10 }
  0x4b   :  { %p5981_p0 = scmp.ne.s32.totalorder %s108_s10, %s5980_s16  ;;  %p5986_p2 = scmp.lt.s32.totalorder %s5980_s16, %s5980_s16 }
  0x4d   :  { %p5987_p3 = por %p5986_p2, %p5985_p1 }
  0x4f   :  { %p5988_p4 = pnand %p5987_p3, %p5981_p0 }
  0x51   :  { %5991 = shalt.err (!%p5988_p4)
}
  0x52   :  { %110 = dma.hbm_to_vmem [thread:$0]  %s6474_s9, 128, %s108_s10, [#allocation6]  }
  0x53   :  { %s6000_s0 = scalar_lea.vmem %s130_s15, 16  ;;  %s6004_s18 = scalar_lea.vmem %s130_s15, 32 }
  0x54   :  { %p6001_p5 = scmp.ne.s32.totalorder %s130_s15, %s6000_s0  ;;  %p6005_p6 = scmp.lt.s32.totalorder %s130_s15, %s130_s15 }
  0x55   :  { %p6006_p7 = scmp.lt.s32.totalorder %s6004_s18, %s6000_s0 }
  0x57   :  { %p6007_p8 = por %p6006_p7, %p6005_p6 }
  0x59   :  { %p6008_p9 = pnand %p6007_p8, %p6001_p5 }
  0x5b   :  { %6011 = shalt.err (!%p6008_p9)
}
  0x5c   :  { %132 = dma.hbm_to_vmem [thread:$0]  %s6489_s21, 16, %s130_s15, [#allocation9]  }
  0x5d   :  { %s6433_s22 = smov [#allocation11]   ;;  %s6434_s26 = smov [#allocation14]  }
  0x5e   :  { %s151_s23 = sshll.u32 %s6433_s22, 4  ;;  %s171_s28 = sshll.u32 %s6434_s26, 4  ;;  %s152_s23 = int_to_ptr.vmem [resolvable:$true] %s151_s23  ;;  %s172_s28 = int_to_ptr.vmem [resolvable:$true] %s171_s28 }
  0x5f   :  { %s6020_s1 = scalar_lea.vmem %s152_s23, 16  ;;  %s6024_s2 = scalar_lea.vmem %s152_s23, 32 }
  0x60   :  { %p6021_p10 = scmp.ne.s32.totalorder %s152_s23, %s6020_s1  ;;  %p6025_p11 = scmp.lt.s32.totalorder %s152_s23, %s152_s23 }
  0x61   :  { %p6026_p12 = scmp.lt.s32.totalorder %s6024_s2, %s6020_s1 }
  0x63   :  { %p6027_p13 = por %p6026_p12, %p6025_p11 }
  0x65   :  { %p6028_p0 = pnand %p6027_p13, %p6021_p10 }
  0x67   :  { %6031 = shalt.err (!%p6028_p0)
}
  0x68   :  { %154 = dma.hbm_to_vmem [thread:$0]  %s6504_s3, 16, %s152_s23, [#allocation12]  }
  0x69   :  { %s6040_s9 = scalar_lea.vmem %s172_s28, 16  ;;  %s6044_s7 = scalar_lea.vmem %s172_s28, 32 }
  0x6a   :  { %p6041_p1 = scmp.ne.s32.totalorder %s172_s28, %s6040_s9  ;;  %p6045_p2 = scmp.lt.s32.totalorder %s172_s28, %s172_s28 }
  0x6b   :  { %p6046_p3 = scmp.lt.s32.totalorder %s6044_s7, %s6040_s9 }
  0x6d   :  { %p6047_p4 = por %p6046_p3, %p6045_p2 }
  0x6f   :  { %p6048_p5 = pnand %p6047_p4, %p6041_p1 }
  0x71   :  { %6051 = shalt.err (!%p6048_p5)
}
  0x72   :  { %174 = dma.hbm_to_vmem [thread:$0]  %s6514_s14, 16, %s172_s28, [#allocation15]  }
  0x73   :  { %s6435_s21 = smov [#allocation17]  }
  0x74   :  { %s196_s10 = sshll.u32 %s6435_s21, 4  ;;  %s197_s10 = int_to_ptr.vmem [resolvable:$true] %s196_s10 }
  0x75   :  { %s6060_s11 = scalar_lea.vmem %s197_s10, 32  ;;  %p6065_p7 = scmp.lt.s32.totalorder %s197_s10, %s197_s10 }
  0x76   :  { %p6061_p6 = scmp.ne.s32.totalorder %s197_s10, %s6060_s11  ;;  %p6066_p8 = scmp.lt.s32.totalorder %s6060_s11, %s6060_s11 }
  0x78   :  { %p6067_p9 = por %p6066_p8, %p6065_p7 }
  0x7a   :  { %p6068_p10 = pnand %p6067_p9, %p6061_p6 }
  0x7c   :  { %6071 = shalt.err (!%p6068_p10)
}
  0x7d   :  { %s6436_s3 = smov 16   ;;  %s6437_s15 = smov 1  }
  0x7e   :  { %202 = dma.hbm_to_vmem [thread:$0]  %s6539_s12, 32, %s197_s10, [#allocation18], %s6436_s3, %s6436_s3, %s6437_s15  }
  0x7f   :  { %s6438_s16 = smov [#allocation20]   ;;  %s6439_s14 = smov [#allocation23]  }
  0x80   :  { %s224_s0 = sshll.u32 %s6438_s16, 4  ;;  %s254_s18 = sshll.u32 %s6439_s14, 4  ;;  %s225_s0 = int_to_ptr.vmem [resolvable:$true] %s224_s0  ;;  %s255_s18 = int_to_ptr.vmem [resolvable:$true] %s254_s18 }
  0x81   :  { %s6080_s22 = scalar_lea.vmem %s225_s0, 32  ;;  %p6085_p12 = scmp.lt.s32.totalorder %s225_s0, %s225_s0 }
  0x82   :  { %p6081_p11 = scmp.ne.s32.totalorder %s225_s0, %s6080_s22  ;;  %p6086_p13 = scmp.lt.s32.totalorder %s6080_s22, %s6080_s22 }
  0x84   :  { %p6087_p0 = por %p6086_p13, %p6085_p12 }
  0x86   :  { %p6088_p1 = pnand %p6087_p0, %p6081_p11 }
  0x88   :  { %6091 = shalt.err (!%p6088_p1)
}
  0x89   :  { %230 = dma.hbm_to_vmem [thread:$0]  %s6559_s25, 32, %s225_s0, [#allocation21], %s6436_s3, %s6436_s3, %s6437_s15  }
  0x8a   :  { %s6100_s23 = scalar_lea.vmem %s255_s18, 1024  ;;  %p6105_p3 = scmp.lt.s32.totalorder %s255_s18, %s255_s18 }
  0x8b   :  { %p6101_p2 = scmp.ne.s32.totalorder %s255_s18, %s6100_s23  ;;  %p6106_p4 = scmp.lt.s32.totalorder %s6100_s23, %s6100_s23 }
  0x8d   :  { %p6107_p5 = por %p6106_p4, %p6105_p3 }
  0x8f   :  { %p6108_p6 = pnand %p6107_p5, %p6101_p2 }
  0x91   :  { %6111 = shalt.err (!%p6108_p6)
}
  0x92   :  { %s6440_s12 = smov 128   ;;  %s6441_s26 = smov 8  }
  0x93   :  { %260 = dma.hbm_to_vmem [thread:$0]  %s6584_s30, 1024, %s255_s18, [#allocation24], %s6440_s12, %s6440_s12, %s6441_s26  }
  0x94   :  { %s6442_s28 = smov [#allocation26]   ;;  %s6443_s2 = smov [#allocation29]  }
  0x95   :  { %s282_s1 = sshll.u32 %s6442_s28, 4  ;;  %s310_s25 = sshll.u32 %s6443_s2, 4  ;;  %s283_s1 = int_to_ptr.vmem [resolvable:$true] %s282_s1  ;;  %s311_s25 = int_to_ptr.vmem [resolvable:$true] %s310_s25 }
  0x96   :  { %s6120_s9 = scalar_lea.vmem %s283_s1, 1024  ;;  %p6125_p8 = scmp.lt.s32.totalorder %s283_s1, %s283_s1 }
  0x97   :  { %p6121_p7 = scmp.ne.s32.totalorder %s283_s1, %s6120_s9  ;;  %p6126_p9 = scmp.lt.s32.totalorder %s6120_s9, %s6120_s9 }
  0x99   :  { %p6127_p10 = por %p6126_p9, %p6125_p8 }
  0x9b   :  { %p6128_p11 = pnand %p6127_p10, %p6121_p7 }
  0x9d   :  { %6131 = shalt.err (!%p6128_p11)
}
  0x9e   :  { %288 = dma.hbm_to_vmem [thread:$0]  %s6604_s17, 1024, %s283_s1, [#allocation27], %s6440_s12, %s6440_s12, %s6441_s26  }
  0x9f   :  { %s6140_s7 = scalar_lea.vmem %s311_s25, 1024  ;;  %p6145_p13 = scmp.lt.s32.totalorder %s311_s25, %s311_s25 }
  0xa0   :  { %p6141_p12 = scmp.ne.s32.totalorder %s311_s25, %s6140_s7  ;;  %p6146_p0 = scmp.lt.s32.totalorder %s6140_s7, %s6140_s7 }
  0xa2   :  { %p6147_p1 = por %p6146_p0, %p6145_p13 }
  0xa4   :  { %p6148_p2 = pnand %p6147_p1, %p6141_p12 }
  0xa6   :  { %6151 = shalt.err (!%p6148_p2)
}
  0xa7   :  { %316 = dma.hbm_to_vmem [thread:$0]  %s6624_s20, 1024, %s311_s25, [#allocation30], %s6440_s12, %s6440_s12, %s6441_s26  }
  0xa8   :  { %s6444_s30 = smov [#allocation2]   ;;  %s6445_s10 = smov [#allocation7]  }
  0xa9   :  { %s97_s21 = sshll.u32 %s6444_s30, 4  ;;  %s117_s11 = sshll.u32 %s6445_s10, 4  ;;  %s98_s21 = int_to_ptr.vmem [resolvable:$true] %s97_s21  ;;  %s118_s11 = int_to_ptr.vmem [resolvable:$true] %s117_s11 }
  0xaa   :  { %s6160_s16 = scalar_lea.vmem %s98_s21, 128  ;;  %p6165_p4 = scmp.lt.s32.totalorder %s98_s21, %s98_s21 }
  0xab   :  { %p6161_p3 = scmp.ne.s32.totalorder %s98_s21, %s6160_s16  ;;  %p6166_p5 = scmp.lt.s32.totalorder %s6160_s16, %s6160_s16 }
  0xad   :  { %p6167_p6 = por %p6166_p5, %p6165_p4 }
  0xaf   :  { %p6168_p7 = pnand %p6167_p6, %p6161_p3 }
  0xb1   :  { %6171 = shalt.err (!%p6168_p7)
}
  0xb2   :  { %100 = dma.hbm_to_vmem [thread:$0]  %s6469_s5, 128, %s98_s21, [#allocation3]  }
  0xb3   :  { %s6180_s17 = scalar_lea.vmem %s118_s11, 128  ;;  %p6185_p9 = scmp.lt.s32.totalorder %s118_s11, %s118_s11 }
  0xb4   :  { %p6181_p8 = scmp.ne.s32.totalorder %s118_s11, %s6180_s17  ;;  %p6186_p10 = scmp.lt.s32.totalorder %s6180_s17, %s6180_s17 }
  0xb6   :  { %p6187_p11 = por %p6186_p10, %p6185_p9 }
  0xb8   :  { %p6188_p12 = pnand %p6187_p11, %p6181_p8 }
  0xba   :  { %6191 = shalt.err (!%p6188_p12)
}
  0xbb   :  { %120 = dma.hbm_to_vmem [thread:$0]  %s6479_s13, 128, %s118_s11, [#allocation6]  }
  0xbc   :  { %s6446_s20 = smov [#allocation10]   ;;  %s6447_s14 = smov [#allocation13]  }
  0xbd   :  { %s141_s0 = sshll.u32 %s6446_s20, 4  ;;  %s161_s18 = sshll.u32 %s6447_s14, 4  ;;  %s142_s0 = int_to_ptr.vmem [resolvable:$true] %s141_s0  ;;  %s162_s18 = int_to_ptr.vmem [resolvable:$true] %s161_s18 }
  0xbe   :  { %s6200_s22 = scalar_lea.vmem %s142_s0, 16  ;;  %s6204_s23 = scalar_lea.vmem %s142_s0, 32 }
  0xbf   :  { %p6201_p13 = scmp.ne.s32.totalorder %s142_s0, %s6200_s22  ;;  %p6205_p0 = scmp.lt.s32.totalorder %s142_s0, %s142_s0 }
  0xc0   :  { %p6206_p1 = scmp.lt.s32.totalorder %s6204_s23, %s6200_s22 }
  0xc2   :  { %p6207_p2 = por %p6206_p1, %p6205_p0 }
  0xc4   :  { %p6208_p3 = pnand %p6207_p2, %p6201_p13 }
  0xc6   :  { %6211 = shalt.err (!%p6208_p3)
}
  0xc7   :  { %144 = dma.hbm_to_vmem [thread:$0]  %s6499_s29, 16, %s142_s0, [#allocation9]  }
  0xc8   :  { %s6220_s5 = scalar_lea.vmem %s162_s18, 16  ;;  %s6224_s28 = scalar_lea.vmem %s162_s18, 32 }
  0xc9   :  { %p6221_p4 = scmp.ne.s32.totalorder %s162_s18, %s6220_s5  ;;  %p6225_p5 = scmp.lt.s32.totalorder %s162_s18, %s162_s18 }
  0xca   :  { %p6226_p6 = scmp.lt.s32.totalorder %s6224_s28, %s6220_s5 }
  0xcc   :  { %p6227_p7 = por %p6226_p6, %p6225_p5 }
  0xce   :  { %p6228_p8 = pnand %p6227_p7, %p6221_p4 }
  0xd0   :  { %6231 = shalt.err (!%p6228_p8)
}
  0xd1   :  { %164 = dma.hbm_to_vmem [thread:$0]  %s6509_s8, 16, %s162_s18, [#allocation12]  }
  0xd2   :  { %s6448_s13 = smov [#allocation16]   ;;  %s6449_s2 = smov [#allocation19]  }
  0xd3   :  { %s181_s1 = sshll.u32 %s6448_s13, 4  ;;  %s210_s25 = sshll.u32 %s6449_s2, 4  ;;  %s182_s1 = int_to_ptr.vmem [resolvable:$true] %s181_s1  ;;  %s211_s25 = int_to_ptr.vmem [resolvable:$true] %s210_s25 }
  0xd4   :  { %s6240_s9 = scalar_lea.vmem %s182_s1, 16  ;;  %s6244_s7 = scalar_lea.vmem %s182_s1, 32 }
  0xd5   :  { %p6241_p9 = scmp.ne.s32.totalorder %s182_s1, %s6240_s9  ;;  %p6245_p10 = scmp.lt.s32.totalorder %s182_s1, %s182_s1 }
  0xd6   :  { %p6246_p11 = scmp.lt.s32.totalorder %s6244_s7, %s6240_s9 }
  0xd8   :  { %p6247_p12 = por %p6246_p11, %p6245_p10 }
  0xda   :  { %p6248_p13 = pnand %p6247_p12, %p6241_p9 }
  0xdc   :  { %6251 = shalt.err (!%p6248_p13)
}
  0xdd   :  { %184 = dma.hbm_to_vmem [thread:$0]  %s6519_s19, 16, %s182_s1, [#allocation15]  }
  0xde   :  { %s6260_s29 = scalar_lea.vmem %s211_s25, 32  ;;  %p6265_p1 = scmp.lt.s32.totalorder %s211_s25, %s211_s25 }
  0xdf   :  { %p6261_p0 = scmp.ne.s32.totalorder %s211_s25, %s6260_s29  ;;  %p6266_p2 = scmp.lt.s32.totalorder %s6260_s29, %s6260_s29 }
  0xe1   :  { %p6267_p3 = por %p6266_p2, %p6265_p1 }
  0xe3   :  { %p6268_p4 = pnand %p6267_p3, %p6261_p0 }
  0xe5   :  { %6271 = shalt.err (!%p6268_p4)
}
  0xe6   :  { %s7288_s8 = sld [smem:[#allocation50_spill]]  ;;  %s6450_s30 = smov [#allocation22]  }
  0xe7   :  { %s238_s21 = sshll.u32 %s6450_s30, 4  ;;  %s6451_s10 = smov [#allocation25]   ;;  %s239_s21 = int_to_ptr.vmem [resolvable:$true] %s238_s21 }
  0xe8   :  { %s268_s11 = sshll.u32 %s6451_s10, 4  ;;  %s6280_s16 = scalar_lea.vmem %s239_s21, 32  ;;  %s269_s11 = int_to_ptr.vmem [resolvable:$true] %s268_s11 }
  0xe9   :  { %p6281_p5 = scmp.ne.s32.totalorder %s239_s21, %s6280_s16  ;;  %p6285_p6 = scmp.lt.s32.totalorder %s239_s21, %s239_s21 }
  0xea   :  { %p6286_p7 = scmp.lt.s32.totalorder %s6280_s16, %s6280_s16 }
  0xec   :  { %216 = dma.hbm_to_vmem [thread:$0]  %s7288_s8, 32, %s211_s25, [#allocation18], %s6436_s3, %s6436_s3, %s6437_s15  }
  0xed   :  { %p6287_p8 = por %p6286_p7, %p6285_p6 }
  0xef   :  { %p6288_p9 = pnand %p6287_p8, %p6281_p5 }
  0xf1   :  { %6291 = shalt.err (!%p6288_p9)
}
  0xf2   :  { %s7289_s19 = sld [smem:[#allocation53_spill]]  ;;  %s6300_s17 = scalar_lea.vmem %s269_s11, 1024 }
  0xf3   :  { %p6301_p10 = scmp.ne.s32.totalorder %s269_s11, %s6300_s17  ;;  %p6305_p11 = scmp.lt.s32.totalorder %s269_s11, %s269_s11 }
  0xf4   :  { %p6306_p12 = scmp.lt.s32.totalorder %s6300_s17, %s6300_s17 }
  0xf6   :  { %p6307_p13 = por %p6306_p12, %p6305_p11 }
  0xf8   :  { %244 = dma.hbm_to_vmem [thread:$0]  %s7289_s19, 32, %s239_s21, [#allocation21], %s6436_s3, %s6436_s3, %s6437_s15  }
  0xf9   :  { %p6308_p0 = pnand %p6307_p13, %p6301_p10 }
  0xfb   :  { %6311 = shalt.err (!%p6308_p0)
}
  0xfc   :  { %s7290_s20 = sld [smem:[#allocation57_spill]]  ;;  %s6452_s0 = smov [#allocation28]  }
  0xfd   :  { %s296_s14 = sshll.u32 %s6452_s0, 4  ;;  %s6453_s18 = smov [#allocation31]   ;;  %s297_s14 = int_to_ptr.vmem [resolvable:$true] %s296_s14 }
  0xfe   :  { %s324_s22 = sshll.u32 %s6453_s18, 4  ;;  %s6320_s23 = scalar_lea.vmem %s297_s14, 1024  ;;  %s325_s22 = int_to_ptr.vmem [resolvable:$true] %s324_s22 }
  0xff   :  { %p6321_p1 = scmp.ne.s32.totalorder %s297_s14, %s6320_s23  ;;  %p6325_p2 = scmp.lt.s32.totalorder %s297_s14, %s297_s14 }
 0x100   :  { %p6326_p3 = scmp.lt.s32.totalorder %s6320_s23, %s6320_s23 }
 0x102   :  { %274 = dma.hbm_to_vmem [thread:$0]  %s7290_s20, 1024, %s269_s11, [#allocation24], %s6440_s12, %s6440_s12, %s6441_s26  }
 0x103   :  { %p6327_p4 = por %p6326_p3, %p6325_p2 }
 0x105   :  { %p6328_p5 = pnand %p6327_p4, %p6321_p1 }
 0x107   :  { %6331 = shalt.err (!%p6328_p5)
}
 0x108   :  { %s7291_s15 = sld [smem:[#allocation60_spill]]  ;;  %s6340_s5 = scalar_lea.vmem %s325_s22, 1024 }
 0x109   :  { %p6341_p6 = scmp.ne.s32.totalorder %s325_s22, %s6340_s5  ;;  %p6345_p7 = scmp.lt.s32.totalorder %s325_s22, %s325_s22 }
 0x10a   :  { %p6346_p8 = scmp.lt.s32.totalorder %s6340_s5, %s6340_s5 }
 0x10c   :  { %p6347_p9 = por %p6346_p8, %p6345_p7 }
 0x10e   :  { %302 = dma.hbm_to_vmem [thread:$0]  %s7291_s15, 1024, %s297_s14, [#allocation27], %s6440_s12, %s6440_s12, %s6441_s26  }
 0x10f   :  { %p6348_p10 = pnand %p6347_p9, %p6341_p6 }
 0x111   :  { %6351 = shalt.err (!%p6348_p10)
}
 0x112   :  { %s7292_s28 = sld [smem:[#allocation63_spill]] }
 0x118   :  { %330 = dma.hbm_to_vmem [thread:$0]  %s7292_s28, 1024, %s325_s22, [#allocation30], %s6440_s12, %s6440_s12, %s6441_s26  }
 0x119   :  { %6372 = dma.done.wait [#allocation3], 128  }
 0x11a   :  { %6373 = vsyncadd [#allocation3], 4294967168 }
 0x11b   :  { %6374 = dma.done.wait [#allocation6], 256  }
 0x11c   :  { %6375 = vsyncadd [#allocation6], 4294967040 }
 0x11d   :  { %6376 = dma.done.wait [#allocation9], 32  }
 0x11e   :  { %6377 = vsyncadd [#allocation9], 4294967264 }
 0x11f   :  { %6378 = dma.done.wait [#allocation12], 32  }
 0x120   :  { %6379 = vsyncadd [#allocation12], 4294967264 }
 0x121   :  { %6380 = dma.done.wait [#allocation15], 32  }
 0x122   :  { %6381 = vsyncadd [#allocation15], 4294967264 }
 0x123   :  { %6382 = dma.done.wait [#allocation18], 64  }
 0x124   :  { %6383 = vsyncadd [#allocation18], 4294967232 }
 0x125   :  { %6384 = dma.done.wait [#allocation21], 64  }
 0x126   :  { %6385 = vsyncadd [#allocation21], 4294967232 }
 0x127   :  { %6386 = dma.done.wait [#allocation24], 2048  }
 0x128   :  { %6387 = vsyncadd [#allocation24], 4294965248 }
 0x129   :  { %6388 = dma.done.wait [#allocation27], 2048  }
 0x12a   :  { %6389 = vsyncadd [#allocation27], 4294965248 }
 0x12b   :  { %6390 = dma.done.wait [#allocation30], 2048  }
 0x12c   :  { %6391 = vsyncadd [#allocation30], 4294965248  ;;  %s7293_s12 = sld [smem:[#allocation44_spill]]  ;;  %v6454_v0 = vmov 0.0   ;;  %vm6455_vm0 = vmmov 0   ;;  %v398_v3 = vld [vmem:[#allocation2] sm:$0xff] }
 0x12d   :  { %5414 = vmatprep.subr.mxu0 %v6454_v0  ;;  %s7294_s13 = sld [smem:[#allocation46_spill]]  ;;  %5418 = vmatprep.mubr.msk.f32.mxu0 %vm6455_vm0, %v6454_v0  ;;  %vm405_vm1 = vcmask 130048   ;;  %v480_v4 = vld [vmem:[#allocation5] sm:$0xff]  ;;  %v5099_v13 = vld [vmem:[#allocation8] ss:$0 sm:$0xff]  ;;  %v394_v14 = vld [vmem:[#allocation7] sm:$0xff] }
 0x12e   :  { %s7295_s1 = sld [smem:[#allocation48_spill]]  ;;  %5421 = vmatprep.subr.mxu1 %v6454_v0  ;;  %5425 = vmatprep.mubr.msk.f32.mxu1 %vm6455_vm0, %v6454_v0  ;;  %vm578_vm2 = vcmask 261120   ;;  %v5104_v27 = vld [vmem:[#allocation17] ss:$0 sm:$0xff]  ;;  %vm804_vm3 = vcmask 64512   ;;  %s6456_s9 = smov 112  }
 0x12f   :  { %s7296_s2 = sld [smem:[#allocation49_spill]]  ;;  %s6457_s7 = smov 120   ;;  %v5106_v35 = vld [vmem:[#allocation19] ss:$0 sm:$0xff]  ;;  %vm1479_vm4 = vcmask 195584   ;;  %vm1610_vm5 = vcmask 523264  }
 0x130   :  { %s7297_s25 = sld [smem:[#allocation47_spill]]  ;;  %s6458_s29 = smov 104  }
 0x131   :  { %s6459_s8 = smov 24   ;;  %s7298_s30 = sld [smem:[#allocation51_spill]] }
 0x132   :  { %v396_v1 = vld [vmem:[%s7293_s12 + $0x8] sm:$0xff]  ;;  %v395_v2 = vld [vmem:[%s7293_s12] sm:$0xff]  ;;  %s7299_s21 = sld [smem:[#allocation52_spill]] }
 0x133   :  { %5415 = vmatpush3.msra.mxu0 %v396_v1  ;;  %5422 = vmatpush3.msra.mxu1 %v396_v1  ;;  %v560_v5 = vld [vmem:[%s7294_s13 + $0x18] sm:$0xff]  ;;  %v559_v7 = vld [vmem:[%s7294_s13 + $0x10] sm:$0xff]  ;;  %v558_v9 = vld [vmem:[%s7294_s13 + $0x8] sm:$0xff]  ;;  %s7300_s10 = sld [smem:[#allocation54_spill]] }
 0x134   :  { %5416 = vmatprep.subr.mxu0 %v6454_v0  ;;  %5423 = vmatprep.subr.mxu1 %v6454_v0  ;;  %v565_v6 = vld [vmem:[%s7295_s1 + $0x18] sm:$0xff]  ;;  %v564_v8 = vld [vmem:[%s7295_s1 + $0x10] sm:$0xff]  ;;  %v563_v10 = vld [vmem:[%s7295_s1 + $0x8] sm:$0xff]  ;;  %s7301_s11 = sld [smem:[#allocation55_spill]] }
 0x135   :  { %5417 = vmatpush3.msra.mxu0 %v395_v2  ;;  %5424 = vmatpush3.msra.mxu1 %v395_v2  ;;  %v557_v11 = vld [vmem:[%s7294_s13] sm:$0xff]  ;;  %v570_v22 = vld [vmem:[%s7296_s2 + $0x18] sm:$0xff]  ;;  %v569_v24 = vld [vmem:[%s7296_s2 + $0x10] sm:$0xff]  ;;  %s7302_s16 = sld [smem:[#allocation56_spill]] }
 0x136   :  { %5419 = vmatmul.mubr.msk.f32.vlgmr.msra.gmra.mxu0 %vm405_vm1, %v398_v3  ;;  %5426 = vmatmul.mubr.msk.f32.vlgmr.msra.gmra.mxu1 %vm405_vm1, %v480_v4  ;;  %v562_v12 = vld [vmem:[%s7295_s1] sm:$0xff]  ;;  %v568_v25 = vld [vmem:[%s7296_s2 + $0x8] sm:$0xff]  ;;  %s7303_s19 = sld [smem:[#allocation58_spill]] }
 0x137   :  { %5428 = vmatprep.subr.mxu0 %v6454_v0  ;;  %5439 = vmatprep.subr.mxu1 %v6454_v0  ;;  %v567_v26 = vld [vmem:[%s7296_s2] sm:$0xff]  ;;  %s7304_s17 = sld [smem:[#allocation61_spill]] }
 0x138   :  { %5429 = vmatpush3.msra.mxu0 %v560_v5  ;;  %5440 = vmatpush3.msra.mxu1 %v565_v6  ;;  %v5102_v31 = vld [vmem:[%s7297_s25] ss:$0 sm:$0xff]  ;;  %s7305_s20 = sld [smem:[#allocation59_spill]] }
 0x139   :  { %5430 = vmatprep.subr.mxu0 %v6454_v0  ;;  %5441 = vmatprep.subr.mxu1 %v6454_v0  ;;  %s7306_s0 = sld [smem:[#allocation62_spill]] }
 0x13a   :  { %5431 = vmatpush3.msra.mxu0 %v559_v7  ;;  %5436 = vmatprep.mubr.msk.f32.mxu0 %vm6455_vm0, %v6454_v0 }
 0x13b   :  { %5432 = vmatprep.subr.mxu0 %v6454_v0  ;;  %5447 = vmatprep.mubr.msk.f32.mxu1 %vm6455_vm0, %v6454_v0 }
 0x13c   :  { %5442 = vmatpush3.msra.mxu1 %v564_v8  ;;  %5433 = vmatpush3.msra.mxu0 %v558_v9 }
 0x13d   :  { %5443 = vmatprep.subr.mxu1 %v6454_v0  ;;  %5434 = vmatprep.subr.mxu0 %v6454_v0 }
 0x13e   :  { %5444 = vmatpush3.msra.mxu1 %v563_v10  ;;  %5435 = vmatpush3.msra.mxu0 %v557_v11 }
 0x13f   :  { %5445 = vmatprep.subr.mxu1 %v6454_v0  ;;  %5450 = vmatprep.subr.mxu0 %v6454_v0 }
 0x140   :  { %5446 = vmatpush3.msra.mxu1 %v562_v12 }
 0x141   :  { %5461 = vmatprep.subr.mxu1 %v6454_v0 }
 0x1f6   :  { %v475_v15 = vpop.f32.mrf.mxu0  ;;  %v550_v16 = vpop.f32.mrf.mxu1 }
 0x1f7   :  { %v476_v17 = vadd.f32 %v5099_v13, %v475_v15  ;;  %v551_v18 = vadd.f32 %v5099_v13, %v550_v16 }
 0x1f8   :  { %v5420_v19 = vpop.f32.mrf.mxu0  ;;  %v5427_v20 = vpop.f32.mrf.mxu1 }
 0x1f9   :  { %v6739_v21 = vadd.f32 %v476_v17, %v394_v14  ;;  %v6742_v23 = vadd.f32 %v551_v18, %v394_v14 }
 0x1fb   :  { %5437 = vmatmul.mubr.msk.f32.vlgmr.msra.gmra.mxu0 %vm578_vm2, %v6739_v21  ;;  %5448 = vmatmul.mubr.msk.f32.vlgmr.msra.gmra.mxu1 %vm578_vm2, %v6739_v21 }
 0x1fc   :  { %5451 = vmatpush3.msra.mxu0 %v570_v22  ;;  %5458 = vmatprep.mubr.msk.f32.mxu0 %vm6455_vm0, %v6454_v0 }
 0x1fd   :  { %5452 = vmatprep.subr.mxu0 %v6454_v0  ;;  %5463 = vmatprep.mubr.msk.f32.mxu1 %vm6455_vm0, %v6454_v0 }
 0x1fe   :  { %5453 = vmatpush3.msra.mxu0 %v569_v24 }
 0x1ff   :  { %5454 = vmatprep.subr.mxu0 %v6454_v0 }
 0x200   :  { %5455 = vmatpush3.msra.mxu0 %v568_v25 }
 0x201   :  { %5456 = vmatprep.subr.mxu0 %v6454_v0 }
 0x202   :  { %5457 = vmatpush3.msra.mxu0 %v567_v26 }
 0x203   :  { %5459 = vmatmul.mubr.msk.f32.vlgmr.msra.gmra.mxu0 %vm578_vm2, %v6739_v21  ;;  %5471 = vmatprep.subr.mxu0 %v6454_v0 }
 0x204   :  { %5473 = vmatprep.mubr.msk.f32.mxu0 %vm6455_vm0, %v6454_v0 }
 0x2bb   :  { %v648_v28 = vpop.f32.mrf.mxu0  ;;  %v724_v29 = vpop.f32.mrf.mxu1 }
 0x2bc   :  { %v725_v30 = vadd.f32 %v5104_v27, %v724_v29  ;;  %v649_v34 = vadd.f32 %v5102_v31, %v648_v28 }
 0x2bd   :  { %v5438_v32 = vpop.f32.mrf.mxu0  ;;  %v5449_v33 = vpop.f32.mrf.mxu1 }
 0x2be   :  { %1135 = vrot.lane.b32.xlu1 %v725_v30, %s6456_s9  ;;  %968 = vrot.lane.b32.xlu0 %v725_v30, %s6457_s7 }
 0x2bf   :  { %5462 = vmatpush3.xpose.msk.msra.mxu1 %vm804_vm3, %v725_v30 }
 0x2c0   :  { %5466 = vmatprep.subr.mxu1 %v6454_v0 }
 0x2c2   :  { %5464 = vmatmul.mubr.msk.f32.vlgmr.msra.gmra.mxu1 %vm804_vm3, %v649_v34  ;;  %1133 = vrot.lane.b32.xlu1 %v649_v34, %s6456_s9 }
 0x2c3   :  { %966 = vrot.lane.b32.xlu0 %v649_v34, %s6457_s7  ;;  %v800_v36 = vpop.f32.mrf.mxu0  ;;  %5468 = vmatprep.mubr.msk.f32.mxu1 %vm6455_vm0, %v6454_v0 }
 0x2c4   :  { %v6773_v37 = vadd.f32 %v5106_v35, %v800_v36 }
 0x2c5   :  { %v5460_v38 = vpop.f32.mrf.mxu0 }
 0x2c6   :  { %5467 = vmatpush3.msra.mxu1 %v6773_v37  ;;  %1299 = vrot.lane.b32.xlu1 %v649_v34, %s6458_s29 }
 0x2c7   :  { %1301 = vrot.lane.b32.xlu0 %v725_v30, %s6458_s29  ;;  %5476 = vmatprep.subr.mxu1 %v6454_v0 }
 0x330   :  { %v969_v39 = vpop.permute.xlu0 %968  ;;  %v1136_v40 = vpop.permute.xlu1 %1135 }
 0x331   :  { %5472 = vmatpush3.xpose.msk.msra.mxu0 %vm804_vm3, %v969_v39 }
 0x332   :  { %5481 = vmatprep.subr.mxu0 %v6454_v0 }
 0x334   :  { %v1134_v42 = vpop.permute.xlu1 %1133 }
 0x335   :  { %v967_v41 = vpop.permute.xlu0 %966 }
 0x336   :  { %5474 = vmatmul.mubr.msk.f32.vlgmr.msra.gmra.mxu0 %vm804_vm3, %v967_v41 }
 0x337   :  { %5482 = vmatpush3.xpose.msk.msra.mxu0 %vm804_vm3, %v1136_v40  ;;  %5483 = vmatprep.mubr.msk.f32.mxu0 %vm6455_vm0, %v6454_v0 }
 0x338   :  { %5491 = vmatprep.subr.mxu0 %v6454_v0  ;;  %v1300_v44 = vpop.permute.xlu1 %1299 }
 0x339   :  { %v1302_v43 = vpop.permute.xlu0 %1301 }
 0x33a   :  { %5484 = vmatmul.mubr.msk.f32.vlgmr.msra.gmra.mxu0 %vm804_vm3, %v1134_v42 }
 0x33b   :  { %5492 = vmatpush3.xpose.msk.msra.mxu0 %vm804_vm3, %v1302_v43  ;;  %5493 = vmatprep.mubr.msk.f32.mxu0 %vm6455_vm0, %v6454_v0 }
 0x33c   :  { %5501 = vmatprep.subr.mxu0 %v6454_v0 }
 0x33e   :  { %5494 = vmatmul.mubr.msk.f32.vlgmr.msra.gmra.mxu0 %vm804_vm3, %v1300_v44 }
 0x33f   :  { %5509 = vmatprep.mubr.msk.f32.mxu0 %vm6455_vm0, %v6454_v0 }
 0x382   :  { %v877_v45 = vpop.f32.mrf.mxu1 }
 0x383   :  { %v881_v46 = vmul.f32 0.03125, %v877_v45 }
 0x384   :  { %v5465_v47 = vpop.f32.mrf.mxu1 }
 0x385   :  { %v882_v48 = vsel %vm804_vm3, %v881_v46, -inf }
 0x386   :  { %883 = vmax.xlane.f32.xlu0 %v882_v48 }
 0x3f6   :  { %v1040_v49 = vpop.f32.mrf.mxu0 }
 0x3f7   :  { %v1044_v50 = vmul.f32 0.03125, %v1040_v49 }
 0x3f8   :  { %v5475_v51 = vpop.f32.mrf.mxu0 }
 0x3f9   :  { %v1045_v52 = vsel %vm804_vm3, %v1044_v50, -inf }
 0x3fa   :  { %1046 = vmax.xlane.f32.xlu1 %v1045_v52  ;;  %v1207_v53 = vpop.f32.mrf.mxu0 }
 0x3fb   :  { %v1211_v54 = vmul.f32 0.03125, %v1207_v53 }
 0x3fc   :  { %v5485_v55 = vpop.f32.mrf.mxu0 }
 0x3fd   :  { %v1212_v56 = vsel %vm804_vm3, %v1211_v54, -inf }
 0x3fe   :  { %1213 = vmax.xlane.f32.xlu0 %v1212_v56  ;;  %v1373_v57 = vpop.f32.mrf.mxu0  ;;  %v1513_v56 = vld [vmem:[%s7298_s30 + $0x18] sm:$0xff] }
 0x3ff   :  { %v1377_v58 = vmul.f32 0.03125, %v1373_v57  ;;  %5502 = vmatpush3.msra.mxu0 %v1513_v56  ;;  %v1512_v57 = vld [vmem:[%s7298_s30 + $0x10] sm:$0xff] }
 0x400   :  { %v5495_v59 = vpop.f32.mrf.mxu0  ;;  %5503 = vmatprep.subr.mxu0 %v6454_v0 }
 0x401   :  { %v1378_v60 = vsel %vm804_vm3, %v1377_v58, -inf  ;;  %5504 = vmatpush3.msra.mxu0 %v1512_v57  ;;  %v1602_v59 = vld [vmem:[%s7299_s21 + $0x38] sm:$0xff] }
 0x402   :  { %1379 = vmax.xlane.f32.xlu0 %v1378_v60  ;;  %5505 = vmatprep.subr.mxu0 %v6454_v0  ;;  %v1601_v60 = vld [vmem:[%s7299_s21 + $0x30] sm:$0xff] }
 0x40b   :  { %1057 = vrot.lane.b32.xlu1 %v6773_v37, %s6457_s7 }
 0x40f   :  { %v884_v61 = vpop.xlane.xlu0 %883 }
 0x410   :  { %v885_v62 = vsub.f32 %v881_v46, %v884_v61  ;;  %v1600_v61 = vld [vmem:[%s7299_s21 + $0x28] sm:$0xff] }
 0x412   :  { %v886_v63 = vmul.f32 1.442695, %v885_v62  ;;  %v1599_v62 = vld [vmem:[%s7299_s21 + $0x20] sm:$0xff] }
 0x414   :  { %5888 = vpow2.f32 %v886_v63  ;;  %v1598_v63 = vld [vmem:[%s7299_s21 + $0x18] sm:$0xff] }
 0x421   :  { %v5889_v1 = vpop.eup %5888 }
 0x422   :  { %v888_v2 = vsel %vm804_vm3, %v5889_v1, 0.0 }
 0x42f   :  { %889 = vadd.xlane.f32.xlu1 %v888_v2 }
 0x483   :  { %v1047_v3 = vpop.xlane.xlu1 %1046 }
 0x484   :  { %v1048_v4 = vsub.f32 %v1044_v50, %v1047_v3 }
 0x486   :  { %v1049_v5 = vmul.f32 1.442695, %v1048_v4 }
 0x487   :  { %v1214_v6 = vpop.xlane.xlu0 %1213  ;;  %v1058_v18 = vpop.permute.xlu1 %1057 }
 0x488   :  { %5890 = vpow2.f32 %v1049_v5  ;;  %v1215_v7 = vsub.f32 %v1211_v54, %v1214_v6  ;;  %v6850_v5 = vld [vmem:[#allocation11] ss:$0 sm:$0xff] }
 0x48a   :  { %v1216_v8 = vmul.f32 1.442695, %v1215_v7  ;;  %v6852_v7 = vld [vmem:[#allocation13] ss:$0 sm:$0xff] }
 0x48b   :  { %v1380_v9 = vpop.xlane.xlu0 %1379 }
 0x48c   :  { %5892 = vpow2.f32 %v1216_v8  ;;  %v1381_v10 = vsub.f32 %v1377_v58, %v1380_v9  ;;  %v1510_v58 = vld [vmem:[%s7298_s30] sm:$0xff] }
 0x48e   :  { %v1382_v11 = vmul.f32 1.442695, %v1381_v10  ;;  %v1597_v10 = vld [vmem:[%s7299_s21 + $0x10] sm:$0xff] }
 0x490   :  { %5894 = vpow2.f32 %v1382_v11  ;;  %v1596_v11 = vld [vmem:[%s7299_s21 + $0x8] sm:$0xff] }
 0x495   :  { %v5891_v12 = vpop.eup %5890 }
 0x496   :  { %v1051_v13 = vsel %vm804_vm3, %v5891_v12, 0.0 }
 0x497   :  { %1052 = vadd.xlane.f32.xlu0 %v1051_v13  ;;  %v5122_v13 = vld [vmem:[#allocation20] ss:$0 sm:$0xff] }
 0x499   :  { %v5893_v14 = vpop.eup %5892 }
 0x49a   :  { %v1218_v15 = vsel %vm804_vm3, %v5893_v14, 0.0 }
 0x49b   :  { %1219 = vadd.xlane.f32.xlu1 %v1218_v15 }
 0x49d   :  { %v5895_v16 = vpop.eup %5894 }
 0x49e   :  { %v1384_v17 = vsel %vm804_vm3, %v5895_v16, 0.0 }
 0x49f   :  { %1385 = vadd.xlane.f32.xlu0 %v1384_v17 }
 0x4ac   :  { %1389 = vrot.lane.b32.xlu1 %v6773_v37, %s6458_s29 }
 0x4b5   :  { %1223 = vrot.lane.b32.xlu0 %v6773_v37, %s6456_s9 }
 0x4b8   :  { %v890_v19 = vpop.xlane.xlu1 %889 }
 0x4b9   :  { %5896 = vrcp.f32 %v890_v19 }
 0x4c6   :  { %v5897_v20 = vpop.eup %5896 }
 0x4c7   :  { %v892_v22 = vmul.f32 %v5897_v20, %v5889_v1 }
 0x4c9   :  { %5469 = vmatmul.mubr.msk.f32.vlgmr.msra.gmra.mxu1 %vm804_vm3, %v892_v22 }
 0x4ca   :  { %5477 = vmatpush3.msra.mxu1 %v1058_v18  ;;  %5478 = vmatprep.mubr.msk.f32.mxu1 %vm6455_vm0, %v6454_v0  ;;  %v5124_v18 = vld [vmem:[#allocation22] ss:$0 sm:$0xff] }
 0x4cb   :  { %5486 = vmatprep.subr.mxu1 %v6454_v0 }
 0x520   :  { %v1053_v24 = vpop.xlane.xlu0 %1052 }
 0x521   :  { %5898 = vrcp.f32 %v1053_v24 }
 0x524   :  { %v1220_v25 = vpop.xlane.xlu1 %1219 }
 0x525   :  { %5900 = vrcp.f32 %v1220_v25 }
 0x528   :  { %v1386_v26 = vpop.xlane.xlu0 %1385  ;;  %v1390_v32 = vpop.permute.xlu1 %1389 }
 0x529   :  { %5902 = vrcp.f32 %v1386_v26 }
 0x52c   :  { %v1224_v29 = vpop.permute.xlu0 %1223 }
 0x52e   :  { %v5899_v27 = vpop.eup %5898 }
 0x52f   :  { %v1055_v28 = vmul.f32 %v5899_v27, %v5891_v12  ;;  %v1595_v12 = vld [vmem:[%s7299_s21] sm:$0xff] }
 0x531   :  { %5479 = vmatmul.mubr.msk.f32.vlgmr.msra.gmra.mxu1 %vm804_vm3, %v1055_v28 }
 0x532   :  { %v5901_v30 = vpop.eup %5900  ;;  %5487 = vmatpush3.msra.mxu1 %v1224_v29  ;;  %5488 = vmatprep.mubr.msk.f32.mxu1 %vm6455_vm0, %v6454_v0 }
 0x533   :  { %5496 = vmatprep.subr.mxu1 %v6454_v0  ;;  %v1222_v31 = vmul.f32 %v5901_v30, %v5893_v14 }
 0x535   :  { %5489 = vmatmul.mubr.msk.f32.vlgmr.msra.gmra.mxu1 %vm804_vm3, %v1222_v31  ;;  %v5129_v31 = vld [vmem:[%s7294_s13 + $0x38] sm:$0xff] }
 0x536   :  { %v5903_v33 = vpop.eup %5902  ;;  %5497 = vmatpush3.msra.mxu1 %v1390_v32  ;;  %5498 = vmatprep.mubr.msk.f32.mxu1 %vm6455_vm0, %v6454_v0  ;;  %v5138_v32 = vld [vmem:[%s7296_s2 + $0x38] sm:$0xff] }
 0x537   :  { %v1388_v34 = vmul.f32 %v5903_v33, %v5895_v16  ;;  %5512 = vmatprep.subr.mxu1 %v6454_v0  ;;  %v5128_v33 = vld [vmem:[%s7294_s13 + $0x30] sm:$0xff] }
 0x539   :  { %5499 = vmatmul.mubr.msk.f32.vlgmr.msra.gmra.mxu1 %vm804_vm3, %v1388_v34  ;;  %v5137_v34 = vld [vmem:[%s7296_s2 + $0x30] sm:$0xff] }
 0x53a   :  { %5528 = vmatprep.mubr.msk.f32.mxu1 %vm6455_vm0, %v6454_v0  ;;  %5513 = vmatpush3.msra.mxu1 %v1602_v59 }
 0x53b   :  { %5514 = vmatprep.subr.mxu1 %v6454_v0 }
 0x53c   :  { %5515 = vmatpush3.msra.mxu1 %v1601_v60 }
 0x53d   :  { %5516 = vmatprep.subr.mxu1 %v6454_v0 }
 0x53e   :  { %5517 = vmatpush3.msra.mxu1 %v1600_v61 }
 0x53f   :  { %5518 = vmatprep.subr.mxu1 %v6454_v0 }
 0x540   :  { %5519 = vmatpush3.msra.mxu1 %v1599_v62 }
 0x541   :  { %5520 = vmatprep.subr.mxu1 %v6454_v0 }
 0x542   :  { %5521 = vmatpush3.msra.mxu1 %v1598_v63 }
 0x543   :  { %5522 = vmatprep.subr.mxu1 %v6454_v0 }
 0x544   :  { %5523 = vmatpush3.msra.mxu1 %v1597_v10 }
 0x545   :  { %5524 = vmatprep.subr.mxu1 %v6454_v0 }
 0x546   :  { %5525 = vmatpush3.msra.mxu1 %v1596_v11 }
 0x547   :  { %5526 = vmatprep.subr.mxu1 %v6454_v0 }
 0x548   :  { %5527 = vmatpush3.msra.mxu1 %v1595_v12 }
 0x549   :  { %5553 = vmatprep.subr.mxu1 %v6454_v0 }
 0x589   :  { %v962_v35 = vpop.f32.mrf.mxu1 }
 0x58b   :  { %v5470_v36 = vpop.f32.mrf.mxu1 }
 0x58c   :  { %v5136_v36 = vld [vmem:[%s7296_s2 + $0x28] sm:$0xff] }
 0x5f1   :  { %v1129_v37 = vpop.f32.mrf.mxu1 }
 0x5f2   :  { %1466 = vrot.lane.b32.xlu1 %v1129_v37, %s6441_s26  ;;  %v5126_v37 = vld [vmem:[%s7294_s13 + $0x20] sm:$0xff] }
 0x5f3   :  { %v5480_v38 = vpop.f32.mrf.mxu1 }
 0x5f4   :  { %v5135_v38 = vld [vmem:[%s7296_s2 + $0x20] sm:$0xff] }
 0x5f5   :  { %v1295_v39 = vpop.f32.mrf.mxu1 }
 0x5f6   :  { %1470 = vrot.lane.b32.xlu0 %v1295_v39, %s6436_s3 }
 0x5f7   :  { %v5490_v40 = vpop.f32.mrf.mxu1 }
 0x5f9   :  { %v1461_v41 = vpop.f32.mrf.mxu1 }
 0x5fa   :  { %1474 = vrot.lane.b32.xlu1 %v1461_v41, %s6459_s8 }
 0x5fb   :  { %v5500_v42 = vpop.f32.mrf.mxu1 }
 0x664   :  { %v1467_v43 = vpop.permute.xlu1 %1466 }
 0x665   :  { %v1477_v45 = vsel %vm804_vm3, %v962_v35, %v1467_v43  ;;  %v5127_v35 = vld [vmem:[%s7294_s13 + $0x28] sm:$0xff] }
 0x668   :  { %v1471_v44 = vpop.permute.xlu0 %1470 }
 0x669   :  { %v1478_v46 = vsel %vm405_vm1, %v1477_v45, %v1471_v44 }
 0x66c   :  { %v1475_v47 = vpop.permute.xlu1 %1474 }
 0x66d   :  { %v1480_v48 = vsel %vm1479_vm4, %v1478_v46, %v1475_v47  ;;  %v5134_v46 = vld [vmem:[%s7295_s1 + $0x38] sm:$0xff]  ;;  %v5133_v47 = vld [vmem:[%s7295_s1 + $0x30] sm:$0xff] }
 0x66e   :  { %v1481_v49 = vadd.f32 %v1480_v48, %v6739_v21  ;;  %v1511_v21 = vld [vmem:[%s7298_s30 + $0x8] sm:$0xff] }
 0x66f   :  { %5506 = vmatpush3.msra.mxu0 %v1511_v21  ;;  %v5132_v48 = vld [vmem:[%s7295_s1 + $0x28] sm:$0xff]  ;;  %v5141_v21 = vld [vmem:[#allocation17 + $0x1] ss:$0 sm:$0xff] }
 0x670   :  { %v1482_v50 = vsel %vm578_vm2, %v1481_v49, 0.0  ;;  %5507 = vmatprep.subr.mxu0 %v6454_v0 }
 0x671   :  { %1483 = vadd.xlane.f32.xlu0 %v1482_v50  ;;  %5508 = vmatpush3.msra.mxu0 %v1510_v58  ;;  %v5139_v50 = vld [vmem:[%s7297_s25 + $0x1] ss:$0 sm:$0xff] }
 0x672   :  { %5531 = vmatprep.subr.mxu0 %v6454_v0 }
 0x6fa   :  { %v1484_v51 = vpop.xlane.xlu0 %1483 }
 0x6fb   :  { %v1486_v52 = vmul.f32 0.03125, %v1484_v51  ;;  %v5143_v51 = vld [vmem:[#allocation19 + $0x1] ss:$0 sm:$0xff] }
 0x6fd   :  { %v1487_v53 = vsub.f32 %v1481_v49, %v1486_v52  ;;  %v5131_v49 = vld [vmem:[%s7295_s1 + $0x20] sm:$0xff] }
 0x6ff   :  { %v1488_v54 = vmul.f32 %v1487_v53, %v1487_v53 }
 0x701   :  { %v1489_v55 = vsel %vm578_vm2, %v1488_v54, 0.0 }
 0x702   :  { %1490 = vadd.xlane.f32.xlu1 %v1489_v55 }
 0x78b   :  { %v1491_v1 = vpop.xlane.xlu1 %1490 }
 0x78c   :  { %v1492_v2 = vmul.f32 0.03125, %v1491_v1 }
 0x78e   :  { %v1493_v3 = vadd.f32 1e-05, %v1492_v2 }
 0x790   :  { %5904 = vrsqrt.f32 %v1493_v3 }
 0x79d   :  { %v5905_v4 = vpop.eup %5904 }
 0x79e   :  { %v1495_v6 = vmul.f32 %v5905_v4, %v1487_v53 }
 0x7a0   :  { %v1502_v8 = vmul.f32 %v6850_v5, %v1495_v6 }
 0x7a2   :  { %v1509_v9 = vadd.f32 %v6852_v7, %v1502_v8 }
 0x7a4   :  { %5510 = vmatmul.mubr.msk.f32.vlgmr.msra.gmra.mxu0 %vm578_vm2, %v1509_v9 }
 0x7a5   :  { %5539 = vmatprep.mubr.msk.f32.mxu0 %vm6455_vm0, %v6454_v0  ;;  %5532 = vmatpush3.msra.mxu0 %v5129_v31 }
 0x7a6   :  { %5533 = vmatprep.subr.mxu0 %v6454_v0 }
 0x7a7   :  { %5534 = vmatpush3.msra.mxu0 %v5128_v33 }
 0x7a8   :  { %5535 = vmatprep.subr.mxu0 %v6454_v0 }
 0x7a9   :  { %5536 = vmatpush3.msra.mxu0 %v5127_v35 }
 0x7aa   :  { %5537 = vmatprep.subr.mxu0 %v6454_v0 }
 0x7ab   :  { %5538 = vmatpush3.msra.mxu0 %v5126_v37 }
 0x7ac   :  { %5542 = vmatprep.subr.mxu0 %v6454_v0 }
 0x864   :  { %v1590_v14 = vpop.f32.mrf.mxu0 }
 0x865   :  { %v1591_v15 = vadd.f32 %v5122_v13, %v1590_v14 }
 0x866   :  { %v5511_v16 = vpop.f32.mrf.mxu0 }
 0x867   :  { %v1594_v17 = vmax.f32 %v1591_v15, 0.0 }
 0x869   :  { %5529 = vmatmul.mubr.msk.f32.vlgmr.msra.gmra.mxu1 %vm1610_vm5, %v1594_v17 }
 0x86a   :  { %5561 = vmatprep.mubr.msk.f32.mxu1 %vm6455_vm0, %v6454_v0  ;;  %5554 = vmatpush3.msra.mxu1 %v5138_v32 }
 0x86b   :  { %5555 = vmatprep.subr.mxu1 %v6454_v0 }
 0x86c   :  { %5556 = vmatpush3.msra.mxu1 %v5137_v34 }
 0x86d   :  { %5557 = vmatprep.subr.mxu1 %v6454_v0 }
 0x86e   :  { %5558 = vmatpush3.msra.mxu1 %v5136_v36 }
 0x86f   :  { %5559 = vmatprep.subr.mxu1 %v6454_v0 }
 0x870   :  { %5560 = vmatpush3.msra.mxu1 %v5135_v38 }
 0x871   :  { %5569 = vmatprep.subr.mxu1 %v6454_v0 }
 0x929   :  { %v1680_v19 = vpop.f32.mrf.mxu1 }
 0x92a   :  { %v1681_v20 = vadd.f32 %v5124_v18, %v1680_v19 }
 0x92b   :  { %v5530_v22 = vpop.f32.mrf.mxu1 }
 0x92c   :  { %v1684_v24 = vadd.f32 %v1681_v20, %v1509_v9 }
 0x92e   :  { %v1685_v25 = vsel %vm578_vm2, %v1684_v24, 0.0 }
 0x92f   :  { %1686 = vadd.xlane.f32.xlu0 %v1685_v25 }
 0x9b8   :  { %v1687_v26 = vpop.xlane.xlu0 %1686 }
 0x9b9   :  { %v1688_v27 = vmul.f32 0.03125, %v1687_v26 }
 0x9bb   :  { %v1689_v28 = vsub.f32 %v1684_v24, %v1688_v27 }
 0x9bd   :  { %v1690_v29 = vmul.f32 %v1689_v28, %v1689_v28 }
 0x9bf   :  { %v1691_v30 = vsel %vm578_vm2, %v1690_v29, 0.0 }
 0x9c0   :  { %1692 = vadd.xlane.f32.xlu0 %v1691_v30 }
 0xa49   :  { %v1693_v39 = vpop.xlane.xlu0 %1692 }
 0xa4a   :  { %v1694_v40 = vmul.f32 0.03125, %v1693_v39 }
 0xa4c   :  { %v1695_v41 = vadd.f32 1e-05, %v1694_v40 }
 0xa4e   :  { %5906 = vrsqrt.f32 %v1695_v41 }
 0xa5b   :  { %v5907_v42 = vpop.eup %5906 }
 0xa5c   :  { %v1697_v43 = vmul.f32 %v5907_v42, %v1689_v28 }
 0xa5e   :  { %v1698_v44 = vmul.f32 %v6850_v5, %v1697_v43 }
 0xa60   :  { %v6888_v45 = vadd.f32 %v6852_v7, %v1698_v44 }
 0xa62   :  { %5540 = vmatmul.mubr.msk.f32.vlgmr.msra.gmra.mxu0 %vm578_vm2, %v6888_v45  ;;  %5562 = vmatmul.mubr.msk.f32.vlgmr.msra.gmra.mxu1 %vm578_vm2, %v6888_v45 }
 0xa63   :  { %5543 = vmatpush3.msra.mxu0 %v5134_v46  ;;  %5550 = vmatprep.mubr.msk.f32.mxu0 %vm6455_vm0, %v6454_v0 }
 0xa64   :  { %5544 = vmatprep.subr.mxu0 %v6454_v0  ;;  %5571 = vmatprep.mubr.msk.f32.mxu1 %vm6455_vm0, %v6454_v0 }
 0xa65   :  { %5545 = vmatpush3.msra.mxu0 %v5133_v47 }
 0xa66   :  { %5546 = vmatprep.subr.mxu0 %v6454_v0 }
 0xa67   :  { %5547 = vmatpush3.msra.mxu0 %v5132_v48 }
 0xa68   :  { %5548 = vmatprep.subr.mxu0 %v6454_v0 }
 0xa69   :  { %5549 = vmatpush3.msra.mxu0 %v5131_v49 }
 0xa6a   :  { %5551 = vmatmul.mubr.msk.f32.vlgmr.msra.gmra.mxu0 %vm578_vm2, %v6888_v45  ;;  %5564 = vmatprep.subr.mxu0 %v6454_v0 }
 0xa6b   :  { %5566 = vmatprep.mubr.msk.f32.mxu0 %vm6455_vm0, %v6454_v0 }
 0xb22   :  { %v1796_v52 = vpop.f32.mrf.mxu0  ;;  %v1948_v53 = vpop.f32.mrf.mxu1 }
 0xb23   :  { %v1797_v54 = vadd.f32 %v5139_v50, %v1796_v52  ;;  %v6911_v55 = vadd.f32 %v5143_v51, %v1948_v53 }
 0xb24   :  { %v5541_v56 = vpop.f32.mrf.mxu0  ;;  %v5563_v57 = vpop.f32.mrf.mxu1 }
 0xb25   :  { %5570 = vmatpush3.msra.mxu1 %v6911_v55  ;;  %2113 = vrot.lane.b32.xlu0 %v1797_v54, %s6457_s7 }
 0xb26   :  { %5579 = vmatprep.subr.mxu1 %v6454_v0 }
 0xb2a   :  { %v1872_v58 = vpop.f32.mrf.mxu0 }
 0xb2b   :  { %v1873_v59 = vadd.f32 %v5141_v21, %v1872_v58 }
 0xb2c   :  { %v5552_v60 = vpop.f32.mrf.mxu0 }
 0xb2d   :  { %2448 = vrot.lane.b32.xlu0 %v1873_v59, %s6458_s29  ;;  %2115 = vrot.lane.b32.xlu1 %v1873_v59, %s6457_s7 }
 0xb2e   :  { %5565 = vmatpush3.xpose.msk.msra.mxu0 %vm804_vm3, %v1873_v59 }
 0xb2f   :  { %5574 = vmatprep.subr.mxu0 %v6454_v0 }
 0xb31   :  { %5567 = vmatmul.mubr.msk.f32.vlgmr.msra.gmra.mxu0 %vm804_vm3, %v1797_v54  ;;  %2282 = vrot.lane.b32.xlu1 %v1873_v59, %s6456_s9 }
 0xb32   :  { %5576 = vmatprep.mubr.msk.f32.mxu0 %vm6455_vm0, %v6454_v0 }
 0xb35   :  { %2280 = vrot.lane.b32.xlu1 %v1797_v54, %s6456_s9 }
 0xb39   :  { %2446 = vrot.lane.b32.xlu1 %v1797_v54, %s6458_s29 }
 0xb97   :  { %v2114_v62 = vpop.permute.xlu0 %2113 }
 0xb9f   :  { %v2116_v61 = vpop.permute.xlu1 %2115  ;;  %v2449_v2 = vpop.permute.xlu0 %2448 }
 0xba0   :  { %5575 = vmatpush3.xpose.msk.msra.mxu0 %vm804_vm3, %v2116_v61 }
 0xba1   :  { %5584 = vmatprep.subr.mxu0 %v6454_v0 }
 0xba3   :  { %v2283_v63 = vpop.permute.xlu1 %2282  ;;  %5577 = vmatmul.mubr.msk.f32.vlgmr.msra.gmra.mxu0 %vm804_vm3, %v2114_v62 }
 0xba4   :  { %5585 = vmatpush3.xpose.msk.msra.mxu0 %vm804_vm3, %v2283_v63  ;;  %5586 = vmatprep.mubr.msk.f32.mxu0 %vm6455_vm0, %v6454_v0 }
 0xba5   :  { %5594 = vmatprep.subr.mxu0 %v6454_v0 }
 0xba7   :  { %v2281_v1 = vpop.permute.xlu1 %2280 }
 0xba8   :  { %5587 = vmatmul.mubr.msk.f32.vlgmr.msra.gmra.mxu0 %vm804_vm3, %v2281_v1 }
 0xba9   :  { %5595 = vmatpush3.xpose.msk.msra.mxu0 %vm804_vm3, %v2449_v2  ;;  %5596 = vmatprep.mubr.msk.f32.mxu0 %vm6455_vm0, %v6454_v0 }
 0xbaa   :  { %5604 = vmatprep.subr.mxu0 %v6454_v0 }
 0xbab   :  { %v2447_v3 = vpop.permute.xlu1 %2446 }
 0xbac   :  { %5597 = vmatmul.mubr.msk.f32.vlgmr.msra.gmra.mxu0 %vm804_vm3, %v2447_v3 }
 0xbad   :  { %5612 = vmatprep.mubr.msk.f32.mxu0 %vm6455_vm0, %v6454_v0 }
 0xbf1   :  { %v2024_v4 = vpop.f32.mrf.mxu0 }
 0xbf2   :  { %v2028_v6 = vmul.f32 0.03125, %v2024_v4 }
 0xbf3   :  { %v5568_v8 = vpop.f32.mrf.mxu0 }
 0xbf4   :  { %v2029_v9 = vsel %vm804_vm3, %v2028_v6, -inf }
 0xbf5   :  { %2030 = vmax.xlane.f32.xlu0 %v2029_v9 }
 0xc63   :  { %v2187_v10 = vpop.f32.mrf.mxu0 }
 0xc64   :  { %v2191_v11 = vmul.f32 0.03125, %v2187_v10 }
 0xc65   :  { %v5578_v12 = vpop.f32.mrf.mxu0 }
 0xc66   :  { %v2192_v13 = vsel %vm804_vm3, %v2191_v11, -inf }
 0xc67   :  { %2193 = vmax.xlane.f32.xlu1 %v2192_v13 }
 0xc68   :  { %v2354_v14 = vpop.f32.mrf.mxu0 }
 0xc69   :  { %v2358_v15 = vmul.f32 0.03125, %v2354_v14 }
 0xc6a   :  { %v5588_v16 = vpop.f32.mrf.mxu0 }
 0xc6b   :  { %v2359_v17 = vsel %vm804_vm3, %v2358_v15, -inf }
 0xc6c   :  { %2360 = vmax.xlane.f32.xlu0 %v2359_v17  ;;  %v2520_v18 = vpop.f32.mrf.mxu0 }
 0xc6d   :  { %v2524_v19 = vmul.f32 0.03125, %v2520_v18 }
 0xc6e   :  { %v5598_v20 = vpop.f32.mrf.mxu0 }
 0xc6f   :  { %v2525_v22 = vsel %vm804_vm3, %v2524_v19, -inf  ;;  %v5159_v20 = vld [vmem:[%s7298_s30 + $0x30] sm:$0xff] }
 0xc70   :  { %2526 = vmax.xlane.f32.xlu0 %v2525_v22  ;;  %v5157_v22 = vld [vmem:[%s7298_s30 + $0x20] sm:$0xff] }
 0xc78   :  { %2204 = vrot.lane.b32.xlu1 %v6911_v55, %s6457_s7 }
 0xc7e   :  { %v2031_v24 = vpop.xlane.xlu0 %2030 }
 0xc7f   :  { %v2032_v25 = vsub.f32 %v2028_v6, %v2031_v24  ;;  %v5170_v24 = vld [vmem:[%s7299_s21 + $0x78] sm:$0xff] }
 0xc81   :  { %v2033_v26 = vmul.f32 1.442695, %v2032_v25  ;;  %v5169_v25 = vld [vmem:[%s7299_s21 + $0x70] sm:$0xff] }
 0xc83   :  { %5908 = vpow2.f32 %v2033_v26  ;;  %v5168_v26 = vld [vmem:[%s7299_s21 + $0x68] sm:$0xff] }
 0xc90   :  { %v5909_v27 = vpop.eup %5908 }
 0xc91   :  { %v2035_v28 = vsel %vm804_vm3, %v5909_v27, 0.0 }
 0xc9c   :  { %2036 = vadd.xlane.f32.xlu1 %v2035_v28  ;;  %v5166_v28 = vld [vmem:[%s7299_s21 + $0x58] sm:$0xff] }
 0xcf0   :  { %v2194_v29 = vpop.xlane.xlu1 %2193 }
 0xcf1   :  { %v2195_v30 = vsub.f32 %v2191_v11, %v2194_v29  ;;  %v5165_v29 = vld [vmem:[%s7299_s21 + $0x50] sm:$0xff] }
 0xcf3   :  { %v2196_v31 = vmul.f32 1.442695, %v2195_v30 }
 0xcf4   :  { %v2205_v44 = vpop.permute.xlu1 %2204 }
 0xcf5   :  { %5910 = vpow2.f32 %v2196_v31  ;;  %v2361_v32 = vpop.xlane.xlu0 %2360 }
 0xcf6   :  { %v2362_v33 = vsub.f32 %v2358_v15, %v2361_v32 }
 0xcf8   :  { %v2363_v34 = vmul.f32 1.442695, %v2362_v33 }
 0xcf9   :  { %v2527_v35 = vpop.xlane.xlu0 %2526 }
 0xcfa   :  { %5912 = vpow2.f32 %v2363_v34  ;;  %v2528_v36 = vsub.f32 %v2524_v19, %v2527_v35  ;;  %v5160_v19 = vld [vmem:[%s7298_s30 + $0x38] sm:$0xff] }
 0xcfb   :  { %5605 = vmatpush3.msra.mxu0 %v5160_v19 }
 0xcfc   :  { %v2529_v37 = vmul.f32 1.442695, %v2528_v36  ;;  %5606 = vmatprep.subr.mxu0 %v6454_v0 }
 0xcfd   :  { %5607 = vmatpush3.msra.mxu0 %v5159_v20 }
 0xcfe   :  { %5914 = vpow2.f32 %v2529_v37  ;;  %5608 = vmatprep.subr.mxu0 %v6454_v0  ;;  %v5176_v37 = vld [vmem:[%s7300_s10 + $0x38] sm:$0xff] }
 0xd02   :  { %v5911_v38 = vpop.eup %5910 }
 0xd03   :  { %v2198_v39 = vsel %vm804_vm3, %v5911_v38, 0.0 }
 0xd04   :  { %2199 = vadd.xlane.f32.xlu0 %v2198_v39  ;;  %v5174_v39 = vld [vmem:[%s7300_s10 + $0x28] sm:$0xff] }
 0xd07   :  { %v5913_v40 = vpop.eup %5912 }
 0xd08   :  { %v2365_v41 = vsel %vm804_vm3, %v5913_v40, 0.0 }
 0xd09   :  { %2366 = vadd.xlane.f32.xlu1 %v2365_v41  ;;  %v2847_v41 = vld [vmem:[#allocation23 + $0x28] sm:$0xff] }
 0xd0b   :  { %v5915_v42 = vpop.eup %5914 }
 0xd0c   :  { %v2531_v43 = vsel %vm804_vm3, %v5915_v42, 0.0 }
 0xd0d   :  { %2532 = vadd.xlane.f32.xlu0 %v2531_v43  ;;  %v5164_v43 = vld [vmem:[%s7299_s21 + $0x48] sm:$0xff] }
 0xd1a   :  { %2536 = vrot.lane.b32.xlu1 %v6911_v55, %s6458_s29 }
 0xd23   :  { %2370 = vrot.lane.b32.xlu0 %v6911_v55, %s6456_s9 }
 0xd25   :  { %v2037_v46 = vpop.xlane.xlu1 %2036 }
 0xd26   :  { %5916 = vrcp.f32 %v2037_v46  ;;  %v5161_v46 = vld [vmem:[#allocation20 + $0x1] ss:$0 sm:$0xff] }
 0xd33   :  { %v5917_v47 = vpop.eup %5916 }
 0xd34   :  { %v2039_v48 = vmul.f32 %v5917_v47, %v5909_v27  ;;  %v5167_v27 = vld [vmem:[%s7299_s21 + $0x60] sm:$0xff] }
 0xd36   :  { %5572 = vmatmul.mubr.msk.f32.vlgmr.msra.gmra.mxu1 %vm804_vm3, %v2039_v48 }
 0xd37   :  { %5580 = vmatpush3.msra.mxu1 %v2205_v44  ;;  %5581 = vmatprep.mubr.msk.f32.mxu1 %vm6455_vm0, %v6454_v0  ;;  %v5163_v44 = vld [vmem:[%s7299_s21 + $0x40] sm:$0xff] }
 0xd38   :  { %5589 = vmatprep.subr.mxu1 %v6454_v0 }
 0xd8d   :  { %v2200_v49 = vpop.xlane.xlu0 %2199 }
 0xd8e   :  { %5918 = vrcp.f32 %v2200_v49 }
 0xd92   :  { %v2367_v50 = vpop.xlane.xlu1 %2366 }
 0xd93   :  { %5920 = vrcp.f32 %v2367_v50 }
 0xd96   :  { %v2533_v51 = vpop.xlane.xlu0 %2532  ;;  %v2537_v57 = vpop.permute.xlu1 %2536 }
 0xd97   :  { %5922 = vrcp.f32 %v2533_v51  ;;  %v2856_v51 = vld [vmem:[#allocation25 + $0x38] sm:$0xff] }
 0xd9a   :  { %v2371_v54 = vpop.permute.xlu0 %2370 }
 0xd9b   :  { %v5919_v52 = vpop.eup %5918 }
 0xd9c   :  { %v2202_v53 = vmul.f32 %v5919_v52, %v5911_v38  ;;  %v5175_v38 = vld [vmem:[%s7300_s10 + $0x30] sm:$0xff]  ;;  %v2855_v52 = vld [vmem:[#allocation25 + $0x30] sm:$0xff] }
 0xd9e   :  { %5582 = vmatmul.mubr.msk.f32.vlgmr.msra.gmra.mxu1 %vm804_vm3, %v2202_v53  ;;  %v5180_v53 = vld [vmem:[%s7301_s11 + $0x1] ss:$0 sm:$0xff] }
 0xd9f   :  { %5590 = vmatpush3.msra.mxu1 %v2371_v54  ;;  %5591 = vmatprep.mubr.msk.f32.mxu1 %vm6455_vm0, %v6454_v0  ;;  %v2854_v54 = vld [vmem:[#allocation25 + $0x28] sm:$0xff] }
 0xda0   :  { %v5921_v55 = vpop.eup %5920  ;;  %5599 = vmatprep.subr.mxu1 %v6454_v0 }
 0xda1   :  { %v2369_v56 = vmul.f32 %v5921_v55, %v5913_v40  ;;  %v5173_v40 = vld [vmem:[%s7300_s10 + $0x20] sm:$0xff] }
 0xda3   :  { %5592 = vmatmul.mubr.msk.f32.vlgmr.msra.gmra.mxu1 %vm804_vm3, %v2369_v56 }
 0xda4   :  { %v5923_v21 = vpop.eup %5922  ;;  %5600 = vmatpush3.msra.mxu1 %v2537_v57  ;;  %5601 = vmatprep.mubr.msk.f32.mxu1 %vm6455_vm0, %v6454_v0  ;;  %v2853_v57 = vld [vmem:[#allocation25 + $0x20] sm:$0xff] }
 0xda5   :  { %v2535_v58 = vmul.f32 %v5923_v21, %v5915_v42  ;;  %5615 = vmatprep.subr.mxu1 %v6454_v0  ;;  %v2846_v42 = vld [vmem:[#allocation23 + $0x20] sm:$0xff] }
 0xda7   :  { %5602 = vmatmul.mubr.msk.f32.vlgmr.msra.gmra.mxu1 %vm804_vm3, %v2535_v58  ;;  %v5182_v58 = vld [vmem:[%s7302_s16 + $0x1] ss:$0 sm:$0xff] }
 0xda8   :  { %5631 = vmatprep.mubr.msk.f32.mxu1 %vm6455_vm0, %v6454_v0  ;;  %5616 = vmatpush3.msra.mxu1 %v5170_v24 }
 0xda9   :  { %5617 = vmatprep.subr.mxu1 %v6454_v0 }
 0xdaa   :  { %5618 = vmatpush3.msra.mxu1 %v5169_v25 }
 0xdab   :  { %5619 = vmatprep.subr.mxu1 %v6454_v0 }
 0xdac   :  { %5620 = vmatpush3.msra.mxu1 %v5168_v26 }
 0xdad   :  { %5621 = vmatprep.subr.mxu1 %v6454_v0 }
 0xdae   :  { %5622 = vmatpush3.msra.mxu1 %v5167_v27 }
 0xdaf   :  { %5623 = vmatprep.subr.mxu1 %v6454_v0 }
 0xdb0   :  { %5624 = vmatpush3.msra.mxu1 %v5166_v28 }
 0xdb1   :  { %5625 = vmatprep.subr.mxu1 %v6454_v0 }
 0xdb2   :  { %5626 = vmatpush3.msra.mxu1 %v5165_v29 }
 0xdb3   :  { %5627 = vmatprep.subr.mxu1 %v6454_v0 }
 0xdb4   :  { %5628 = vmatpush3.msra.mxu1 %v5164_v43 }
 0xdb5   :  { %5629 = vmatprep.subr.mxu1 %v6454_v0 }
 0xdb6   :  { %5630 = vmatpush3.msra.mxu1 %v5163_v44 }
 0xdb7   :  { %5656 = vmatprep.subr.mxu1 %v6454_v0 }
 0xdf6   :  { %v2109_v59 = vpop.f32.mrf.mxu1 }
 0xdf8   :  { %v5573_v60 = vpop.f32.mrf.mxu1 }
 0xe5e   :  { %v2276_v61 = vpop.f32.mrf.mxu1 }
 0xe5f   :  { %2613 = vrot.lane.b32.xlu1 %v2276_v61, %s6441_s26 }
 0xe60   :  { %v5583_v62 = vpop.f32.mrf.mxu1 }
 0xe63   :  { %v2442_v63 = vpop.f32.mrf.mxu1 }
 0xe64   :  { %2617 = vrot.lane.b32.xlu0 %v2442_v63, %s6436_s3 }
 0xe65   :  { %v5593_v1 = vpop.f32.mrf.mxu1 }
 0xe67   :  { %v2608_v2 = vpop.f32.mrf.mxu1 }
 0xe68   :  { %2621 = vrot.lane.b32.xlu1 %v2608_v2, %s6459_s8 }
 0xe69   :  { %v5603_v3 = vpop.f32.mrf.mxu1 }
 0xed1   :  { %v2614_v4 = vpop.permute.xlu1 %2613 }
 0xed2   :  { %v2624_v8 = vsel %vm804_vm3, %v2109_v59, %v2614_v4 }
 0xed6   :  { %v2618_v6 = vpop.permute.xlu0 %2617 }
 0xed7   :  { %v2625_v9 = vsel %vm405_vm1, %v2624_v8, %v2618_v6 }
 0xeda   :  { %v2622_v10 = vpop.permute.xlu1 %2621 }
 0xedb   :  { %v2626_v11 = vsel %vm1479_vm4, %v2625_v9, %v2622_v10  ;;  %v5184_v9 = vld [vmem:[%s7303_s19 + $0x1] ss:$0 sm:$0xff]  ;;  %v3090_v10 = vlaneseq }
 0xedc   :  { %v2627_v12 = vadd.f32 %v2626_v11, %v6888_v45  ;;  %v5158_v45 = vld [vmem:[%s7298_s30 + $0x28] sm:$0xff] }
 0xedd   :  { %5609 = vmatpush3.msra.mxu0 %v5158_v45 }
 0xede   :  { %v2628_v13 = vsel %vm578_vm2, %v2627_v12, 0.0  ;;  %5610 = vmatprep.subr.mxu0 %v6454_v0 }
 0xedf   :  { %2629 = vadd.xlane.f32.xlu0 %v2628_v13  ;;  %5611 = vmatpush3.msra.mxu0 %v5157_v22 }
 0xee0   :  { %5634 = vmatprep.subr.mxu0 %v6454_v0 }
 0xf68   :  { %v2630_v14 = vpop.xlane.xlu0 %2629 }
 0xf69   :  { %v2631_v15 = vmul.f32 0.03125, %v2630_v14  ;;  %v3091_v14 = vshrl.u32 %v3090_v10, 7 }
 0xf6b   :  { %v2632_v16 = vsub.f32 %v2627_v12, %v2631_v15  ;;  %v3093_v15 = vand.u32 127, %v3090_v10 }
 0xf6d   :  { %v2633_v17 = vmul.f32 %v2632_v16, %v2632_v16  ;;  %vm3094_vm6 = vcmp.gt.s32.totalorder %v3093_v15, %v3091_v14 }
 0xf6f   :  { %v2634_v18 = vsel %vm578_vm2, %v2633_v17, 0.0  ;;  %v3095_v17 = vsel %vm3094_vm6, -1e+30, %v6454_v0 }
 0xf70   :  { %2635 = vadd.xlane.f32.xlu1 %v2634_v18 }
 0xff9   :  { %v2636_v30 = vpop.xlane.xlu1 %2635 }
 0xffa   :  { %v2637_v31 = vmul.f32 0.03125, %v2636_v30 }
 0xffc   :  { %v2638_v32 = vadd.f32 1e-05, %v2637_v31 }
 0xffe   :  { %5924 = vrsqrt.f32 %v2638_v32 }
0x100b   :  { %v5925_v33 = vpop.eup %5924 }
0x100c   :  { %v2640_v34 = vmul.f32 %v5925_v33, %v2632_v16 }
0x100e   :  { %v2641_v35 = vmul.f32 %v6850_v5, %v2640_v34  ;;  %v2849_v5 = vld [vmem:[#allocation23 + $0x38] sm:$0xff] }
0x1010   :  { %v7001_v36 = vadd.f32 %v6852_v7, %v2641_v35  ;;  %v2848_v7 = vld [vmem:[#allocation23 + $0x30] sm:$0xff] }
0x1012   :  { %5613 = vmatmul.mubr.msk.f32.vlgmr.msra.gmra.mxu0 %vm578_vm2, %v7001_v36 }
0x1013   :  { %5635 = vmatpush3.msra.mxu0 %v5176_v37  ;;  %5642 = vmatprep.mubr.msk.f32.mxu0 %vm6455_vm0, %v6454_v0 }
0x1014   :  { %5636 = vmatprep.subr.mxu0 %v6454_v0 }
0x1015   :  { %5637 = vmatpush3.msra.mxu0 %v5175_v38 }
0x1016   :  { %5638 = vmatprep.subr.mxu0 %v6454_v0 }
0x1017   :  { %5639 = vmatpush3.msra.mxu0 %v5174_v39 }
0x1018   :  { %5640 = vmatprep.subr.mxu0 %v6454_v0 }
0x1019   :  { %5641 = vmatpush3.msra.mxu0 %v5173_v40 }
0x101a   :  { %5643 = vmatmul.mubr.msk.f32.vlgmr.msra.gmra.mxu0 %vm578_vm2, %v6742_v23  ;;  %5645 = vmatprep.subr.mxu0 %v6454_v0 }
0x101b   :  { %5646 = vmatpush3.msra.mxu0 %v2849_v5  ;;  %5653 = vmatprep.mubr.msk.f32.mxu0 %vm6455_vm0, %v6454_v0 }
0x101c   :  { %5647 = vmatprep.subr.mxu0 %v6454_v0 }
0x101d   :  { %5648 = vmatpush3.msra.mxu0 %v2848_v7 }
0x101e   :  { %5649 = vmatprep.subr.mxu0 %v6454_v0 }
0x101f   :  { %5650 = vmatpush3.msra.mxu0 %v2847_v41 }
0x1020   :  { %5651 = vmatprep.subr.mxu0 %v6454_v0 }
0x1021   :  { %5652 = vmatpush3.msra.mxu0 %v2846_v42 }
0x1022   :  { %5654 = vmatmul.mubr.msk.f32.vlgmr.msra.gmra.mxu0 %vm578_vm2, %v6742_v23  ;;  %5667 = vmatprep.subr.mxu0 %v6454_v0 }
0x1023   :  { %5669 = vmatprep.mubr.msk.f32.mxu0 %vm6455_vm0, %v6454_v0 }
0x10d2   :  { %v2725_v47 = vpop.f32.mrf.mxu0 }
0x10d3   :  { %v2726_v48 = vadd.f32 %v5161_v46, %v2725_v47 }
0x10d4   :  { %v5614_v49 = vpop.f32.mrf.mxu0 }
0x10d5   :  { %v2729_v50 = vmax.f32 %v2726_v48, 0.0 }
0x10d7   :  { %5632 = vmatmul.mubr.msk.f32.vlgmr.msra.gmra.mxu1 %vm1610_vm5, %v2729_v50 }
0x10d8   :  { %5657 = vmatpush3.msra.mxu1 %v2856_v51  ;;  %5664 = vmatprep.mubr.msk.f32.mxu1 %vm6455_vm0, %v6454_v0 }
0x10d9   :  { %5658 = vmatprep.subr.mxu1 %v6454_v0 }
0x10da   :  { %v2934_v55 = vpop.f32.mrf.mxu0  ;;  %5659 = vmatpush3.msra.mxu1 %v2855_v52 }
0x10db   :  { %v2935_v56 = vadd.f32 %v5180_v53, %v2934_v55  ;;  %5660 = vmatprep.subr.mxu1 %v6454_v0 }
0x10dc   :  { %v5644_v21 = vpop.f32.mrf.mxu0  ;;  %5661 = vmatpush3.msra.mxu1 %v2854_v54 }
0x10dd   :  { %5662 = vmatprep.subr.mxu1 %v6454_v0  ;;  %3258 = vrot.lane.b32.xlu1 %v2935_v56, %s6457_s7 }
0x10de   :  { %5663 = vmatpush3.msra.mxu1 %v2853_v57 }
0x10df   :  { %5665 = vmatmul.mubr.msk.f32.vlgmr.msra.gmra.mxu1 %vm578_vm2, %v6742_v23  ;;  %5672 = vmatprep.subr.mxu1 %v6454_v0 }
0x10e0   :  { %5674 = vmatprep.mubr.msk.f32.mxu1 %vm6455_vm0, %v6454_v0 }
0x10e1   :  { %3426 = vrot.lane.b32.xlu1 %v2935_v56, %s6456_s9 }
0x10e2   :  { %v3010_v59 = vpop.f32.mrf.mxu0 }
0x10e3   :  { %v3011_v60 = vadd.f32 %v5182_v58, %v3010_v59 }
0x10e4   :  { %v5655_v61 = vpop.f32.mrf.mxu0 }
0x10e5   :  { %3593 = vrot.lane.b32.xlu1 %v2935_v56, %s6458_s29  ;;  %3260 = vrot.lane.b32.xlu0 %v3011_v60, %s6457_s7 }
0x10e6   :  { %5668 = vmatpush3.xpose.msk.msra.mxu0 %vm804_vm3, %v3011_v60 }
0x10e7   :  { %5677 = vmatprep.subr.mxu0 %v6454_v0 }
0x10e9   :  { %5670 = vmatmul.mubr.msk.f32.vlgmr.msra.gmra.mxu0 %vm804_vm3, %v2935_v56  ;;  %3428 = vrot.lane.b32.xlu0 %v3011_v60, %s6456_s9 }
0x10ea   :  { %5679 = vmatprep.mubr.msk.f32.mxu0 %vm6455_vm0, %v6454_v0 }
0x10ed   :  { %3595 = vrot.lane.b32.xlu0 %v3011_v60, %s6458_s29 }
0x114f   :  { %v3259_v62 = vpop.permute.xlu1 %3258 }
0x1153   :  { %v3427_v2 = vpop.permute.xlu1 %3426 }
0x1157   :  { %v3261_v63 = vpop.permute.xlu0 %3260  ;;  %v3594_v4 = vpop.permute.xlu1 %3593 }
0x1158   :  { %5678 = vmatpush3.xpose.msk.msra.mxu0 %vm804_vm3, %v3261_v63 }
0x1159   :  { %5687 = vmatprep.subr.mxu0 %v6454_v0 }
0x115b   :  { %v3429_v1 = vpop.permute.xlu0 %3428  ;;  %5680 = vmatmul.mubr.msk.f32.vlgmr.msra.gmra.mxu0 %vm804_vm3, %v3259_v62 }
0x115c   :  { %5688 = vmatpush3.xpose.msk.msra.mxu0 %vm804_vm3, %v3429_v1  ;;  %5689 = vmatprep.mubr.msk.f32.mxu0 %vm6455_vm0, %v6454_v0 }
0x115d   :  { %5697 = vmatprep.subr.mxu0 %v6454_v0 }
0x115f   :  { %v3596_v3 = vpop.permute.xlu0 %3595  ;;  %5690 = vmatmul.mubr.msk.f32.vlgmr.msra.gmra.mxu0 %vm804_vm3, %v3427_v2 }
0x1160   :  { %5698 = vmatpush3.xpose.msk.msra.mxu0 %vm804_vm3, %v3596_v3  ;;  %5699 = vmatprep.mubr.msk.f32.mxu0 %vm6455_vm0, %v6454_v0 }
0x1161   :  { %5707 = vmatprep.subr.mxu0 %v6454_v0 }
0x1163   :  { %5700 = vmatmul.mubr.msk.f32.vlgmr.msra.gmra.mxu0 %vm804_vm3, %v3594_v4 }
0x1164   :  { %5715 = vmatprep.mubr.msk.f32.mxu0 %vm6455_vm0, %v6454_v0 }
0x1197   :  { %v7070_v6 = vpop.f32.mrf.mxu1 }
0x1199   :  { %v5633_v8 = vpop.f32.mrf.mxu1 }
0x119f   :  { %v3086_v11 = vpop.f32.mrf.mxu1 }
0x11a0   :  { %v3087_v12 = vadd.f32 %v5184_v9, %v3086_v11 }
0x11a1   :  { %v5666_v13 = vpop.f32.mrf.mxu1 }
0x11a2   :  { %5673 = vmatpush3.msra.mxu1 %v3087_v12 }
0x11a3   :  { %5682 = vmatprep.subr.mxu1 %v6454_v0 }
0x11a9   :  { %v3168_v16 = vpop.f32.mrf.mxu0 }
0x11aa   :  { %v3172_v18 = vmul.f32 0.03125, %v3168_v16 }
0x11ab   :  { %v5671_v19 = vpop.f32.mrf.mxu0 }
0x11ac   :  { %v3173_v20 = vadd.f32 %v3172_v18, %v3095_v17 }
0x11ae   :  { %v3174_v45 = vsel %vm804_vm3, %v3173_v20, -inf }
0x11af   :  { %3175 = vmax.xlane.f32.xlu0 %v3174_v45 }
0x121b   :  { %v3332_v22 = vpop.f32.mrf.mxu0 }
0x121c   :  { %v3336_v24 = vmul.f32 0.03125, %v3332_v22 }
0x121d   :  { %v5681_v25 = vpop.f32.mrf.mxu0 }
0x121e   :  { %v3337_v26 = vadd.f32 %v3336_v24, %v3095_v17 }
0x121f   :  { %v3500_v27 = vpop.f32.mrf.mxu0 }
0x1220   :  { %v3504_v28 = vmul.f32 0.03125, %v3500_v27  ;;  %v3338_v29 = vsel %vm804_vm3, %v3337_v26, -inf }
0x1221   :  { %3339 = vmax.xlane.f32.xlu1 %v3338_v29  ;;  %v5691_v30 = vpop.f32.mrf.mxu0 }
0x1222   :  { %v3505_v31 = vadd.f32 %v3504_v28, %v3095_v17 }
0x1223   :  { %v3667_v32 = vpop.f32.mrf.mxu0 }
0x1224   :  { %v3671_v33 = vmul.f32 0.03125, %v3667_v32  ;;  %v3506_v34 = vsel %vm804_vm3, %v3505_v31, -inf }
0x1225   :  { %3507 = vmax.xlane.f32.xlu0 %v3506_v34  ;;  %v5701_v35 = vpop.f32.mrf.mxu0 }
0x1226   :  { %v3672_v37 = vadd.f32 %v3671_v33, %v3095_v17 }
0x1228   :  { %v3673_v38 = vsel %vm804_vm3, %v3672_v37, -inf }
0x1229   :  { %3674 = vmax.xlane.f32.xlu0 %v3673_v38  ;;  %v3813_v38 = vld [vmem:[#allocation28 + $0x30] sm:$0xff] }
0x1232   :  { %3350 = vrot.lane.b32.xlu1 %v3087_v12, %s6457_s7 }
0x1238   :  { %v3176_v39 = vpop.xlane.xlu0 %3175 }
0x1239   :  { %v3177_v40 = vsub.f32 %v3173_v20, %v3176_v39  ;;  %v5171_v20 = vld [vmem:[#allocation22 + $0x1] ss:$0 sm:$0xff]  ;;  %v3812_v39 = vld [vmem:[#allocation28 + $0x28] sm:$0xff] }
0x123a   :  { %v2817_v45 = vadd.f32 %v5171_v20, %v7070_v6 }
0x123b   :  { %v3178_v5 = vmul.f32 1.442695, %v3177_v40 }
0x123c   :  { %v2820_v22 = vadd.f32 %v2817_v45, %v7001_v36 }
0x123d   :  { %5926 = vpow2.f32 %v3178_v5 }
0x123e   :  { %v2821_v24 = vsel %vm578_vm2, %v2820_v22, 0.0 }
0x124a   :  { %v5927_v7 = vpop.eup %5926 }
0x124b   :  { %v3180_v41 = vsel %vm804_vm3, %v5927_v7, 0.0 }
0x1256   :  { %3181 = vadd.xlane.f32.xlu1 %v3180_v41 }
0x12aa   :  { %v3340_v42 = vpop.xlane.xlu1 %3339 }
0x12ab   :  { %v3341_v43 = vsub.f32 %v3337_v26, %v3340_v42 }
0x12ad   :  { %v3342_v44 = vmul.f32 1.442695, %v3341_v43  ;;  %v3807_v43 = vld [vmem:[#allocation26 + $0x38] sm:$0xff] }
0x12ae   :  { %v3508_v46 = vpop.xlane.xlu0 %3507  ;;  %v3351_v21 = vpop.permute.xlu1 %3350  ;;  %5708 = vmatpush3.msra.mxu0 %v3807_v43 }
0x12af   :  { %5928 = vpow2.f32 %v3342_v44  ;;  %v3509_v47 = vsub.f32 %v3505_v31, %v3508_v46  ;;  %5709 = vmatprep.subr.mxu0 %v6454_v0  ;;  %v3806_v44 = vld [vmem:[#allocation26 + $0x30] sm:$0xff]  ;;  %v3805_v46 = vld [vmem:[#allocation26 + $0x28] sm:$0xff] }
0x12b0   :  { %5710 = vmatpush3.msra.mxu0 %v3806_v44 }
0x12b1   :  { %v3510_v48 = vmul.f32 1.442695, %v3509_v47  ;;  %5711 = vmatprep.subr.mxu0 %v6454_v0  ;;  %v3804_v47 = vld [vmem:[#allocation26 + $0x20] sm:$0xff] }
0x12b2   :  { %v3675_v49 = vpop.xlane.xlu0 %3674  ;;  %5712 = vmatpush3.msra.mxu0 %v3805_v46 }
0x12b3   :  { %5930 = vpow2.f32 %v3510_v48  ;;  %v3676_v50 = vsub.f32 %v3672_v37, %v3675_v49  ;;  %v3814_v37 = vld [vmem:[#allocation28 + $0x38] sm:$0xff]  ;;  %5713 = vmatprep.subr.mxu0 %v6454_v0 }
0x12b4   :  { %5714 = vmatpush3.msra.mxu0 %v3804_v47 }
0x12b5   :  { %v3677_v51 = vmul.f32 1.442695, %v3676_v50  ;;  %5729 = vmatprep.subr.mxu0 %v6454_v0 }
0x12b7   :  { %5932 = vpow2.f32 %v3677_v51 }
0x12bc   :  { %v5929_v52 = vpop.eup %5928 }
0x12bd   :  { %v3344_v53 = vsel %vm804_vm3, %v5929_v52, 0.0 }
0x12be   :  { %3345 = vadd.xlane.f32.xlu0 %v3344_v53  ;;  %v5970_v53 = vld [vmem:[#allocation11] ss:$0 sm:$0xff] }
0x12c0   :  { %v5931_v54 = vpop.eup %5930 }
0x12c1   :  { %v3512_v55 = vsel %vm804_vm3, %v5931_v54, 0.0 }
0x12c2   :  { %3513 = vadd.xlane.f32.xlu1 %v3512_v55  ;;  %v5971_v55 = vld [vmem:[#allocation13] ss:$0 sm:$0xff] }
0x12c4   :  { %v5933_v56 = vpop.eup %5932 }
0x12c5   :  { %v3679_v57 = vsel %vm804_vm3, %v5933_v56, 0.0 }
0x12c6   :  { %3680 = vadd.xlane.f32.xlu0 %v3679_v57 }
0x12d3   :  { %3684 = vrot.lane.b32.xlu1 %v3087_v12, %s6458_s29 }
0x12dc   :  { %3517 = vrot.lane.b32.xlu0 %v3087_v12, %s6456_s9 }
0x12df   :  { %v3182_v58 = vpop.xlane.xlu1 %3181 }
0x12e0   :  { %5934 = vrcp.f32 %v3182_v58 }
0x12ed   :  { %v5935_v59 = vpop.eup %5934 }
0x12ee   :  { %v3184_v60 = vmul.f32 %v5935_v59, %v5927_v7 }
0x12f0   :  { %5675 = vmatmul.mubr.msk.f32.vlgmr.msra.gmra.mxu1 %vm804_vm3, %v3184_v60  ;;  %v7125_v60 = vld [vmem:[#allocation14] ss:$0 sm:$0xff] }
0x12f1   :  { %5683 = vmatpush3.msra.mxu1 %v3351_v21  ;;  %5684 = vmatprep.mubr.msk.f32.mxu1 %vm6455_vm0, %v6454_v0 }
0x12f2   :  { %5692 = vmatprep.subr.mxu1 %v6454_v0 }
0x1347   :  { %v3346_v61 = vpop.xlane.xlu0 %3345 }
0x1348   :  { %5936 = vrcp.f32 %v3346_v61 }
0x134b   :  { %v3514_v62 = vpop.xlane.xlu1 %3513 }
0x134c   :  { %5938 = vrcp.f32 %v3514_v62  ;;  %v7127_v62 = vld [vmem:[#allocation16] ss:$0 sm:$0xff] }
0x134f   :  { %v3681_v63 = vpop.xlane.xlu0 %3680  ;;  %v3685_v9 = vpop.permute.xlu1 %3684 }
0x1350   :  { %5940 = vrcp.f32 %v3681_v63 }
0x1353   :  { %v3518_v3 = vpop.permute.xlu0 %3517 }
0x1355   :  { %v5937_v1 = vpop.eup %5936 }
0x1356   :  { %v3348_v2 = vmul.f32 %v5937_v1, %v5929_v52 }
0x1358   :  { %5685 = vmatmul.mubr.msk.f32.vlgmr.msra.gmra.mxu1 %vm804_vm3, %v3348_v2  ;;  %v3821_v2 = vld [vmem:[#allocation29 + $0x38] sm:$0xff] }
0x1359   :  { %v5939_v4 = vpop.eup %5938  ;;  %5693 = vmatpush3.msra.mxu1 %v3518_v3  ;;  %5694 = vmatprep.mubr.msk.f32.mxu1 %vm6455_vm0, %v6454_v0  ;;  %v3820_v3 = vld [vmem:[#allocation29 + $0x30] sm:$0xff] }
0x135a   :  { %5702 = vmatprep.subr.mxu1 %v6454_v0  ;;  %v3516_v8 = vmul.f32 %v5939_v4, %v5931_v54  ;;  %v3819_v4 = vld [vmem:[#allocation29 + $0x28] sm:$0xff] }
0x135c   :  { %5695 = vmatmul.mubr.msk.f32.vlgmr.msra.gmra.mxu1 %vm804_vm3, %v3516_v8  ;;  %v3818_v8 = vld [vmem:[#allocation29 + $0x20] sm:$0xff] }
0x135d   :  { %v5941_v10 = vpop.eup %5940  ;;  %5703 = vmatpush3.msra.mxu1 %v3685_v9  ;;  %5704 = vmatprep.mubr.msk.f32.mxu1 %vm6455_vm0, %v6454_v0  ;;  %v5205_v9 = vld [vmem:[%s7304_s17 + $0x1] ss:$0 sm:$0xff] }
0x135e   :  { %v3683_v11 = vmul.f32 %v5941_v10, %v5933_v56  ;;  %5718 = vmatprep.subr.mxu1 %v6454_v0 }
0x1360   :  { %5705 = vmatmul.mubr.msk.f32.vlgmr.msra.gmra.mxu1 %vm804_vm3, %v3683_v11 }
0x1361   :  { %5726 = vmatprep.mubr.msk.f32.mxu1 %vm6455_vm0, %v6454_v0  ;;  %5719 = vmatpush3.msra.mxu1 %v3814_v37 }
0x1362   :  { %5720 = vmatprep.subr.mxu1 %v6454_v0 }
0x1363   :  { %5721 = vmatpush3.msra.mxu1 %v3813_v38 }
0x1364   :  { %5722 = vmatprep.subr.mxu1 %v6454_v0 }
0x1365   :  { %5723 = vmatpush3.msra.mxu1 %v3812_v39 }
0x1366   :  { %5724 = vmatprep.subr.mxu1 %v6454_v0 }
0x13b0   :  { %v3254_v12 = vpop.f32.mrf.mxu1 }
0x13b2   :  { %v5676_v13 = vpop.f32.mrf.mxu1 }
0x13b3   :  { %v5203_v13 = vld [vmem:[%s7305_s20 + $0x1] ss:$0 sm:$0xff] }
0x1418   :  { %v3422_v14 = vpop.f32.mrf.mxu1 }
0x1419   :  { %3761 = vrot.lane.b32.xlu1 %v3422_v14, %s6441_s26 }
0x141a   :  { %v5686_v15 = vpop.f32.mrf.mxu1 }
0x141c   :  { %v3589_v16 = vpop.f32.mrf.mxu1 }
0x141d   :  { %3765 = vrot.lane.b32.xlu0 %v3589_v16, %s6436_s3 }
0x141e   :  { %v5696_v17 = vpop.f32.mrf.mxu1 }
0x141f   :  { %v5207_v17 = vld [vmem:[%s7306_s0 + $0x1] ss:$0 sm:$0xff] }
0x1420   :  { %v3756_v18 = vpop.f32.mrf.mxu1 }
0x1421   :  { %3769 = vrot.lane.b32.xlu1 %v3756_v18, %s6459_s8 }
0x1422   :  { %v5706_v19 = vpop.f32.mrf.mxu1 }
0x143c   :  { %2822 = vadd.xlane.f32.xlu0 %v2821_v24 }
0x148b   :  { %v3762_v25 = vpop.permute.xlu1 %3761 }
0x148c   :  { %v3772_v27 = vsel %vm804_vm3, %v3254_v12, %v3762_v25 }
0x148f   :  { %v3766_v26 = vpop.permute.xlu0 %3765 }
0x1490   :  { %v3773_v28 = vsel %vm405_vm1, %v3772_v27, %v3766_v26 }
0x1493   :  { %v3770_v29 = vpop.permute.xlu1 %3769 }
0x1494   :  { %v3774_v30 = vsel %vm1479_vm4, %v3773_v28, %v3770_v29 }
0x1495   :  { %v3775_v31 = vadd.f32 %v3774_v30, %v6742_v23  ;;  %v3811_v23 = vld [vmem:[#allocation28 + $0x20] sm:$0xff] }
0x1496   :  { %5725 = vmatpush3.msra.mxu1 %v3811_v23 }
0x1497   :  { %v3776_v32 = vsel %vm578_vm2, %v3775_v31, 0.0  ;;  %5740 = vmatprep.subr.mxu1 %v6454_v0 }
0x1498   :  { %3777 = vadd.xlane.f32.xlu1 %v3776_v32 }
0x14c5   :  { %v2823_v6 = vpop.xlane.xlu0 %2822 }
0x14c6   :  { %v2824_v33 = vmul.f32 0.03125, %v2823_v6 }
0x14c8   :  { %v2825_v36 = vsub.f32 %v2820_v22, %v2824_v33 }
0x14ca   :  { %v2826_v34 = vmul.f32 %v2825_v36, %v2825_v36 }
0x14cc   :  { %v2827_v35 = vsel %vm578_vm2, %v2826_v34, 0.0 }
0x14cd   :  { %2828 = vadd.xlane.f32.xlu0 %v2827_v35 }
0x1521   :  { %v3778_v40 = vpop.xlane.xlu1 %3777 }
0x1522   :  { %v3779_v5 = vmul.f32 0.03125, %v3778_v40 }
0x1524   :  { %v3780_v7 = vsub.f32 %v3775_v31, %v3779_v5 }
0x1526   :  { %v3781_v41 = vmul.f32 %v3780_v7, %v3780_v7 }
0x1528   :  { %v3782_v42 = vsel %vm578_vm2, %v3781_v41, 0.0 }
0x1529   :  { %3783 = vadd.xlane.f32.xlu0 %v3782_v42 }
0x1556   :  { %v2829_v48 = vpop.xlane.xlu0 %2828 }
0x1557   :  { %v2830_v49 = vmul.f32 0.03125, %v2829_v48 }
0x1559   :  { %v2831_v50 = vadd.f32 1e-05, %v2830_v49 }
0x155b   :  { %5942 = vrsqrt.f32 %v2831_v50 }
0x1568   :  { %v5943_v51 = vpop.eup %5942 }
0x1569   :  { %v2833_v52 = vmul.f32 %v5943_v51, %v2825_v36 }
0x156b   :  { %v2834_v54 = vmul.f32 %v5970_v53, %v2833_v52 }
0x156d   :  { %v2835_v56 = vadd.f32 %v5971_v55, %v2834_v54 }
0x156f   :  { %5727 = vmatmul.mubr.msk.f32.vlgmr.msra.gmra.mxu1 %vm578_vm2, %v2835_v56 }
0x1570   :  { %5742 = vmatprep.mubr.msk.f32.mxu1 %vm6455_vm0, %v6454_v0 }
0x15b2   :  { %v3784_v57 = vpop.xlane.xlu0 %3783 }
0x15b3   :  { %v3785_v21 = vmul.f32 0.03125, %v3784_v57 }
0x15b5   :  { %v3786_v58 = vadd.f32 1e-05, %v3785_v21 }
0x15b7   :  { %5944 = vrsqrt.f32 %v3786_v58 }
0x15c4   :  { %v5945_v59 = vpop.eup %5944 }
0x15c5   :  { %v3788_v61 = vmul.f32 %v5945_v59, %v3780_v7 }
0x15c7   :  { %v3795_v63 = vmul.f32 %v7125_v60, %v3788_v61 }
0x15c9   :  { %v7131_v1 = vadd.f32 %v7127_v62, %v3795_v63 }
0x15cb   :  { %5716 = vmatmul.mubr.msk.f32.vlgmr.msra.gmra.mxu0 %vm578_vm2, %v7131_v1 }
0x15cc   :  { %5730 = vmatpush3.msra.mxu0 %v3821_v2  ;;  %5737 = vmatprep.mubr.msk.f32.mxu0 %vm6455_vm0, %v6454_v0 }
0x15cd   :  { %5731 = vmatprep.subr.mxu0 %v6454_v0 }
0x15ce   :  { %5732 = vmatpush3.msra.mxu0 %v3820_v3 }
0x15cf   :  { %5733 = vmatprep.subr.mxu0 %v6454_v0 }
0x15d0   :  { %5734 = vmatpush3.msra.mxu0 %v3819_v4 }
0x15d1   :  { %5735 = vmatprep.subr.mxu0 %v6454_v0 }
0x15d2   :  { %5736 = vmatpush3.msra.mxu0 %v3818_v8 }
0x15d3   :  { %5738 = vmatmul.mubr.msk.f32.vlgmr.msra.gmra.mxu0 %vm578_vm2, %v2835_v56  ;;  %5750 = vmatprep.subr.mxu0 %v6454_v0 }
0x15d4   :  { %5752 = vmatprep.mubr.msk.f32.mxu0 %vm6455_vm0, %v6454_v0 }
0x162f   :  { %v3978_v10 = vpop.f32.mrf.mxu1 }
0x1630   :  { %v3979_v11 = vadd.f32 %v5205_v9, %v3978_v10 }
0x1631   :  { %v5728_v12 = vpop.f32.mrf.mxu1 }
0x1632   :  { %4221 = vrot.lane.b32.xlu1 %v3979_v11, %s6457_s7  ;;  %5741 = vmatpush3.xpose.msk.msra.mxu1 %vm804_vm3, %v3979_v11 }
0x1633   :  { %5745 = vmatprep.subr.mxu1 %v6454_v0 }
0x1636   :  { %4388 = vrot.lane.b32.xlu1 %v3979_v11, %s6456_s9 }
0x168b   :  { %v3899_v14 = vpop.f32.mrf.mxu0 }
0x168c   :  { %v3900_v15 = vadd.f32 %v5203_v13, %v3899_v14 }
0x168d   :  { %v5717_v16 = vpop.f32.mrf.mxu0 }
0x168e   :  { %4386 = vrot.lane.b32.xlu1 %v3900_v15, %s6456_s9  ;;  %4219 = vrot.lane.b32.xlu0 %v3900_v15, %s6457_s7 }
0x168f   :  { %5743 = vmatmul.mubr.msk.f32.vlgmr.msra.gmra.mxu1 %vm804_vm3, %v3900_v15 }
0x1690   :  { %5747 = vmatprep.mubr.msk.f32.mxu1 %vm6455_vm0, %v6454_v0 }
0x1692   :  { %4552 = vrot.lane.b32.xlu1 %v3900_v15, %s6458_s29  ;;  %4554 = vrot.lane.b32.xlu0 %v3979_v11, %s6458_s29 }
0x1693   :  { %v4054_v18 = vpop.f32.mrf.mxu0 }
0x1694   :  { %v7158_v19 = vadd.f32 %v5207_v17, %v4054_v18 }
0x1695   :  { %v5739_v20 = vpop.f32.mrf.mxu0 }
0x1696   :  { %5746 = vmatpush3.msra.mxu1 %v7158_v19 }
0x1697   :  { %5755 = vmatprep.subr.mxu1 %v6454_v0 }
0x16a4   :  { %v4222_v45 = vpop.permute.xlu1 %4221 }
0x16a5   :  { %5751 = vmatpush3.xpose.msk.msra.mxu0 %vm804_vm3, %v4222_v45 }
0x16a6   :  { %5760 = vmatprep.subr.mxu0 %v6454_v0 }
0x16a8   :  { %v4389_v22 = vpop.permute.xlu1 %4388 }
0x1700   :  { %v4220_v24 = vpop.permute.xlu0 %4219  ;;  %v4387_v25 = vpop.permute.xlu1 %4386 }
0x1701   :  { %5753 = vmatmul.mubr.msk.f32.vlgmr.msra.gmra.mxu0 %vm804_vm3, %v4220_v24 }
0x1702   :  { %5761 = vmatpush3.xpose.msk.msra.mxu0 %vm804_vm3, %v4389_v22  ;;  %5762 = vmatprep.mubr.msk.f32.mxu0 %vm6455_vm0, %v6454_v0 }
0x1703   :  { %5770 = vmatprep.subr.mxu0 %v6454_v0 }
0x1704   :  { %v4555_v26 = vpop.permute.xlu0 %4554  ;;  %v4553_v27 = vpop.permute.xlu1 %4552 }
0x1705   :  { %5763 = vmatmul.mubr.msk.f32.vlgmr.msra.gmra.mxu0 %vm804_vm3, %v4387_v25 }
0x1706   :  { %5771 = vmatpush3.xpose.msk.msra.mxu0 %vm804_vm3, %v4555_v26  ;;  %5772 = vmatprep.mubr.msk.f32.mxu0 %vm6455_vm0, %v6454_v0 }
0x1707   :  { %5780 = vmatprep.subr.mxu0 %v6454_v0 }
0x1709   :  { %5773 = vmatmul.mubr.msk.f32.vlgmr.msra.gmra.mxu0 %vm804_vm3, %v4553_v27 }
0x170a   :  { %5788 = vmatprep.mubr.msk.f32.mxu0 %vm6455_vm0, %v6454_v0 }
0x174f   :  { %v4130_v28 = vpop.f32.mrf.mxu1 }
0x1750   :  { %v4134_v29 = vmul.f32 0.03125, %v4130_v28 }
0x1751   :  { %v5744_v30 = vpop.f32.mrf.mxu1 }
0x1752   :  { %v4135_v31 = vsel %vm804_vm3, %v4134_v29, -inf }
0x1753   :  { %4136 = vmax.xlane.f32.xlu0 %v4135_v31 }
0x17c1   :  { %v4293_v32 = vpop.f32.mrf.mxu0 }
0x17c2   :  { %v4297_v6 = vmul.f32 0.03125, %v4293_v32 }
0x17c3   :  { %v5754_v33 = vpop.f32.mrf.mxu0 }
0x17c4   :  { %v4298_v36 = vsel %vm804_vm3, %v4297_v6, -inf }
0x17c5   :  { %4299 = vmax.xlane.f32.xlu1 %v4298_v36  ;;  %v4460_v34 = vpop.f32.mrf.mxu0 }
0x17c6   :  { %v4464_v35 = vmul.f32 0.03125, %v4460_v34 }
0x17c7   :  { %v5764_v37 = vpop.f32.mrf.mxu0 }
0x17c8   :  { %v4465_v38 = vsel %vm804_vm3, %v4464_v35, -inf }
0x17c9   :  { %4466 = vmax.xlane.f32.xlu0 %v4465_v38  ;;  %v4626_v39 = vpop.f32.mrf.mxu0 }
0x17ca   :  { %v4630_v23 = vmul.f32 0.03125, %v4626_v39  ;;  %v4753_v39 = vld [vmem:[#allocation31 + $0x38] sm:$0xff] }
0x17cb   :  { %v5774_v40 = vpop.f32.mrf.mxu0  ;;  %5781 = vmatpush3.msra.mxu0 %v4753_v39 }
0x17cc   :  { %v4631_v5 = vsel %vm804_vm3, %v4630_v23, -inf  ;;  %5782 = vmatprep.subr.mxu0 %v6454_v0  ;;  %v4750_v40 = vld [vmem:[#allocation31 + $0x20] sm:$0xff] }
0x17cd   :  { %4632 = vmax.xlane.f32.xlu0 %v4631_v5  ;;  %v5231_v5 = vld [vmem:[%s6644_s27 + $0x78] sm:$0xff] }
0x17d6   :  { %4310 = vrot.lane.b32.xlu1 %v7158_v19, %s6457_s7 }
0x17dc   :  { %v4137_v7 = vpop.xlane.xlu0 %4136 }
0x17dd   :  { %v4138_v41 = vsub.f32 %v4134_v29, %v4137_v7  ;;  %v5230_v7 = vld [vmem:[%s6644_s27 + $0x70] sm:$0xff] }
0x17df   :  { %v4139_v42 = vmul.f32 1.442695, %v4138_v41  ;;  %v5229_v41 = vld [vmem:[%s6644_s27 + $0x68] sm:$0xff] }
0x17e1   :  { %5946 = vpow2.f32 %v4139_v42  ;;  %v5228_v42 = vld [vmem:[%s6644_s27 + $0x60] sm:$0xff] }
0x17ee   :  { %v5947_v43 = vpop.eup %5946 }
0x17ef   :  { %v4141_v44 = vsel %vm804_vm3, %v5947_v43, 0.0 }
0x17fa   :  { %4142 = vadd.xlane.f32.xlu1 %v4141_v44 }
0x184e   :  { %v4300_v46 = vpop.xlane.xlu1 %4299 }
0x184f   :  { %v4301_v47 = vsub.f32 %v4297_v6, %v4300_v46 }
0x1851   :  { %v4302_v48 = vmul.f32 1.442695, %v4301_v47 }
0x1852   :  { %v4467_v49 = vpop.xlane.xlu0 %4466  ;;  %v4311_v61 = vpop.permute.xlu1 %4310 }
0x1853   :  { %5948 = vpow2.f32 %v4302_v48  ;;  %v4468_v50 = vsub.f32 %v4464_v35, %v4467_v49 }
0x1855   :  { %v4469_v51 = vmul.f32 1.442695, %v4468_v50 }
0x1856   :  { %v4633_v52 = vpop.xlane.xlu0 %4632 }
0x1857   :  { %5950 = vpow2.f32 %v4469_v51  ;;  %v4634_v53 = vsub.f32 %v4630_v23, %v4633_v52  ;;  %v4752_v23 = vld [vmem:[#allocation31 + $0x30] sm:$0xff]  ;;  %v5226_v52 = vld [vmem:[%s6644_s27 + $0x50] sm:$0xff] }
0x1858   :  { %5783 = vmatpush3.msra.mxu0 %v4752_v23 }
0x1859   :  { %v4635_v54 = vmul.f32 1.442695, %v4634_v53  ;;  %5784 = vmatprep.subr.mxu0 %v6454_v0  ;;  %v5225_v53 = vld [vmem:[%s6644_s27 + $0x48] sm:$0xff] }
0x185b   :  { %5952 = vpow2.f32 %v4635_v54  ;;  %v5224_v54 = vld [vmem:[%s6644_s27 + $0x40] sm:$0xff] }
0x1860   :  { %v5949_v55 = vpop.eup %5948 }
0x1861   :  { %v4304_v56 = vsel %vm804_vm3, %v5949_v55, 0.0 }
0x1862   :  { %4305 = vadd.xlane.f32.xlu0 %v4304_v56 }
0x1864   :  { %v5951_v57 = vpop.eup %5950 }
0x1865   :  { %v4471_v21 = vsel %vm804_vm3, %v5951_v57, 0.0 }
0x1866   :  { %4472 = vadd.xlane.f32.xlu1 %v4471_v21 }
0x1868   :  { %v5953_v58 = vpop.eup %5952 }
0x1869   :  { %v4637_v59 = vsel %vm804_vm3, %v5953_v58, 0.0 }
0x186a   :  { %4638 = vadd.xlane.f32.xlu0 %v4637_v59  ;;  %v5233_v59 = vld [vmem:[%s6649_s24 + $0x1] ss:$0 sm:$0xff]  ;;  %s6460_s24 = smov [#allocation32]  }
0x1877   :  { %4642 = vrot.lane.b32.xlu1 %v7158_v19, %s6458_s29 }
0x1880   :  { %4476 = vrot.lane.b32.xlu0 %v7158_v19, %s6456_s9 }
0x1883   :  { %v4143_v63 = vpop.xlane.xlu1 %4142 }
0x1884   :  { %5954 = vrcp.f32 %v4143_v63 }
0x1891   :  { %v5955_v2 = vpop.eup %5954 }
0x1892   :  { %v4145_v3 = vmul.f32 %v5955_v2, %v5947_v43  ;;  %v5227_v43 = vld [vmem:[%s6644_s27 + $0x58] sm:$0xff] }
0x1894   :  { %5748 = vmatmul.mubr.msk.f32.vlgmr.msra.gmra.mxu1 %vm804_vm3, %v4145_v3 }
0x1895   :  { %5756 = vmatpush3.msra.mxu1 %v4311_v61  ;;  %5757 = vmatprep.mubr.msk.f32.mxu1 %vm6455_vm0, %v6454_v0 }
0x1896   :  { %5765 = vmatprep.subr.mxu1 %v6454_v0 }
0x18eb   :  { %v4306_v4 = vpop.xlane.xlu0 %4305 }
0x18ec   :  { %5956 = vrcp.f32 %v4306_v4 }
0x18ef   :  { %v4473_v8 = vpop.xlane.xlu1 %4472 }
0x18f0   :  { %5958 = vrcp.f32 %v4473_v8 }
0x18f3   :  { %v4639_v9 = vpop.xlane.xlu0 %4638  ;;  %v4643_v15 = vpop.permute.xlu1 %4642 }
0x18f4   :  { %5960 = vrcp.f32 %v4639_v9 }
0x18f7   :  { %v4477_v12 = vpop.permute.xlu0 %4476 }
0x18f9   :  { %v5957_v10 = vpop.eup %5956 }
0x18fa   :  { %v4308_v11 = vmul.f32 %v5957_v10, %v5949_v55  ;;  %v5222_v55 = vld [vmem:[%s6639_s6 + $0x1] ss:$0 sm:$0xff]  ;;  %s5044_s6 = sshll.u32 %s6460_s24, 4  ;;  %s5045_s6 = int_to_ptr.vmem [resolvable:$true] %s5044_s6 }
0x18fb   :  { %s6352_s27 = scalar_lea.vmem %s5045_s6, 128  ;;  %p6357_p12 = scmp.lt.s32.totalorder %s5045_s6, %s5045_s6 }
0x18fc   :  { %5758 = vmatmul.mubr.msk.f32.vlgmr.msra.gmra.mxu1 %vm804_vm3, %v4308_v11  ;;  %p6353_p11 = scmp.ne.s32.totalorder %s5045_s6, %s6352_s27  ;;  %p6358_p13 = scmp.lt.s32.totalorder %s6352_s27, %s6352_s27 }
0x18fd   :  { %v5959_v13 = vpop.eup %5958  ;;  %5766 = vmatpush3.msra.mxu1 %v4477_v12  ;;  %5767 = vmatprep.mubr.msk.f32.mxu1 %vm6455_vm0, %v6454_v0 }
0x18fe   :  { %5775 = vmatprep.subr.mxu1 %v6454_v0  ;;  %v4475_v14 = vmul.f32 %v5959_v13, %v5951_v57  ;;  %p6359_p0 = por %p6358_p13, %p6357_p12 }
0x1900   :  { %5768 = vmatmul.mubr.msk.f32.vlgmr.msra.gmra.mxu1 %vm804_vm3, %v4475_v14  ;;  %p6360_p1 = pnand %p6359_p0, %p6353_p11 }
0x1901   :  { %v5961_v16 = vpop.eup %5960  ;;  %5776 = vmatpush3.msra.mxu1 %v4643_v15  ;;  %5777 = vmatprep.mubr.msk.f32.mxu1 %vm6455_vm0, %v6454_v0 }
0x1902   :  { %v4641_v17 = vmul.f32 %v5961_v16, %v5953_v58  ;;  %5791 = vmatprep.subr.mxu1 %v6454_v0 }
0x1904   :  { %5778 = vmatmul.mubr.msk.f32.vlgmr.msra.gmra.mxu1 %vm804_vm3, %v4641_v17 }
0x1905   :  { %5807 = vmatprep.mubr.msk.f32.mxu1 %vm6455_vm0, %v6454_v0  ;;  %5792 = vmatpush3.msra.mxu1 %v5231_v5 }
0x1906   :  { %5793 = vmatprep.subr.mxu1 %v6454_v0 }
0x1907   :  { %5794 = vmatpush3.msra.mxu1 %v5230_v7 }
0x1908   :  { %5795 = vmatprep.subr.mxu1 %v6454_v0 }
0x1909   :  { %5796 = vmatpush3.msra.mxu1 %v5229_v41 }
0x190a   :  { %5797 = vmatprep.subr.mxu1 %v6454_v0 }
0x190b   :  { %5798 = vmatpush3.msra.mxu1 %v5228_v42 }
0x190c   :  { %5799 = vmatprep.subr.mxu1 %v6454_v0 }
0x190d   :  { %5800 = vmatpush3.msra.mxu1 %v5227_v43 }
0x190e   :  { %5801 = vmatprep.subr.mxu1 %v6454_v0 }
0x190f   :  { %5802 = vmatpush3.msra.mxu1 %v5226_v52 }
0x1910   :  { %5803 = vmatprep.subr.mxu1 %v6454_v0 }
0x1911   :  { %5804 = vmatpush3.msra.mxu1 %v5225_v53 }
0x1912   :  { %5805 = vmatprep.subr.mxu1 %v6454_v0 }
0x1913   :  { %5806 = vmatpush3.msra.mxu1 %v5224_v54 }
0x1954   :  { %v4215_v18 = vpop.f32.mrf.mxu1 }
0x1956   :  { %v5749_v19 = vpop.f32.mrf.mxu1 }
0x19bc   :  { %v4382_v20 = vpop.f32.mrf.mxu1 }
0x19bd   :  { %4719 = vrot.lane.b32.xlu1 %v4382_v20, %s6441_s26 }
0x19be   :  { %v5759_v45 = vpop.f32.mrf.mxu1 }
0x19c0   :  { %v4548_v22 = vpop.f32.mrf.mxu1 }
0x19c1   :  { %4723 = vrot.lane.b32.xlu0 %v4548_v22, %s6436_s3  ;;  %s7307_s3 = sld [smem:[#allocation45_spill]] }
0x19c2   :  { %v5769_v24 = vpop.f32.mrf.mxu1 }
0x19c4   :  { %v4714_v25 = vpop.f32.mrf.mxu1 }
0x19c5   :  { %4727 = vrot.lane.b32.xlu1 %v4714_v25, %s6459_s8  ;;  %v5235_v25 = vld [vmem:[#allocation10] ss:$0 sm:$0xff] }
0x19c6   :  { %v5779_v26 = vpop.f32.mrf.mxu1 }
0x19c7   :  { %v4945_v13 = vld [vmem:[%s7307_s3 + $0x18] sm:$0xff]  ;;  %v4944_v14 = vld [vmem:[%s7307_s3 + $0x10] sm:$0xff]  ;;  %v4943_v15 = vld [vmem:[%s7307_s3 + $0x8] sm:$0xff] }
0x19c8   :  { %v4942_v16 = vld [vmem:[%s7307_s3] sm:$0xff] }
0x1a2f   :  { %v4720_v27 = vpop.permute.xlu1 %4719 }
0x1a30   :  { %v4730_v29 = vsel %vm804_vm3, %v4215_v18, %v4720_v27 }
0x1a33   :  { %v4724_v28 = vpop.permute.xlu0 %4723 }
0x1a34   :  { %v4731_v30 = vsel %vm405_vm1, %v4730_v29, %v4724_v28 }
0x1a37   :  { %v4728_v31 = vpop.permute.xlu1 %4727 }
0x1a38   :  { %v4732_v32 = vsel %vm1479_vm4, %v4731_v30, %v4728_v31 }
0x1a39   :  { %v4733_v6 = vadd.f32 %v4732_v32, %v7131_v1  ;;  %v4751_v1 = vld [vmem:[#allocation31 + $0x28] sm:$0xff] }
0x1a3a   :  { %5785 = vmatpush3.msra.mxu0 %v4751_v1 }
0x1a3b   :  { %v4734_v33 = vsel %vm578_vm2, %v4733_v6, 0.0  ;;  %5786 = vmatprep.subr.mxu0 %v6454_v0 }
0x1a3c   :  { %4735 = vadd.xlane.f32.xlu0 %v4734_v33  ;;  %5787 = vmatpush3.msra.mxu0 %v4750_v40 }
0x1a3d   :  { %5810 = vmatprep.subr.mxu0 %v6454_v0 }
0x1ac5   :  { %v4736_v36 = vpop.xlane.xlu0 %4735 }
0x1ac6   :  { %v4737_v34 = vmul.f32 0.03125, %v4736_v36 }
0x1ac8   :  { %v4738_v35 = vsub.f32 %v4733_v6, %v4737_v34 }
0x1aca   :  { %v4739_v37 = vmul.f32 %v4738_v35, %v4738_v35 }
0x1acc   :  { %v4740_v38 = vsel %vm578_vm2, %v4739_v37, 0.0 }
0x1acd   :  { %4741 = vadd.xlane.f32.xlu1 %v4740_v38 }
0x1b56   :  { %v4742_v44 = vpop.xlane.xlu1 %4741 }
0x1b57   :  { %v4743_v46 = vmul.f32 0.03125, %v4742_v44 }
0x1b59   :  { %v4744_v47 = vadd.f32 1e-05, %v4743_v46 }
0x1b5b   :  { %5962 = vrsqrt.f32 %v4744_v47 }
0x1b68   :  { %v5963_v48 = vpop.eup %5962 }
0x1b69   :  { %v4746_v49 = vmul.f32 %v5963_v48, %v4738_v35 }
0x1b6b   :  { %v4747_v50 = vmul.f32 %v7125_v60, %v4746_v49 }
0x1b6d   :  { %v4748_v51 = vadd.f32 %v7127_v62, %v4747_v50 }
0x1b6f   :  { %5789 = vmatmul.mubr.msk.f32.vlgmr.msra.gmra.mxu0 %vm578_vm2, %v4748_v51 }
0x1b70   :  { %5818 = vmatprep.mubr.msk.f32.mxu0 %vm6455_vm0, %v6454_v0  ;;  %5811 = vmatpush3.msra.mxu0 %v4945_v13 }
0x1b71   :  { %5812 = vmatprep.subr.mxu0 %v6454_v0 }
0x1b72   :  { %5813 = vmatpush3.msra.mxu0 %v4944_v14 }
0x1b73   :  { %5814 = vmatprep.subr.mxu0 %v6454_v0 }
0x1b74   :  { %5815 = vmatpush3.msra.mxu0 %v4943_v15 }
0x1b75   :  { %5816 = vmatprep.subr.mxu0 %v6454_v0 }
0x1b76   :  { %5817 = vmatpush3.msra.mxu0 %v4942_v16 }
0x1c2f   :  { %v4831_v56 = vpop.f32.mrf.mxu0 }
0x1c30   :  { %v4832_v57 = vadd.f32 %v5222_v55, %v4831_v56 }
0x1c31   :  { %v5790_v21 = vpop.f32.mrf.mxu0 }
0x1c32   :  { %v4835_v58 = vmax.f32 %v4832_v57, 0.0 }
0x1c34   :  { %5808 = vmatmul.mubr.msk.f32.vlgmr.msra.gmra.mxu1 %vm1610_vm5, %v4835_v58 }
0x1cf4   :  { %v4922_v61 = vpop.f32.mrf.mxu1 }
0x1cf5   :  { %v4923_v63 = vadd.f32 %v5233_v59, %v4922_v61 }
0x1cf6   :  { %v5809_v2 = vpop.f32.mrf.mxu1 }
0x1cf7   :  { %v4926_v3 = vadd.f32 %v4923_v63, %v4748_v51 }
0x1cf9   :  { %v4927_v4 = vsel %vm578_vm2, %v4926_v3, 0.0 }
0x1cfa   :  { %4928 = vadd.xlane.f32.xlu0 %v4927_v4 }
0x1d83   :  { %v4929_v8 = vpop.xlane.xlu0 %4928 }
0x1d84   :  { %v4930_v9 = vmul.f32 0.03125, %v4929_v8 }
0x1d86   :  { %v4931_v10 = vsub.f32 %v4926_v3, %v4930_v9 }
0x1d88   :  { %v4932_v11 = vmul.f32 %v4931_v10, %v4931_v10 }
0x1d8a   :  { %v4933_v12 = vsel %vm578_vm2, %v4932_v11, 0.0 }
0x1d8b   :  { %4934 = vadd.xlane.f32.xlu0 %v4933_v12 }
0x1e14   :  { %v4935_v17 = vpop.xlane.xlu0 %4934 }
0x1e15   :  { %v4936_v18 = vmul.f32 0.03125, %v4935_v17 }
0x1e17   :  { %v4937_v19 = vadd.f32 1e-05, %v4936_v18 }
0x1e19   :  { %5964 = vrsqrt.f32 %v4937_v19 }
0x1e26   :  { %v5965_v20 = vpop.eup %5964 }
0x1e27   :  { %v4939_v45 = vmul.f32 %v5965_v20, %v4931_v10 }
0x1e29   :  { %v4940_v22 = vmul.f32 %v7125_v60, %v4939_v45 }
0x1e2b   :  { %v4941_v24 = vadd.f32 %v7127_v62, %v4940_v22 }
0x1e2d   :  { %5819 = vmatmul.mubr.msk.f32.vlgmr.msra.gmra.mxu0 %vm578_vm2, %v4941_v24 }
0x1eed   :  { %v5022_v26 = vpop.f32.mrf.mxu0 }
0x1eee   :  { %v5023_v27 = vadd.f32 %v5235_v25, %v5022_v26 }
0x1eef   :  { %v5820_v28 = vpop.f32.mrf.mxu0 }
0x1ef0   :  { %v5026_v29 = vsel %vm405_vm1, %v5023_v27, -inf }
0x1ef1   :  { %5027 = vmax.xlane.f32.xlu1 %v5026_v29 }
0x1f7a   :  { %v5028_v0 = vpop.xlane.xlu1 %5027 }
0x1f7b   :  { %v5029_v30 = vsub.f32 %v5023_v27, %v5028_v0 }
0x1f7d   :  { %v5030_v31 = vmul.f32 1.442695, %v5029_v30 }
0x1f7f   :  { %5966 = vpow2.f32 %v5030_v31 }
0x1f8c   :  { %v5967_v32 = vpop.eup %5966 }
0x1f8d   :  { %v5032_v6 = vsel %vm405_vm1, %v5967_v32, 0.0 }
0x1f8e   :  { %5033 = vadd.xlane.f32.xlu0 %v5032_v6 }
0x2017   :  { %v5034_v60 = vpop.xlane.xlu0 %5033 }
0x2018   :  { %5968 = vrcp.f32 %v5034_v60 }
0x2025   :  { %v5969_v62 = vpop.eup %5968 }
0x2026   :  { %v5036_v33 = vmul.f32 %v5969_v62, %v5967_v32 }
0x2028   :  { %5037 = vst.msk [vmem:[#allocation32] sm:$0xff] %vm405_vm1, %v5036_v33 }
0x2029   :  { %6363 = shalt.err (!%p6360_p1)
}
0x202a   :  { %5047 = dma.vmem_to_hbm [thread:$0]  %s5045_s6, 128, %s6654_s4, [#allocation4]  }
0x202b   :  { %6392 = dma.done.wait [#allocation4], 128  }
0x202c   :  { %6393 = vsyncadd [#allocation4], 4294967168 }
0x202d   :  { %5051 = vsyncpa [#allocation3], 1 }
0x202e   :  { %5052 = vsyncpa [#allocation6], 1 }
0x202f   :  { %5053 = vsyncpa [#allocation9], 1 }
0x2030   :  { %5054 = vsyncpa [#allocation12], 1 }
0x2031   :  { %5055 = vsyncpa [#allocation15], 1 }
0x2032   :  { %5056 = vsyncpa [#allocation18], 1 }
0x2033   :  { %5057 = vsyncpa [#allocation21], 1 }
0x2034   :  { %5058 = vsyncpa [#allocation24], 1 }
0x2035   :  { %5059 = vsyncpa [#allocation27], 1 }
0x2036   :  { %5060 = vsyncpa [#allocation30], 1 }
0x2037   :  { %5061 = vsyncpa [#allocation4], 1 }

</bundles_post_ra>
